<compile_context>
chip_gen: v5e
topology: v5e:2x2
jax: 0.10.0
libtpu: 0.0.40
codegen_flags: <defaults>
</compile_context>

<pallas_src>
import jax
import jax.numpy as jnp
from jax import lax
from jax.experimental import pallas as pl
from jax.experimental.pallas import tpu as pltpu


def _recip(x):
  """Reciprocal via EUP approx + one Newton step (~f32 accurate, cheap)."""
  r = pl.reciprocal(x, approx=True)
  return r * (2.0 - x * r)


# --------------------------------------------------------------------------
# Fused kernel: MRC init + num_layers GCNWMMSELayer_SISOAdhoc iterations for
# one batch block (TB batch elements on the lane axis) per grid step.
# --------------------------------------------------------------------------
def _make_gcnwmmse_kernel(num_layers, num_channels):
  C = num_channels

  def kernel(par_ref, d_re_ref, d_im_ref, h2_ref, noise_ref, maxpow_ref,
             out_ref):
    d_re = d_re_ref[...]          # (K, TB)   diag(H) real
    d_im = d_im_ref[...]          # (K, TB)   diag(H) imag
    h2 = h2_ref[...]              # (K, K, TB)  |H|^2, [rx_user i, tx_bs j, b]
    noise = noise_ref[...]        # (K, TB)
    maxpow = maxpow_ref[...]      # (K, TB)

    K, TB = d_re.shape
    zeros = jnp.zeros((K, TB), jnp.float32)

    # layer-invariant quantities (hoisted out of the layer loop)
    sqrt_maxpow = jnp.sqrt(maxpow)
    inv_sqrt_maxpow = lax.rsqrt(maxpow)
    # SMEM parameter table read once (shared params across layers)
    par = [[par_ref[r, c] for c in range(C)] for r in range(6)]

    # TODO(synk): algo.downlink_mrc is not provided; using the standard SISO
    # MRC init v0 = sqrt(P_k) * conj(h_kk) / |h_kk| (matched filter, max pow).
    inv_dabs = lax.rsqrt(d_re * d_re + d_im * d_im)
    v_re = sqrt_maxpow * d_re * inv_dabs
    v_im = -sqrt_maxpow * d_im * inv_dabs

    out_ref[0, 0] = v_re
    out_ref[1, 0] = v_im
    out_ref[2, 0] = zeros         # u/w are undefined for layer 0
    out_ref[3, 0] = zeros
    out_ref[4, 0] = zeros
    out_ref[5, 0] = zeros

    for l in range(num_layers):   # shared parameters across layers
      # ---------------- u step ----------------
      ut_re = d_re * v_re - d_im * v_im          # u_tilde = diag(H) * v
      ut_im = d_re * v_im + d_im * v_re
      v2 = v_re * v_re + v_im * v_im
      # cov_i = sum_j |H_ij|^2 |v_j|^2 + noise_i   (sublane/XLU reduce over j)
      cov = jnp.sum(h2 * v2[None, :, :], axis=1) + noise
      inv_cov = _recip(cov)
      u_re = ut_re * inv_cov
      u_im = ut_im * inv_cov

      # ---------------- w step ---------------- (w_poly=None -> w = 1/error)
      e_re = 1.0 - (u_re * ut_re + u_im * ut_im)
      e_im = -(u_re * ut_im - u_im * ut_re)
      e_den = e_re * e_re + e_im * e_im
      inv_eden = _recip(e_den)
      w_re = e_re * inv_eden
      w_im = -e_im * inv_eden

      # ---------------- v step ----------------
      cu_re = d_re * u_re + d_im * u_im          # conj(diag(H)) * u
      cu_im = d_re * u_im - d_im * u_re
      vt_re = cu_re * w_re - cu_im * w_im        # v_tilde
      vt_im = cu_re * w_im + cu_im * w_re
      u2 = u_re * u_re + u_im * u_im
      w_abs = jnp.sqrt(inv_eden)                 # |w| = 1/|error|
      ulc = u2 * w_abs
      # ul_cov_j = | sum_i |H_ij|^2 * ulc_i |  (leading-axis / VPU reduce over
      # i, reusing the SAME |H|^2 tensor -> no transposed copy shipped)
      ul_cov = jnp.abs(jnp.sum(h2 * ulc[:, None, :], axis=0))
      vt_abs = jnp.sqrt(vt_re * vt_re + vt_im * vt_im)
      mu = jnp.maximum(vt_abs * inv_sqrt_maxpow - ul_cov, 0.0)
      ul_aug = ul_cov + mu
      inv_aug = _recip(ul_aug)
      a_re = vt_re * inv_aug
      a_im = vt_im * inv_aug

      # 'ar' + 'diagload' branches, complex ReLU and recombination, unrolled
      # over the C graph-filter channels (parameters are hoisted SMEM scalars).
      vn_re = zeros
      vn_im = zeros
      for c in range(C):
        ar_re, ar_im = par[0][c], par[1][c]
        dl_re, dl_im = par[2][c], par[3][c]
        rc_re, rc_im = par[4][c], par[5][c]
        t_re = a_re * ar_re - a_im * ar_im + vt_re * dl_re - vt_im * dl_im
        t_im = a_re * ar_im + a_im * ar_re + vt_re * dl_im + vt_im * dl_re
        t_re = jnp.maximum(t_re, 0.0)            # complex ReLU (re/im parts)
        t_im = jnp.maximum(t_im, 0.0)
        vn_re = vn_re + (t_re * rc_re - t_im * rc_im)
        vn_im = vn_im + (t_re * rc_im + t_im * rc_re)

      # -------- per-layer transmit-power correction --------
      cur_pow = jnp.maximum(maxpow, vn_re * vn_re + vn_im * vn_im)
      corr = jnp.minimum(sqrt_maxpow * lax.rsqrt(cur_pow), 1.0)
      v_re = vn_re * corr
      v_im = vn_im * corr

      out_ref[0, l + 1] = v_re
      out_ref[1, l + 1] = v_im
      out_ref[2, l + 1] = u_re
      out_ref[3, l + 1] = u_im
      out_ref[4, l + 1] = w_re
      out_ref[5, l + 1] = w_im

  return kernel


def _choose_batch_tile(B, K, L1, max_batch_tile=2048,
                       vmem_budget_bytes=12 * 1024 * 1024):
  """Largest 128-multiple batch tile fitting a conservative VMEM budget."""
  # f32 bytes per batch lane, counting double-buffered inputs and output slab
  per_lane = 4 * (2 * K * K            # |H|^2 block, double-buffered
                  + 2 * 4 * K          # d_re, d_im, noise, maxpow
                  + 2 * 6 * L1 * K)    # output slab
  tb_cap = max(128, (vmem_budget_bytes // per_lane) // 128 * 128)
  tb_cap = min(tb_cap, max_batch_tile)
  b128 = ((B + 127) // 128) * 128      # lane-dense even for tiny batches
  tb = min(tb_cap, b128)
  bp = ((B + tb - 1) // tb) * tb
  return tb, bp


# --------------------------------------------------------------------------
# Model forward (GCNWMMSE_SISOAdhoc, shared_parameters=True, default config)
# --------------------------------------------------------------------------
def gcnwmmse_siso_adhoc_forward(ch_re, ch_im, noise, maxpow, params,
                                num_layers, max_batch_tile=2048):
  """Returns (v_out, u_out, w_out, bss_pow_out) mirroring the PyTorch module:
     v_out: (L+1, B, K, 1) complex64; u_out/w_out: (L, B, K, 1) complex64;
     bss_pow_out: (L+1, B, K) float32."""
  B, K, _ = ch_re.shape
  C = params["ar_re"].shape[-1]
  L1 = num_layers + 1

  # ---- wrapper-side layout plumbing (done once, outside the kernel) ----
  h2 = ch_re * ch_re + ch_im * ch_im                  # |H|^2, (B, K, K)
  d_re = jnp.diagonal(ch_re, axis1=-2, axis2=-1)      # diag(H), (B, K)
  d_im = jnp.diagonal(ch_im, axis1=-2, axis2=-1)
  noise2 = noise.reshape(B, K)
  maxpow2 = maxpow.reshape(B, K)

  tb, bp = _choose_batch_tile(B, K, L1, max_batch_tile)
  pad = bp - B
  if pad:
    # pad with a benign identity channel so no padded lane divides by zero
    eye = jnp.eye(K, dtype=jnp.float32)
    h2 = jnp.concatenate([h2, jnp.broadcast_to(eye, (pad, K, K))], axis=0)
    d_re = jnp.concatenate([d_re, jnp.ones((pad, K), jnp.float32)], axis=0)
    d_im = jnp.concatenate([d_im, jnp.zeros((pad, K), jnp.float32)], axis=0)
    noise2 = jnp.concatenate([noise2, jnp.ones((pad, K), jnp.float32)], axis=0)
    maxpow2 = jnp.concatenate([maxpow2, jnp.ones((pad, K), jnp.float32)],
                              axis=0)

  h2_t = jnp.transpose(h2, (1, 2, 0))                 # (K, K, Bp)  [i, j, b]
  d_re_t = jnp.transpose(d_re)                        # (K, Bp)
  d_im_t = jnp.transpose(d_im)
  noise_t = jnp.transpose(noise2)
  maxpow_t = jnp.transpose(maxpow2)
  # pack the six (1, C) parameter planes into one (6, C) SMEM scalar table
  par = jnp.concatenate(
      [params["ar_re"], params["ar_im"], params["dl_re"], params["dl_im"],
       params["rc_re"], params["rc_im"]], axis=0).astype(jnp.float32)

  vec_spec = pl.BlockSpec((K, tb), lambda b: (0, b))
  mat_spec = pl.BlockSpec((K, K, tb), lambda b: (0, 0, b))
  par_spec = pl.BlockSpec(memory_space=pltpu.MemorySpace.SMEM)
  out_spec = pl.BlockSpec((6, L1, K, tb), lambda b: (0, 0, 0, b))

  grid_spec = pltpu.PrefetchScalarGridSpec(
      num_scalar_prefetch=0,
      grid=(bp // tb,),
      in_specs=[par_spec, vec_spec, vec_spec, mat_spec, vec_spec, vec_spec],
      out_specs=out_spec,
  )
  slab = pl.pallas_call(
      _make_gcnwmmse_kernel(num_layers, C),
      out_shape=jax.ShapeDtypeStruct((6, L1, K, bp), jnp.float32),
      grid_spec=grid_spec,
      compiler_params=pltpu.CompilerParams(
          dimension_semantics=("parallel",)),
  )(par, d_re_t, d_im_t, h2_t, noise_t, maxpow_t)

  slab = jnp.transpose(slab[..., :B], (0, 1, 3, 2))   # (6, L+1, B, K)
  v_out = (slab[0] + 1j * slab[1]).astype(jnp.complex64)[..., None]
  u_out = (slab[2, 1:] + 1j * slab[3, 1:]).astype(jnp.complex64)[..., None]
  w_out = (slab[4, 1:] + 1j * slab[5, 1:]).astype(jnp.complex64)[..., None]
  # per-BS transmit power; users_assign[i] == i for the SISO ad-hoc scenario,
  # and each beamformer is 1x1 so bf_mat_pow == |v|^2.
  bss_pow_out = slab[0] ** 2 + slab[1] ** 2           # (L+1, B, K)
  return v_out, u_out, w_out, bss_pow_out


# --------------------------------------------------------------------------
# Pure-JAX reference of the same layer math (correctness check only)
# --------------------------------------------------------------------------
def _mrc_init(ch_re, ch_im, maxpow):
  K = ch_re.shape[-1]
  eye = jnp.eye(K, dtype=jnp.float32)
  d_re = jnp.sum(ch_re * eye, axis=-1, keepdims=True)
  d_im = jnp.sum(ch_im * eye, axis=-1, keepdims=True)
  d_abs = jnp.sqrt(d_re ** 2 + d_im ** 2)
  sp = jnp.sqrt(maxpow)
  return sp * d_re / d_abs, -sp * d_im / d_abs


def gcnwmmse_layer_ref(ch_re, ch_im, noise, maxpow, v_re, v_im, params):
  K = ch_re.shape[-1]
  eye = jnp.eye(K, dtype=jnp.float32)
  H2 = ch_re ** 2 + ch_im ** 2
  d_re = jnp.sum(ch_re * eye, axis=-1, keepdims=True)
  d_im = jnp.sum(ch_im * eye, axis=-1, keepdims=True)
  ut_re = d_re * v_re - d_im * v_im
  ut_im = d_re * v_im + d_im * v_re
  v2 = v_re ** 2 + v_im ** 2
  cov = jnp.sum(H2 * jnp.swapaxes(v2, -1, -2), axis=-1, keepdims=True) + noise
  u_re, u_im = ut_re / cov, ut_im / cov
  e_re = 1.0 - (u_re * ut_re + u_im * ut_im)
  e_im = -(u_re * ut_im - u_im * ut_re)
  den = e_re ** 2 + e_im ** 2
  w_re, w_im = e_re / den, -e_im / den
  cu_re = d_re * u_re + d_im * u_im
  cu_im = d_re * u_im - d_im * u_re
  vt_re = cu_re * w_re - cu_im * w_im
  vt_im = cu_re * w_im + cu_im * w_re
  ulc = (u_re ** 2 + u_im ** 2) * jnp.sqrt(w_re ** 2 + w_im ** 2)
  ul_cov = jnp.abs(jnp.swapaxes(
      jnp.sum(H2 * ulc, axis=-2, keepdims=True), -1, -2))
  vt_abs = jnp.sqrt(vt_re ** 2 + vt_im ** 2)
  mu = jnp.maximum(vt_abs / jnp.sqrt(maxpow) - ul_cov, 0.0)
  ul_aug = ul_cov + mu
  ar_re, ar_im = params["ar_re"], params["ar_im"]
  dl_re, dl_im = params["dl_re"], params["dl_im"]
  rc_re, rc_im = params["rc_re"], params["rc_im"]
  a_re, a_im = vt_re / ul_aug, vt_im / ul_aug
  t_re = a_re * ar_re - a_im * ar_im + vt_re * dl_re - vt_im * dl_im
  t_im = a_re * ar_im + a_im * ar_re + vt_re * dl_im + vt_im * dl_re
  t_re, t_im = jnp.maximum(t_re, 0.0), jnp.maximum(t_im, 0.0)
  vn_re = jnp.sum(t_re * rc_re - t_im * rc_im, axis=-1, keepdims=True)
  vn_im = jnp.sum(t_re * rc_im + t_im * rc_re, axis=-1, keepdims=True)
  cur = jnp.maximum(maxpow, vn_re ** 2 + vn_im ** 2)
  corr = jnp.minimum(jnp.sqrt(maxpow / cur), 1.0)
  return vn_re * corr, vn_im * corr, u_re, u_im, w_re, w_im


if __name__ == "__main__":
  B, K, C, L = 2, 8, 4, 5          # batch, users(=bss), v channels, layers
  key = jax.random.PRNGKey(0)
  ks = jax.random.split(key, 8)

  # scenario (channel_mat complex, noise powers, per-BS max powers)
  ch_re = jax.random.normal(ks[0], (B, K, K), jnp.float32) / jnp.sqrt(2.0)
  ch_im = jax.random.normal(ks[1], (B, K, K), jnp.float32) / jnp.sqrt(2.0)
  noise = 0.1 * jnp.ones((B, K, 1), jnp.float32)
  maxpow = jnp.ones((B, K, 1), jnp.float32)

  # deterministic parameter init: randcn(...)/sqrt(C+1), recomb stored as (1,C)
  s = 1.0 / jnp.sqrt(jnp.float32(C + 1)) / jnp.sqrt(2.0)
  params = {
      "ar_re": s * jax.random.normal(ks[2], (1, C), jnp.float32),
      "ar_im": s * jax.random.normal(ks[3], (1, C), jnp.float32),
      "dl_re": s * jax.random.normal(ks[4], (1, C), jnp.float32),
      "dl_im": s * jax.random.normal(ks[5], (1, C), jnp.float32),
      "rc_re": s * jax.random.normal(ks[6], (1, C), jnp.float32),
      "rc_im": s * jax.random.normal(ks[7], (1, C), jnp.float32),
  }

  v_out, u_out, w_out, bss_pow_out = gcnwmmse_siso_adhoc_forward(
      ch_re, ch_im, noise, maxpow, params, L)
  jax.block_until_ready((v_out, u_out, w_out, bss_pow_out))

  # correctness check vs pure-JAX reference of the same layer math
  rvr, rvi = _mrc_init(ch_re, ch_im, maxpow)
  assert jnp.allclose(jnp.real(v_out[0]), rvr, atol=1e-4, rtol=1e-4)
  assert jnp.allclose(jnp.imag(v_out[0]), rvi, atol=1e-4, rtol=1e-4)
  for _ in range(L):
    rvr, rvi, rur, rui, rwr, rwi = gcnwmmse_layer_ref(
        ch_re, ch_im, noise, maxpow, rvr, rvi, params)
  assert jnp.allclose(jnp.real(v_out[-1]), rvr, atol=1e-4, rtol=1e-4)
  assert jnp.allclose(jnp.imag(v_out[-1]), rvi, atol=1e-4, rtol=1e-4)
  assert jnp.allclose(jnp.real(u_out[-1]), rur, atol=1e-4, rtol=1e-4)
  assert jnp.allclose(jnp.imag(u_out[-1]), rui, atol=1e-4, rtol=1e-4)
  assert jnp.allclose(jnp.real(w_out[-1]), rwr, atol=1e-3, rtol=1e-4)
  assert jnp.allclose(jnp.imag(w_out[-1]), rwi, atol=1e-3, rtol=1e-4)
  assert v_out.shape == (L + 1, B, K, 1)
  assert u_out.shape == (L, B, K, 1)
  assert w_out.shape == (L, B, K, 1)
  assert bss_pow_out.shape == (L + 1, B, K)

  print("KERNEL_OK")
</pallas_src>

<mosaic_0001>
module attributes {stable_mosaic.version = 11 : i64} {
  func.func @kernel(%arg0: i32, %arg1: memref<6x4xf32, #tpu.memory_space<smem>>, %arg2: memref<8x128xf32, #tpu.memory_space<vmem>>, %arg3: memref<8x128xf32, #tpu.memory_space<vmem>>, %arg4: memref<8x8x128xf32, #tpu.memory_space<vmem>>, %arg5: memref<8x128xf32, #tpu.memory_space<vmem>>, %arg6: memref<8x128xf32, #tpu.memory_space<vmem>>, %arg7: memref<6x6x8x128xf32, #tpu.memory_space<vmem>>) attributes {dimension_semantics = [#tpu.dimension_semantics<parallel>], iteration_bounds = array<i64: 1>, scalar_prefetch = 0 : i64, scratch_operands = 0 : i64, tpu.core_type = #tpu.core_type<tc>, window_params = [{transform_indices = @transform_0, window_bounds = array<i64: 6, 4>}, {transform_indices = @transform_1, window_bounds = array<i64: 8, 128>}, {transform_indices = @transform_2, window_bounds = array<i64: 8, 128>}, {transform_indices = @transform_3, window_bounds = array<i64: 8, 8, 128>}, {transform_indices = @transform_4, window_bounds = array<i64: 8, 128>}, {transform_indices = @transform_5, window_bounds = array<i64: 8, 128>}, {transform_indices = @transform_6, window_bounds = array<i64: 6, 6, 8, 128>}]} {
    %c0 = arith.constant 0 : index
    %c0_0 = arith.constant 0 : index
    %0 = vector.load %arg2[%c0, %c0_0] : memref<8x128xf32, #tpu.memory_space<vmem>>, vector<8x128xf32>
    %c0_1 = arith.constant 0 : index
    %c0_2 = arith.constant 0 : index
    %1 = vector.load %arg3[%c0_1, %c0_2] : memref<8x128xf32, #tpu.memory_space<vmem>>, vector<8x128xf32>
    %c0_3 = arith.constant 0 : index
    %c0_4 = arith.constant 0 : index
    %c0_5 = arith.constant 0 : index
    %2 = vector.load %arg4[%c0_3, %c0_4, %c0_5] : memref<8x8x128xf32, #tpu.memory_space<vmem>>, vector<8x8x128xf32>
    %c0_6 = arith.constant 0 : index
    %c0_7 = arith.constant 0 : index
    %3 = vector.load %arg5[%c0_6, %c0_7] : memref<8x128xf32, #tpu.memory_space<vmem>>, vector<8x128xf32>
    %c0_8 = arith.constant 0 : index
    %c0_9 = arith.constant 0 : index
    %4 = vector.load %arg6[%c0_8, %c0_9] : memref<8x128xf32, #tpu.memory_space<vmem>>, vector<8x128xf32>
    %cst = arith.constant 0.000000e+00 : f32
    %5 = vector.broadcast %cst : f32 to vector<8x128xf32>
    %6 = math.sqrt %4 : vector<8x128xf32>
    %7 = math.rsqrt %4 : vector<8x128xf32>
    %c0_10 = arith.constant 0 : index
    %c0_11 = arith.constant 0 : index
    %8 = memref.load %arg1[%c0_10, %c0_11] : memref<6x4xf32, #tpu.memory_space<smem>>
    %c0_12 = arith.constant 0 : index
    %c1 = arith.constant 1 : index
    %9 = memref.load %arg1[%c0_12, %c1] : memref<6x4xf32, #tpu.memory_space<smem>>
    %c0_13 = arith.constant 0 : index
    %c2 = arith.constant 2 : index
    %10 = memref.load %arg1[%c0_13, %c2] : memref<6x4xf32, #tpu.memory_space<smem>>
    %c0_14 = arith.constant 0 : index
    %c3 = arith.constant 3 : index
    %11 = memref.load %arg1[%c0_14, %c3] : memref<6x4xf32, #tpu.memory_space<smem>>
    %c1_15 = arith.constant 1 : index
    %c0_16 = arith.constant 0 : index
    %12 = memref.load %arg1[%c1_15, %c0_16] : memref<6x4xf32, #tpu.memory_space<smem>>
    %c1_17 = arith.constant 1 : index
    %c1_18 = arith.constant 1 : index
    %13 = memref.load %arg1[%c1_17, %c1_18] : memref<6x4xf32, #tpu.memory_space<smem>>
    %c1_19 = arith.constant 1 : index
    %c2_20 = arith.constant 2 : index
    %14 = memref.load %arg1[%c1_19, %c2_20] : memref<6x4xf32, #tpu.memory_space<smem>>
    %c1_21 = arith.constant 1 : index
    %c3_22 = arith.constant 3 : index
    %15 = memref.load %arg1[%c1_21, %c3_22] : memref<6x4xf32, #tpu.memory_space<smem>>
    %c2_23 = arith.constant 2 : index
    %c0_24 = arith.constant 0 : index
    %16 = memref.load %arg1[%c2_23, %c0_24] : memref<6x4xf32, #tpu.memory_space<smem>>
    %c2_25 = arith.constant 2 : index
    %c1_26 = arith.constant 1 : index
    %17 = memref.load %arg1[%c2_25, %c1_26] : memref<6x4xf32, #tpu.memory_space<smem>>
    %c2_27 = arith.constant 2 : index
    %c2_28 = arith.constant 2 : index
    %18 = memref.load %arg1[%c2_27, %c2_28] : memref<6x4xf32, #tpu.memory_space<smem>>
    %c2_29 = arith.constant 2 : index
    %c3_30 = arith.constant 3 : index
    %19 = memref.load %arg1[%c2_29, %c3_30] : memref<6x4xf32, #tpu.memory_space<smem>>
    %c3_31 = arith.constant 3 : index
    %c0_32 = arith.constant 0 : index
    %20 = memref.load %arg1[%c3_31, %c0_32] : memref<6x4xf32, #tpu.memory_space<smem>>
    %c3_33 = arith.constant 3 : index
    %c1_34 = arith.constant 1 : index
    %21 = memref.load %arg1[%c3_33, %c1_34] : memref<6x4xf32, #tpu.memory_space<smem>>
    %c3_35 = arith.constant 3 : index
    %c2_36 = arith.constant 2 : index
    %22 = memref.load %arg1[%c3_35, %c2_36] : memref<6x4xf32, #tpu.memory_space<smem>>
    %c3_37 = arith.constant 3 : index
    %c3_38 = arith.constant 3 : index
    %23 = memref.load %arg1[%c3_37, %c3_38] : memref<6x4xf32, #tpu.memory_space<smem>>
    %c4 = arith.constant 4 : index
    %c0_39 = arith.constant 0 : index
    %24 = memref.load %arg1[%c4, %c0_39] : memref<6x4xf32, #tpu.memory_space<smem>>
    %c4_40 = arith.constant 4 : index
    %c1_41 = arith.constant 1 : index
    %25 = memref.load %arg1[%c4_40, %c1_41] : memref<6x4xf32, #tpu.memory_space<smem>>
    %c4_42 = arith.constant 4 : index
    %c2_43 = arith.constant 2 : index
    %26 = memref.load %arg1[%c4_42, %c2_43] : memref<6x4xf32, #tpu.memory_space<smem>>
    %c4_44 = arith.constant 4 : index
    %c3_45 = arith.constant 3 : index
    %27 = memref.load %arg1[%c4_44, %c3_45] : memref<6x4xf32, #tpu.memory_space<smem>>
    %c5 = arith.constant 5 : index
    %c0_46 = arith.constant 0 : index
    %28 = memref.load %arg1[%c5, %c0_46] : memref<6x4xf32, #tpu.memory_space<smem>>
    %c5_47 = arith.constant 5 : index
    %c1_48 = arith.constant 1 : index
    %29 = memref.load %arg1[%c5_47, %c1_48] : memref<6x4xf32, #tpu.memory_space<smem>>
    %c5_49 = arith.constant 5 : index
    %c2_50 = arith.constant 2 : index
    %30 = memref.load %arg1[%c5_49, %c2_50] : memref<6x4xf32, #tpu.memory_space<smem>>
    %c5_51 = arith.constant 5 : index
    %c3_52 = arith.constant 3 : index
    %31 = memref.load %arg1[%c5_51, %c3_52] : memref<6x4xf32, #tpu.memory_space<smem>>
    %32 = arith.mulf %0, %0 : vector<8x128xf32>
    %33 = arith.mulf %1, %1 : vector<8x128xf32>
    %34 = arith.addf %32, %33 : vector<8x128xf32>
    %35 = math.rsqrt %34 : vector<8x128xf32>
    %36 = arith.mulf %6, %0 : vector<8x128xf32>
    %37 = arith.mulf %36, %35 : vector<8x128xf32>
    %cst_53 = arith.constant 0.000000e+00 : f32
    %38 = vector.broadcast %cst_53 : f32 to vector<8x128xf32>
    %39 = arith.subf %38, %6 : vector<8x128xf32>
    %40 = arith.mulf %39, %1 : vector<8x128xf32>
    %41 = arith.mulf %40, %35 : vector<8x128xf32>
    %c0_54 = arith.constant 0 : index
    %c0_55 = arith.constant 0 : index
    %c0_56 = arith.constant 0 : index
    %c0_57 = arith.constant 0 : index
    %42 = vector.load %arg7[%c0_54, %c0_55, %c0_56, %c0_57] : memref<6x6x8x128xf32, #tpu.memory_space<vmem>>, vector<1x1x8x128xf32>
    %43 = vector.shape_cast %42 : vector<1x1x8x128xf32> to vector<8x128xf32>
    %44 = vector.shape_cast %37 : vector<8x128xf32> to vector<1x1x8x128xf32>
    tpu.vector_store %arg7[%c0_54, %c0_55, %c0_56, %c0_57], %44 {strides = array<i32>} : memref<6x6x8x128xf32, #tpu.memory_space<vmem>>, vector<1x1x8x128xf32>,
    %c1_58 = arith.constant 1 : index
    %c0_59 = arith.constant 0 : index
    %c0_60 = arith.constant 0 : index
    %c0_61 = arith.constant 0 : index
    %45 = vector.load %arg7[%c1_58, %c0_59, %c0_60, %c0_61] : memref<6x6x8x128xf32, #tpu.memory_space<vmem>>, vector<1x1x8x128xf32>
    %46 = vector.shape_cast %45 : vector<1x1x8x128xf32> to vector<8x128xf32>
    %47 = vector.shape_cast %41 : vector<8x128xf32> to vector<1x1x8x128xf32>
    tpu.vector_store %arg7[%c1_58, %c0_59, %c0_60, %c0_61], %47 {strides = array<i32>} : memref<6x6x8x128xf32, #tpu.memory_space<vmem>>, vector<1x1x8x128xf32>,
    %c2_62 = arith.constant 2 : index
    %c0_63 = arith.constant 0 : index
    %c0_64 = arith.constant 0 : index
    %c0_65 = arith.constant 0 : index
    %48 = vector.load %arg7[%c2_62, %c0_63, %c0_64, %c0_65] : memref<6x6x8x128xf32, #tpu.memory_space<vmem>>, vector<1x1x8x128xf32>
    %49 = vector.shape_cast %48 : vector<1x1x8x128xf32> to vector<8x128xf32>
    %50 = vector.shape_cast %5 : vector<8x128xf32> to vector<1x1x8x128xf32>
    tpu.vector_store %arg7[%c2_62, %c0_63, %c0_64, %c0_65], %50 {strides = array<i32>} : memref<6x6x8x128xf32, #tpu.memory_space<vmem>>, vector<1x1x8x128xf32>,
    %c3_66 = arith.constant 3 : index
    %c0_67 = arith.constant 0 : index
    %c0_68 = arith.constant 0 : index
    %c0_69 = arith.constant 0 : index
    %51 = vector.load %arg7[%c3_66, %c0_67, %c0_68, %c0_69] : memref<6x6x8x128xf32, #tpu.memory_space<vmem>>, vector<1x1x8x128xf32>
    %52 = vector.shape_cast %51 : vector<1x1x8x128xf32> to vector<8x128xf32>
    %53 = vector.shape_cast %5 : vector<8x128xf32> to vector<1x1x8x128xf32>
    tpu.vector_store %arg7[%c3_66, %c0_67, %c0_68, %c0_69], %53 {strides = array<i32>} : memref<6x6x8x128xf32, #tpu.memory_space<vmem>>, vector<1x1x8x128xf32>,
    %c4_70 = arith.constant 4 : index
    %c0_71 = arith.constant 0 : index
    %c0_72 = arith.constant 0 : index
    %c0_73 = arith.constant 0 : index
    %54 = vector.load %arg7[%c4_70, %c0_71, %c0_72, %c0_73] : memref<6x6x8x128xf32, #tpu.memory_space<vmem>>, vector<1x1x8x128xf32>
    %55 = vector.shape_cast %54 : vector<1x1x8x128xf32> to vector<8x128xf32>
    %56 = vector.shape_cast %5 : vector<8x128xf32> to vector<1x1x8x128xf32>
    tpu.vector_store %arg7[%c4_70, %c0_71, %c0_72, %c0_73], %56 {strides = array<i32>} : memref<6x6x8x128xf32, #tpu.memory_space<vmem>>, vector<1x1x8x128xf32>,
    %c5_74 = arith.constant 5 : index
    %c0_75 = arith.constant 0 : index
    %c0_76 = arith.constant 0 : index
    %c0_77 = arith.constant 0 : index
    %57 = vector.load %arg7[%c5_74, %c0_75, %c0_76, %c0_77] : memref<6x6x8x128xf32, #tpu.memory_space<vmem>>, vector<1x1x8x128xf32>
    %58 = vector.shape_cast %57 : vector<1x1x8x128xf32> to vector<8x128xf32>
    %59 = vector.shape_cast %5 : vector<8x128xf32> to vector<1x1x8x128xf32>
    tpu.vector_store %arg7[%c5_74, %c0_75, %c0_76, %c0_77], %59 {strides = array<i32>} : memref<6x6x8x128xf32, #tpu.memory_space<vmem>>, vector<1x1x8x128xf32>,
    %60 = arith.mulf %0, %37 : vector<8x128xf32>
    %61 = arith.mulf %1, %41 : vector<8x128xf32>
    %62 = arith.subf %60, %61 : vector<8x128xf32>
    %63 = arith.mulf %0, %41 : vector<8x128xf32>
    %64 = arith.mulf %1, %37 : vector<8x128xf32>
    %65 = arith.addf %63, %64 : vector<8x128xf32>
    %66 = arith.mulf %37, %37 : vector<8x128xf32>
    %67 = arith.mulf %41, %41 : vector<8x128xf32>
    %68 = arith.addf %66, %67 : vector<8x128xf32>
    %69 = vector.shape_cast %68 : vector<8x128xf32> to vector<1x8x128xf32>
    %70 = vector.broadcast %69 : vector<1x8x128xf32> to vector<8x8x128xf32>
    %71 = arith.mulf %2, %70 : vector<8x8x128xf32>
    %cst_78 = arith.constant dense<0.000000e+00> : vector<8x128xf32>
    %72 = vector.multi_reduction <add>, %71, %cst_78 [1] : vector<8x8x128xf32> to vector<8x128xf32>
    %73 = arith.addf %72, %3 : vector<8x128xf32>
    %74 = tpu.reciprocal %73 {approx = true} : vector<8x128xf32> -> vector<8x128xf32>
    %75 = arith.mulf %73, %74 : vector<8x128xf32>
    %cst_79 = arith.constant 2.000000e+00 : f32
    %76 = vector.broadcast %cst_79 : f32 to vector<8x128xf32>
    %77 = arith.subf %76, %75 : vector<8x128xf32>
    %78 = arith.mulf %74, %77 : vector<8x128xf32>
    %79 = arith.mulf %62, %78 : vector<8x128xf32>
    %80 = arith.mulf %65, %78 : vector<8x128xf32>
    %81 = arith.mulf %79, %62 : vector<8x128xf32>
    %82 = arith.mulf %80, %65 : vector<8x128xf32>
    %83 = arith.addf %81, %82 : vector<8x128xf32>
    %cst_80 = arith.constant 1.000000e+00 : f32
    %84 = vector.broadcast %cst_80 : f32 to vector<8x128xf32>
    %85 = arith.subf %84, %83 : vector<8x128xf32>
    %86 = arith.mulf %79, %65 : vector<8x128xf32>
    %87 = arith.mulf %80, %62 : vector<8x128xf32>
    %88 = arith.subf %86, %87 : vector<8x128xf32>
    %cst_81 = arith.constant 0.000000e+00 : f32
    %89 = vector.broadcast %cst_81 : f32 to vector<8x128xf32>
    %90 = arith.subf %89, %88 : vector<8x128xf32>
    %91 = arith.mulf %85, %85 : vector<8x128xf32>
    %92 = arith.mulf %90, %90 : vector<8x128xf32>
    %93 = arith.addf %91, %92 : vector<8x128xf32>
    %94 = tpu.reciprocal %93 {approx = true} : vector<8x128xf32> -> vector<8x128xf32>
    %95 = arith.mulf %93, %94 : vector<8x128xf32>
    %cst_82 = arith.constant 2.000000e+00 : f32
    %96 = vector.broadcast %cst_82 : f32 to vector<8x128xf32>
    %97 = arith.subf %96, %95 : vector<8x128xf32>
    %98 = arith.mulf %94, %97 : vector<8x128xf32>
    %99 = arith.mulf %85, %98 : vector<8x128xf32>
    %cst_83 = arith.constant 0.000000e+00 : f32
    %100 = vector.broadcast %cst_83 : f32 to vector<8x128xf32>
    %101 = arith.subf %100, %90 : vector<8x128xf32>
    %102 = arith.mulf %101, %98 : vector<8x128xf32>
    %103 = arith.mulf %0, %79 : vector<8x128xf32>
    %104 = arith.mulf %1, %80 : vector<8x128xf32>
    %105 = arith.addf %103, %104 : vector<8x128xf32>
    %106 = arith.mulf %0, %80 : vector<8x128xf32>
    %107 = arith.mulf %1, %79 : vector<8x128xf32>
    %108 = arith.subf %106, %107 : vector<8x128xf32>
    %109 = arith.mulf %105, %99 : vector<8x128xf32>
    %110 = arith.mulf %108, %102 : vector<8x128xf32>
    %111 = arith.subf %109, %110 : vector<8x128xf32>
    %112 = arith.mulf %105, %102 : vector<8x128xf32>
    %113 = arith.mulf %108, %99 : vector<8x128xf32>
    %114 = arith.addf %112, %113 : vector<8x128xf32>
    %115 = arith.mulf %79, %79 : vector<8x128xf32>
    %116 = arith.mulf %80, %80 : vector<8x128xf32>
    %117 = arith.addf %115, %116 : vector<8x128xf32>
    %118 = math.sqrt %98 : vector<8x128xf32>
    %119 = arith.mulf %117, %118 : vector<8x128xf32>
    %120 = vector.shape_cast %119 : vector<8x128xf32> to vector<8x1x128xf32>
    %121 = vector.broadcast %120 : vector<8x1x128xf32> to vector<8x8x128xf32>
    %122 = arith.mulf %2, %121 : vector<8x8x128xf32>
    %cst_84 = arith.constant dense<0.000000e+00> : vector<8x128xf32>
    %123 = vector.multi_reduction <add>, %122, %cst_84 [0] : vector<8x8x128xf32> to vector<8x128xf32>
    %124 = math.absf %123 : vector<8x128xf32>
    %125 = arith.mulf %111, %111 : vector<8x128xf32>
    %126 = arith.mulf %114, %114 : vector<8x128xf32>
    %127 = arith.addf %125, %126 : vector<8x128xf32>
    %128 = math.sqrt %127 : vector<8x128xf32>
    %129 = arith.mulf %128, %7 : vector<8x128xf32>
    %130 = arith.subf %129, %124 : vector<8x128xf32>
    %cst_85 = arith.constant 0.000000e+00 : f32
    %131 = vector.broadcast %cst_85 : f32 to vector<8x128xf32>
    %132 = arith.maximumf %130, %131 : vector<8x128xf32>
    %133 = arith.addf %124, %132 : vector<8x128xf32>
    %134 = tpu.reciprocal %133 {approx = true} : vector<8x128xf32> -> vector<8x128xf32>
    %135 = arith.mulf %133, %134 : vector<8x128xf32>
    %cst_86 = arith.constant 2.000000e+00 : f32
    %136 = vector.broadcast %cst_86 : f32 to vector<8x128xf32>
    %137 = arith.subf %136, %135 : vector<8x128xf32>
    %138 = arith.mulf %134, %137 : vector<8x128xf32>
    %139 = arith.mulf %111, %138 : vector<8x128xf32>
    %140 = arith.mulf %114, %138 : vector<8x128xf32>
    %141 = vector.broadcast %8 : f32 to vector<8x128xf32>
    %142 = arith.mulf %139, %141 : vector<8x128xf32>
    %143 = vector.broadcast %12 : f32 to vector<8x128xf32>
    %144 = arith.mulf %140, %143 : vector<8x128xf32>
    %145 = arith.subf %142, %144 : vector<8x128xf32>
    %146 = vector.broadcast %16 : f32 to vector<8x128xf32>
    %147 = arith.mulf %111, %146 : vector<8x128xf32>
    %148 = arith.addf %145, %147 : vector<8x128xf32>
    %149 = vector.broadcast %20 : f32 to vector<8x128xf32>
    %150 = arith.mulf %114, %149 : vector<8x128xf32>
    %151 = arith.subf %148, %150 : vector<8x128xf32>
    %152 = vector.broadcast %12 : f32 to vector<8x128xf32>
    %153 = arith.mulf %139, %152 : vector<8x128xf32>
    %154 = vector.broadcast %8 : f32 to vector<8x128xf32>
    %155 = arith.mulf %140, %154 : vector<8x128xf32>
    %156 = arith.addf %153, %155 : vector<8x128xf32>
    %157 = vector.broadcast %20 : f32 to vector<8x128xf32>
    %158 = arith.mulf %111, %157 : vector<8x128xf32>
    %159 = arith.addf %156, %158 : vector<8x128xf32>
    %160 = vector.broadcast %16 : f32 to vector<8x128xf32>
    %161 = arith.mulf %114, %160 : vector<8x128xf32>
    %162 = arith.addf %159, %161 : vector<8x128xf32>
    %cst_87 = arith.constant 0.000000e+00 : f32
    %163 = vector.broadcast %cst_87 : f32 to vector<8x128xf32>
    %164 = arith.maximumf %151, %163 : vector<8x128xf32>
    %cst_88 = arith.constant 0.000000e+00 : f32
    %165 = vector.broadcast %cst_88 : f32 to vector<8x128xf32>
    %166 = arith.maximumf %162, %165 : vector<8x128xf32>
    %167 = vector.broadcast %24 : f32 to vector<8x128xf32>
    %168 = arith.mulf %164, %167 : vector<8x128xf32>
    %169 = vector.broadcast %28 : f32 to vector<8x128xf32>
    %170 = arith.mulf %166, %169 : vector<8x128xf32>
    %171 = arith.subf %168, %170 : vector<8x128xf32>
    %172 = arith.addf %5, %171 : vector<8x128xf32>
    %173 = vector.broadcast %28 : f32 to vector<8x128xf32>
    %174 = arith.mulf %164, %173 : vector<8x128xf32>
    %175 = vector.broadcast %24 : f32 to vector<8x128xf32>
    %176 = arith.mulf %166, %175 : vector<8x128xf32>
    %177 = arith.addf %174, %176 : vector<8x128xf32>
    %178 = arith.addf %5, %177 : vector<8x128xf32>
    %179 = vector.broadcast %9 : f32 to vector<8x128xf32>
    %180 = arith.mulf %139, %179 : vector<8x128xf32>
    %181 = vector.broadcast %13 : f32 to vector<8x128xf32>
    %182 = arith.mulf %140, %181 : vector<8x128xf32>
    %183 = arith.subf %180, %182 : vector<8x128xf32>
    %184 = vector.broadcast %17 : f32 to vector<8x128xf32>
    %185 = arith.mulf %111, %184 : vector<8x128xf32>
    %186 = arith.addf %183, %185 : vector<8x128xf32>
    %187 = vector.broadcast %21 : f32 to vector<8x128xf32>
    %188 = arith.mulf %114, %187 : vector<8x128xf32>
    %189 = arith.subf %186, %188 : vector<8x128xf32>
    %190 = vector.broadcast %13 : f32 to vector<8x128xf32>
    %191 = arith.mulf %139, %190 : vector<8x128xf32>
    %192 = vector.broadcast %9 : f32 to vector<8x128xf32>
    %193 = arith.mulf %140, %192 : vector<8x128xf32>
    %194 = arith.addf %191, %193 : vector<8x128xf32>
    %195 = vector.broadcast %21 : f32 to vector<8x128xf32>
    %196 = arith.mulf %111, %195 : vector<8x128xf32>
    %197 = arith.addf %194, %196 : vector<8x128xf32>
    %198 = vector.broadcast %17 : f32 to vector<8x128xf32>
    %199 = arith.mulf %114, %198 : vector<8x128xf32>
    %200 = arith.addf %197, %199 : vector<8x128xf32>
    %cst_89 = arith.constant 0.000000e+00 : f32
    %201 = vector.broadcast %cst_89 : f32 to vector<8x128xf32>
    %202 = arith.maximumf %189, %201 : vector<8x128xf32>
    %cst_90 = arith.constant 0.000000e+00 : f32
    %203 = vector.broadcast %cst_90 : f32 to vector<8x128xf32>
    %204 = arith.maximumf %200, %203 : vector<8x128xf32>
    %205 = vector.broadcast %25 : f32 to vector<8x128xf32>
    %206 = arith.mulf %202, %205 : vector<8x128xf32>
    %207 = vector.broadcast %29 : f32 to vector<8x128xf32>
    %208 = arith.mulf %204, %207 : vector<8x128xf32>
    %209 = arith.subf %206, %208 : vector<8x128xf32>
    %210 = arith.addf %172, %209 : vector<8x128xf32>
    %211 = vector.broadcast %29 : f32 to vector<8x128xf32>
    %212 = arith.mulf %202, %211 : vector<8x128xf32>
    %213 = vector.broadcast %25 : f32 to vector<8x128xf32>
    %214 = arith.mulf %204, %213 : vector<8x128xf32>
    %215 = arith.addf %212, %214 : vector<8x128xf32>
    %216 = arith.addf %178, %215 : vector<8x128xf32>
    %217 = vector.broadcast %10 : f32 to vector<8x128xf32>
    %218 = arith.mulf %139, %217 : vector<8x128xf32>
    %219 = vector.broadcast %14 : f32 to vector<8x128xf32>
    %220 = arith.mulf %140, %219 : vector<8x128xf32>
    %221 = arith.subf %218, %220 : vector<8x128xf32>
    %222 = vector.broadcast %18 : f32 to vector<8x128xf32>
    %223 = arith.mulf %111, %222 : vector<8x128xf32>
    %224 = arith.addf %221, %223 : vector<8x128xf32>
    %225 = vector.broadcast %22 : f32 to vector<8x128xf32>
    %226 = arith.mulf %114, %225 : vector<8x128xf32>
    %227 = arith.subf %224, %226 : vector<8x128xf32>
    %228 = vector.broadcast %14 : f32 to vector<8x128xf32>
    %229 = arith.mulf %139, %228 : vector<8x128xf32>
    %230 = vector.broadcast %10 : f32 to vector<8x128xf32>
    %231 = arith.mulf %140, %230 : vector<8x128xf32>
    %232 = arith.addf %229, %231 : vector<8x128xf32>
    %233 = vector.broadcast %22 : f32 to vector<8x128xf32>
    %234 = arith.mulf %111, %233 : vector<8x128xf32>
    %235 = arith.addf %232, %234 : vector<8x128xf32>
    %236 = vector.broadcast %18 : f32 to vector<8x128xf32>
    %237 = arith.mulf %114, %236 : vector<8x128xf32>
    %238 = arith.addf %235, %237 : vector<8x128xf32>
    %cst_91 = arith.constant 0.000000e+00 : f32
    %239 = vector.broadcast %cst_91 : f32 to vector<8x128xf32>
    %240 = arith.maximumf %227, %239 : vector<8x128xf32>
    %cst_92 = arith.constant 0.000000e+00 : f32
    %241 = vector.broadcast %cst_92 : f32 to vector<8x128xf32>
    %242 = arith.maximumf %238, %241 : vector<8x128xf32>
    %243 = vector.broadcast %26 : f32 to vector<8x128xf32>
    %244 = arith.mulf %240, %243 : vector<8x128xf32>
    %245 = vector.broadcast %30 : f32 to vector<8x128xf32>
    %246 = arith.mulf %242, %245 : vector<8x128xf32>
    %247 = arith.subf %244, %246 : vector<8x128xf32>
    %248 = arith.addf %210, %247 : vector<8x128xf32>
    %249 = vector.broadcast %30 : f32 to vector<8x128xf32>
    %250 = arith.mulf %240, %249 : vector<8x128xf32>
    %251 = vector.broadcast %26 : f32 to vector<8x128xf32>
    %252 = arith.mulf %242, %251 : vector<8x128xf32>
    %253 = arith.addf %250, %252 : vector<8x128xf32>
    %254 = arith.addf %216, %253 : vector<8x128xf32>
    %255 = vector.broadcast %11 : f32 to vector<8x128xf32>
    %256 = arith.mulf %139, %255 : vector<8x128xf32>
    %257 = vector.broadcast %15 : f32 to vector<8x128xf32>
    %258 = arith.mulf %140, %257 : vector<8x128xf32>
    %259 = arith.subf %256, %258 : vector<8x128xf32>
    %260 = vector.broadcast %19 : f32 to vector<8x128xf32>
    %261 = arith.mulf %111, %260 : vector<8x128xf32>
    %262 = arith.addf %259, %261 : vector<8x128xf32>
    %263 = vector.broadcast %23 : f32 to vector<8x128xf32>
    %264 = arith.mulf %114, %263 : vector<8x128xf32>
    %265 = arith.subf %262, %264 : vector<8x128xf32>
    %266 = vector.broadcast %15 : f32 to vector<8x128xf32>
    %267 = arith.mulf %139, %266 : vector<8x128xf32>
    %268 = vector.broadcast %11 : f32 to vector<8x128xf32>
    %269 = arith.mulf %140, %268 : vector<8x128xf32>
    %270 = arith.addf %267, %269 : vector<8x128xf32>
    %271 = vector.broadcast %23 : f32 to vector<8x128xf32>
    %272 = arith.mulf %111, %271 : vector<8x128xf32>
    %273 = arith.addf %270, %272 : vector<8x128xf32>
    %274 = vector.broadcast %19 : f32 to vector<8x128xf32>
    %275 = arith.mulf %114, %274 : vector<8x128xf32>
    %276 = arith.addf %273, %275 : vector<8x128xf32>
    %cst_93 = arith.constant 0.000000e+00 : f32
    %277 = vector.broadcast %cst_93 : f32 to vector<8x128xf32>
    %278 = arith.maximumf %265, %277 : vector<8x128xf32>
    %cst_94 = arith.constant 0.000000e+00 : f32
    %279 = vector.broadcast %cst_94 : f32 to vector<8x128xf32>
    %280 = arith.maximumf %276, %279 : vector<8x128xf32>
    %281 = vector.broadcast %27 : f32 to vector<8x128xf32>
    %282 = arith.mulf %278, %281 : vector<8x128xf32>
    %283 = vector.broadcast %31 : f32 to vector<8x128xf32>
    %284 = arith.mulf %280, %283 : vector<8x128xf32>
    %285 = arith.subf %282, %284 : vector<8x128xf32>
    %286 = arith.addf %248, %285 : vector<8x128xf32>
    %287 = vector.broadcast %31 : f32 to vector<8x128xf32>
    %288 = arith.mulf %278, %287 : vector<8x128xf32>
    %289 = vector.broadcast %27 : f32 to vector<8x128xf32>
    %290 = arith.mulf %280, %289 : vector<8x128xf32>
    %291 = arith.addf %288, %290 : vector<8x128xf32>
    %292 = arith.addf %254, %291 : vector<8x128xf32>
    %293 = arith.mulf %286, %286 : vector<8x128xf32>
    %294 = arith.mulf %292, %292 : vector<8x128xf32>
    %295 = arith.addf %293, %294 : vector<8x128xf32>
    %296 = arith.maximumf %4, %295 : vector<8x128xf32>
    %297 = math.rsqrt %296 : vector<8x128xf32>
    %298 = arith.mulf %6, %297 : vector<8x128xf32>
    %cst_95 = arith.constant 1.000000e+00 : f32
    %299 = vector.broadcast %cst_95 : f32 to vector<8x128xf32>
    %300 = arith.minimumf %298, %299 : vector<8x128xf32>
    %301 = arith.mulf %286, %300 : vector<8x128xf32>
    %302 = arith.mulf %292, %300 : vector<8x128xf32>
    %c0_96 = arith.constant 0 : index
    %c1_97 = arith.constant 1 : index
    %c0_98 = arith.constant 0 : index
    %c0_99 = arith.constant 0 : index
    %303 = vector.load %arg7[%c0_96, %c1_97, %c0_98, %c0_99] : memref<6x6x8x128xf32, #tpu.memory_space<vmem>>, vector<1x1x8x128xf32>
    %304 = vector.shape_cast %303 : vector<1x1x8x128xf32> to vector<8x128xf32>
    %305 = vector.shape_cast %301 : vector<8x128xf32> to vector<1x1x8x128xf32>
    tpu.vector_store %arg7[%c0_96, %c1_97, %c0_98, %c0_99], %305 {strides = array<i32>} : memref<6x6x8x128xf32, #tpu.memory_space<vmem>>, vector<1x1x8x128xf32>,
    %c1_100 = arith.constant 1 : index
    %c1_101 = arith.constant 1 : index
    %c0_102 = arith.constant 0 : index
    %c0_103 = arith.constant 0 : index
    %306 = vector.load %arg7[%c1_100, %c1_101, %c0_102, %c0_103] : memref<6x6x8x128xf32, #tpu.memory_space<vmem>>, vector<1x1x8x128xf32>
    %307 = vector.shape_cast %306 : vector<1x1x8x128xf32> to vector<8x128xf32>
    %308 = vector.shape_cast %302 : vector<8x128xf32> to vector<1x1x8x128xf32>
    tpu.vector_store %arg7[%c1_100, %c1_101, %c0_102, %c0_103], %308 {strides = array<i32>} : memref<6x6x8x128xf32, #tpu.memory_space<vmem>>, vector<1x1x8x128xf32>,
    %c2_104 = arith.constant 2 : index
    %c1_105 = arith.constant 1 : index
    %c0_106 = arith.constant 0 : index
    %c0_107 = arith.constant 0 : index
    %309 = vector.load %arg7[%c2_104, %c1_105, %c0_106, %c0_107] : memref<6x6x8x128xf32, #tpu.memory_space<vmem>>, vector<1x1x8x128xf32>
    %310 = vector.shape_cast %309 : vector<1x1x8x128xf32> to vector<8x128xf32>
    %311 = vector.shape_cast %79 : vector<8x128xf32> to vector<1x1x8x128xf32>
    tpu.vector_store %arg7[%c2_104, %c1_105, %c0_106, %c0_107], %311 {strides = array<i32>} : memref<6x6x8x128xf32, #tpu.memory_space<vmem>>, vector<1x1x8x128xf32>,
    %c3_108 = arith.constant 3 : index
    %c1_109 = arith.constant 1 : index
    %c0_110 = arith.constant 0 : index
    %c0_111 = arith.constant 0 : index
    %312 = vector.load %arg7[%c3_108, %c1_109, %c0_110, %c0_111] : memref<6x6x8x128xf32, #tpu.memory_space<vmem>>, vector<1x1x8x128xf32>
    %313 = vector.shape_cast %312 : vector<1x1x8x128xf32> to vector<8x128xf32>
    %314 = vector.shape_cast %80 : vector<8x128xf32> to vector<1x1x8x128xf32>
    tpu.vector_store %arg7[%c3_108, %c1_109, %c0_110, %c0_111], %314 {strides = array<i32>} : memref<6x6x8x128xf32, #tpu.memory_space<vmem>>, vector<1x1x8x128xf32>,
    %c4_112 = arith.constant 4 : index
    %c1_113 = arith.constant 1 : index
    %c0_114 = arith.constant 0 : index
    %c0_115 = arith.constant 0 : index
    %315 = vector.load %arg7[%c4_112, %c1_113, %c0_114, %c0_115] : memref<6x6x8x128xf32, #tpu.memory_space<vmem>>, vector<1x1x8x128xf32>
    %316 = vector.shape_cast %315 : vector<1x1x8x128xf32> to vector<8x128xf32>
    %317 = vector.shape_cast %99 : vector<8x128xf32> to vector<1x1x8x128xf32>
    tpu.vector_store %arg7[%c4_112, %c1_113, %c0_114, %c0_115], %317 {strides = array<i32>} : memref<6x6x8x128xf32, #tpu.memory_space<vmem>>, vector<1x1x8x128xf32>,
    %c5_116 = arith.constant 5 : index
    %c1_117 = arith.constant 1 : index
    %c0_118 = arith.constant 0 : index
    %c0_119 = arith.constant 0 : index
    %318 = vector.load %arg7[%c5_116, %c1_117, %c0_118, %c0_119] : memref<6x6x8x128xf32, #tpu.memory_space<vmem>>, vector<1x1x8x128xf32>
    %319 = vector.shape_cast %318 : vector<1x1x8x128xf32> to vector<8x128xf32>
    %320 = vector.shape_cast %102 : vector<8x128xf32> to vector<1x1x8x128xf32>
    tpu.vector_store %arg7[%c5_116, %c1_117, %c0_118, %c0_119], %320 {strides = array<i32>} : memref<6x6x8x128xf32, #tpu.memory_space<vmem>>, vector<1x1x8x128xf32>,
    %321 = arith.mulf %0, %301 : vector<8x128xf32>
    %322 = arith.mulf %1, %302 : vector<8x128xf32>
    %323 = arith.subf %321, %322 : vector<8x128xf32>
    %324 = arith.mulf %0, %302 : vector<8x128xf32>
    %325 = arith.mulf %1, %301 : vector<8x128xf32>
    %326 = arith.addf %324, %325 : vector<8x128xf32>
    %327 = arith.mulf %301, %301 : vector<8x128xf32>
    %328 = arith.mulf %302, %302 : vector<8x128xf32>
    %329 = arith.addf %327, %328 : vector<8x128xf32>
    %330 = vector.shape_cast %329 : vector<8x128xf32> to vector<1x8x128xf32>
    %331 = vector.broadcast %330 : vector<1x8x128xf32> to vector<8x8x128xf32>
    %332 = arith.mulf %2, %331 : vector<8x8x128xf32>
    %cst_120 = arith.constant dense<0.000000e+00> : vector<8x128xf32>
    %333 = vector.multi_reduction <add>, %332, %cst_120 [1] : vector<8x8x128xf32> to vector<8x128xf32>
    %334 = arith.addf %333, %3 : vector<8x128xf32>
    %335 = tpu.reciprocal %334 {approx = true} : vector<8x128xf32> -> vector<8x128xf32>
    %336 = arith.mulf %334, %335 : vector<8x128xf32>
    %cst_121 = arith.constant 2.000000e+00 : f32
    %337 = vector.broadcast %cst_121 : f32 to vector<8x128xf32>
    %338 = arith.subf %337, %336 : vector<8x128xf32>
    %339 = arith.mulf %335, %338 : vector<8x128xf32>
    %340 = arith.mulf %323, %339 : vector<8x128xf32>
    %341 = arith.mulf %326, %339 : vector<8x128xf32>
    %342 = arith.mulf %340, %323 : vector<8x128xf32>
    %343 = arith.mulf %341, %326 : vector<8x128xf32>
    %344 = arith.addf %342, %343 : vector<8x128xf32>
    %cst_122 = arith.constant 1.000000e+00 : f32
    %345 = vector.broadcast %cst_122 : f32 to vector<8x128xf32>
    %346 = arith.subf %345, %344 : vector<8x128xf32>
    %347 = arith.mulf %340, %326 : vector<8x128xf32>
    %348 = arith.mulf %341, %323 : vector<8x128xf32>
    %349 = arith.subf %347, %348 : vector<8x128xf32>
    %cst_123 = arith.constant 0.000000e+00 : f32
    %350 = vector.broadcast %cst_123 : f32 to vector<8x128xf32>
    %351 = arith.subf %350, %349 : vector<8x128xf32>
    %352 = arith.mulf %346, %346 : vector<8x128xf32>
    %353 = arith.mulf %351, %351 : vector<8x128xf32>
    %354 = arith.addf %352, %353 : vector<8x128xf32>
    %355 = tpu.reciprocal %354 {approx = true} : vector<8x128xf32> -> vector<8x128xf32>
    %356 = arith.mulf %354, %355 : vector<8x128xf32>
    %cst_124 = arith.constant 2.000000e+00 : f32
    %357 = vector.broadcast %cst_124 : f32 to vector<8x128xf32>
    %358 = arith.subf %357, %356 : vector<8x128xf32>
    %359 = arith.mulf %355, %358 : vector<8x128xf32>
    %360 = arith.mulf %346, %359 : vector<8x128xf32>
    %cst_125 = arith.constant 0.000000e+00 : f32
    %361 = vector.broadcast %cst_125 : f32 to vector<8x128xf32>
    %362 = arith.subf %361, %351 : vector<8x128xf32>
    %363 = arith.mulf %362, %359 : vector<8x128xf32>
    %364 = arith.mulf %0, %340 : vector<8x128xf32>
    %365 = arith.mulf %1, %341 : vector<8x128xf32>
    %366 = arith.addf %364, %365 : vector<8x128xf32>
    %367 = arith.mulf %0, %341 : vector<8x128xf32>
    %368 = arith.mulf %1, %340 : vector<8x128xf32>
    %369 = arith.subf %367, %368 : vector<8x128xf32>
    %370 = arith.mulf %366, %360 : vector<8x128xf32>
    %371 = arith.mulf %369, %363 : vector<8x128xf32>
    %372 = arith.subf %370, %371 : vector<8x128xf32>
    %373 = arith.mulf %366, %363 : vector<8x128xf32>
    %374 = arith.mulf %369, %360 : vector<8x128xf32>
    %375 = arith.addf %373, %374 : vector<8x128xf32>
    %376 = arith.mulf %340, %340 : vector<8x128xf32>
    %377 = arith.mulf %341, %341 : vector<8x128xf32>
    %378 = arith.addf %376, %377 : vector<8x128xf32>
    %379 = math.sqrt %359 : vector<8x128xf32>
    %380 = arith.mulf %378, %379 : vector<8x128xf32>
    %381 = vector.shape_cast %380 : vector<8x128xf32> to vector<8x1x128xf32>
    %382 = vector.broadcast %381 : vector<8x1x128xf32> to vector<8x8x128xf32>
    %383 = arith.mulf %2, %382 : vector<8x8x128xf32>
    %cst_126 = arith.constant dense<0.000000e+00> : vector<8x128xf32>
    %384 = vector.multi_reduction <add>, %383, %cst_126 [0] : vector<8x8x128xf32> to vector<8x128xf32>
    %385 = math.absf %384 : vector<8x128xf32>
    %386 = arith.mulf %372, %372 : vector<8x128xf32>
    %387 = arith.mulf %375, %375 : vector<8x128xf32>
    %388 = arith.addf %386, %387 : vector<8x128xf32>
    %389 = math.sqrt %388 : vector<8x128xf32>
    %390 = arith.mulf %389, %7 : vector<8x128xf32>
    %391 = arith.subf %390, %385 : vector<8x128xf32>
    %cst_127 = arith.constant 0.000000e+00 : f32
    %392 = vector.broadcast %cst_127 : f32 to vector<8x128xf32>
    %393 = arith.maximumf %391, %392 : vector<8x128xf32>
    %394 = arith.addf %385, %393 : vector<8x128xf32>
    %395 = tpu.reciprocal %394 {approx = true} : vector<8x128xf32> -> vector<8x128xf32>
    %396 = arith.mulf %394, %395 : vector<8x128xf32>
    %cst_128 = arith.constant 2.000000e+00 : f32
    %397 = vector.broadcast %cst_128 : f32 to vector<8x128xf32>
    %398 = arith.subf %397, %396 : vector<8x128xf32>
    %399 = arith.mulf %395, %398 : vector<8x128xf32>
    %400 = arith.mulf %372, %399 : vector<8x128xf32>
    %401 = arith.mulf %375, %399 : vector<8x128xf32>
    %402 = vector.broadcast %8 : f32 to vector<8x128xf32>
    %403 = arith.mulf %400, %402 : vector<8x128xf32>
    %404 = vector.broadcast %12 : f32 to vector<8x128xf32>
    %405 = arith.mulf %401, %404 : vector<8x128xf32>
    %406 = arith.subf %403, %405 : vector<8x128xf32>
    %407 = vector.broadcast %16 : f32 to vector<8x128xf32>
    %408 = arith.mulf %372, %407 : vector<8x128xf32>
    %409 = arith.addf %406, %408 : vector<8x128xf32>
    %410 = vector.broadcast %20 : f32 to vector<8x128xf32>
    %411 = arith.mulf %375, %410 : vector<8x128xf32>
    %412 = arith.subf %409, %411 : vector<8x128xf32>
    %413 = vector.broadcast %12 : f32 to vector<8x128xf32>
    %414 = arith.mulf %400, %413 : vector<8x128xf32>
    %415 = vector.broadcast %8 : f32 to vector<8x128xf32>
    %416 = arith.mulf %401, %415 : vector<8x128xf32>
    %417 = arith.addf %414, %416 : vector<8x128xf32>
    %418 = vector.broadcast %20 : f32 to vector<8x128xf32>
    %419 = arith.mulf %372, %418 : vector<8x128xf32>
    %420 = arith.addf %417, %419 : vector<8x128xf32>
    %421 = vector.broadcast %16 : f32 to vector<8x128xf32>
    %422 = arith.mulf %375, %421 : vector<8x128xf32>
    %423 = arith.addf %420, %422 : vector<8x128xf32>
    %cst_129 = arith.constant 0.000000e+00 : f32
    %424 = vector.broadcast %cst_129 : f32 to vector<8x128xf32>
    %425 = arith.maximumf %412, %424 : vector<8x128xf32>
    %cst_130 = arith.constant 0.000000e+00 : f32
    %426 = vector.broadcast %cst_130 : f32 to vector<8x128xf32>
    %427 = arith.maximumf %423, %426 : vector<8x128xf32>
    %428 = vector.broadcast %24 : f32 to vector<8x128xf32>
    %429 = arith.mulf %425, %428 : vector<8x128xf32>
    %430 = vector.broadcast %28 : f32 to vector<8x128xf32>
    %431 = arith.mulf %427, %430 : vector<8x128xf32>
    %432 = arith.subf %429, %431 : vector<8x128xf32>
    %433 = arith.addf %5, %432 : vector<8x128xf32>
    %434 = vector.broadcast %28 : f32 to vector<8x128xf32>
    %435 = arith.mulf %425, %434 : vector<8x128xf32>
    %436 = vector.broadcast %24 : f32 to vector<8x128xf32>
    %437 = arith.mulf %427, %436 : vector<8x128xf32>
    %438 = arith.addf %435, %437 : vector<8x128xf32>
    %439 = arith.addf %5, %438 : vector<8x128xf32>
    %440 = vector.broadcast %9 : f32 to vector<8x128xf32>
    %441 = arith.mulf %400, %440 : vector<8x128xf32>
    %442 = vector.broadcast %13 : f32 to vector<8x128xf32>
    %443 = arith.mulf %401, %442 : vector<8x128xf32>
    %444 = arith.subf %441, %443 : vector<8x128xf32>
    %445 = vector.broadcast %17 : f32 to vector<8x128xf32>
    %446 = arith.mulf %372, %445 : vector<8x128xf32>
    %447 = arith.addf %444, %446 : vector<8x128xf32>
    %448 = vector.broadcast %21 : f32 to vector<8x128xf32>
    %449 = arith.mulf %375, %448 : vector<8x128xf32>
    %450 = arith.subf %447, %449 : vector<8x128xf32>
    %451 = vector.broadcast %13 : f32 to vector<8x128xf32>
    %452 = arith.mulf %400, %451 : vector<8x128xf32>
    %453 = vector.broadcast %9 : f32 to vector<8x128xf32>
    %454 = arith.mulf %401, %453 : vector<8x128xf32>
    %455 = arith.addf %452, %454 : vector<8x128xf32>
    %456 = vector.broadcast %21 : f32 to vector<8x128xf32>
    %457 = arith.mulf %372, %456 : vector<8x128xf32>
    %458 = arith.addf %455, %457 : vector<8x128xf32>
    %459 = vector.broadcast %17 : f32 to vector<8x128xf32>
    %460 = arith.mulf %375, %459 : vector<8x128xf32>
    %461 = arith.addf %458, %460 : vector<8x128xf32>
    %cst_131 = arith.constant 0.000000e+00 : f32
    %462 = vector.broadcast %cst_131 : f32 to vector<8x128xf32>
    %463 = arith.maximumf %450, %462 : vector<8x128xf32>
    %cst_132 = arith.constant 0.000000e+00 : f32
    %464 = vector.broadcast %cst_132 : f32 to vector<8x128xf32>
    %465 = arith.maximumf %461, %464 : vector<8x128xf32>
    %466 = vector.broadcast %25 : f32 to vector<8x128xf32>
    %467 = arith.mulf %463, %466 : vector<8x128xf32>
    %468 = vector.broadcast %29 : f32 to vector<8x128xf32>
    %469 = arith.mulf %465, %468 : vector<8x128xf32>
    %470 = arith.subf %467, %469 : vector<8x128xf32>
    %471 = arith.addf %433, %470 : vector<8x128xf32>
    %472 = vector.broadcast %29 : f32 to vector<8x128xf32>
    %473 = arith.mulf %463, %472 : vector<8x128xf32>
    %474 = vector.broadcast %25 : f32 to vector<8x128xf32>
    %475 = arith.mulf %465, %474 : vector<8x128xf32>
    %476 = arith.addf %473, %475 : vector<8x128xf32>
    %477 = arith.addf %439, %476 : vector<8x128xf32>
    %478 = vector.broadcast %10 : f32 to vector<8x128xf32>
    %479 = arith.mulf %400, %478 : vector<8x128xf32>
    %480 = vector.broadcast %14 : f32 to vector<8x128xf32>
    %481 = arith.mulf %401, %480 : vector<8x128xf32>
    %482 = arith.subf %479, %481 : vector<8x128xf32>
    %483 = vector.broadcast %18 : f32 to vector<8x128xf32>
    %484 = arith.mulf %372, %483 : vector<8x128xf32>
    %485 = arith.addf %482, %484 : vector<8x128xf32>
    %486 = vector.broadcast %22 : f32 to vector<8x128xf32>
    %487 = arith.mulf %375, %486 : vector<8x128xf32>
    %488 = arith.subf %485, %487 : vector<8x128xf32>
    %489 = vector.broadcast %14 : f32 to vector<8x128xf32>
    %490 = arith.mulf %400, %489 : vector<8x128xf32>
    %491 = vector.broadcast %10 : f32 to vector<8x128xf32>
    %492 = arith.mulf %401, %491 : vector<8x128xf32>
    %493 = arith.addf %490, %492 : vector<8x128xf32>
    %494 = vector.broadcast %22 : f32 to vector<8x128xf32>
    %495 = arith.mulf %372, %494 : vector<8x128xf32>
    %496 = arith.addf %493, %495 : vector<8x128xf32>
    %497 = vector.broadcast %18 : f32 to vector<8x128xf32>
    %498 = arith.mulf %375, %497 : vector<8x128xf32>
    %499 = arith.addf %496, %498 : vector<8x128xf32>
    %cst_133 = arith.constant 0.000000e+00 : f32
    %500 = vector.broadcast %cst_133 : f32 to vector<8x128xf32>
    %501 = arith.maximumf %488, %500 : vector<8x128xf32>
    %cst_134 = arith.constant 0.000000e+00 : f32
    %502 = vector.broadcast %cst_134 : f32 to vector<8x128xf32>
    %503 = arith.maximumf %499, %502 : vector<8x128xf32>
    %504 = vector.broadcast %26 : f32 to vector<8x128xf32>
    %505 = arith.mulf %501, %504 : vector<8x128xf32>
    %506 = vector.broadcast %30 : f32 to vector<8x128xf32>
    %507 = arith.mulf %503, %506 : vector<8x128xf32>
    %508 = arith.subf %505, %507 : vector<8x128xf32>
    %509 = arith.addf %471, %508 : vector<8x128xf32>
    %510 = vector.broadcast %30 : f32 to vector<8x128xf32>
    %511 = arith.mulf %501, %510 : vector<8x128xf32>
    %512 = vector.broadcast %26 : f32 to vector<8x128xf32>
    %513 = arith.mulf %503, %512 : vector<8x128xf32>
    %514 = arith.addf %511, %513 : vector<8x128xf32>
    %515 = arith.addf %477, %514 : vector<8x128xf32>
    %516 = vector.broadcast %11 : f32 to vector<8x128xf32>
    %517 = arith.mulf %400, %516 : vector<8x128xf32>
    %518 = vector.broadcast %15 : f32 to vector<8x128xf32>
    %519 = arith.mulf %401, %518 : vector<8x128xf32>
    %520 = arith.subf %517, %519 : vector<8x128xf32>
    %521 = vector.broadcast %19 : f32 to vector<8x128xf32>
    %522 = arith.mulf %372, %521 : vector<8x128xf32>
    %523 = arith.addf %520, %522 : vector<8x128xf32>
    %524 = vector.broadcast %23 : f32 to vector<8x128xf32>
    %525 = arith.mulf %375, %524 : vector<8x128xf32>
    %526 = arith.subf %523, %525 : vector<8x128xf32>
    %527 = vector.broadcast %15 : f32 to vector<8x128xf32>
    %528 = arith.mulf %400, %527 : vector<8x128xf32>
    %529 = vector.broadcast %11 : f32 to vector<8x128xf32>
    %530 = arith.mulf %401, %529 : vector<8x128xf32>
    %531 = arith.addf %528, %530 : vector<8x128xf32>
    %532 = vector.broadcast %23 : f32 to vector<8x128xf32>
    %533 = arith.mulf %372, %532 : vector<8x128xf32>
    %534 = arith.addf %531, %533 : vector<8x128xf32>
    %535 = vector.broadcast %19 : f32 to vector<8x128xf32>
    %536 = arith.mulf %375, %535 : vector<8x128xf32>
    %537 = arith.addf %534, %536 : vector<8x128xf32>
    %cst_135 = arith.constant 0.000000e+00 : f32
    %538 = vector.broadcast %cst_135 : f32 to vector<8x128xf32>
    %539 = arith.maximumf %526, %538 : vector<8x128xf32>
    %cst_136 = arith.constant 0.000000e+00 : f32
    %540 = vector.broadcast %cst_136 : f32 to vector<8x128xf32>
    %541 = arith.maximumf %537, %540 : vector<8x128xf32>
    %542 = vector.broadcast %27 : f32 to vector<8x128xf32>
    %543 = arith.mulf %539, %542 : vector<8x128xf32>
    %544 = vector.broadcast %31 : f32 to vector<8x128xf32>
    %545 = arith.mulf %541, %544 : vector<8x128xf32>
    %546 = arith.subf %543, %545 : vector<8x128xf32>
    %547 = arith.addf %509, %546 : vector<8x128xf32>
    %548 = vector.broadcast %31 : f32 to vector<8x128xf32>
    %549 = arith.mulf %539, %548 : vector<8x128xf32>
    %550 = vector.broadcast %27 : f32 to vector<8x128xf32>
    %551 = arith.mulf %541, %550 : vector<8x128xf32>
    %552 = arith.addf %549, %551 : vector<8x128xf32>
    %553 = arith.addf %515, %552 : vector<8x128xf32>
    %554 = arith.mulf %547, %547 : vector<8x128xf32>
    %555 = arith.mulf %553, %553 : vector<8x128xf32>
    %556 = arith.addf %554, %555 : vector<8x128xf32>
    %557 = arith.maximumf %4, %556 : vector<8x128xf32>
    %558 = math.rsqrt %557 : vector<8x128xf32>
    %559 = arith.mulf %6, %558 : vector<8x128xf32>
    %cst_137 = arith.constant 1.000000e+00 : f32
    %560 = vector.broadcast %cst_137 : f32 to vector<8x128xf32>
    %561 = arith.minimumf %559, %560 : vector<8x128xf32>
    %562 = arith.mulf %547, %561 : vector<8x128xf32>
    %563 = arith.mulf %553, %561 : vector<8x128xf32>
    %c0_138 = arith.constant 0 : index
    %c2_139 = arith.constant 2 : index
    %c0_140 = arith.constant 0 : index
    %c0_141 = arith.constant 0 : index
    %564 = vector.load %arg7[%c0_138, %c2_139, %c0_140, %c0_141] : memref<6x6x8x128xf32, #tpu.memory_space<vmem>>, vector<1x1x8x128xf32>
    %565 = vector.shape_cast %564 : vector<1x1x8x128xf32> to vector<8x128xf32>
    %566 = vector.shape_cast %562 : vector<8x128xf32> to vector<1x1x8x128xf32>
    tpu.vector_store %arg7[%c0_138, %c2_139, %c0_140, %c0_141], %566 {strides = array<i32>} : memref<6x6x8x128xf32, #tpu.memory_space<vmem>>, vector<1x1x8x128xf32>,
    %c1_142 = arith.constant 1 : index
    %c2_143 = arith.constant 2 : index
    %c0_144 = arith.constant 0 : index
    %c0_145 = arith.constant 0 : index
    %567 = vector.load %arg7[%c1_142, %c2_143, %c0_144, %c0_145] : memref<6x6x8x128xf32, #tpu.memory_space<vmem>>, vector<1x1x8x128xf32>
    %568 = vector.shape_cast %567 : vector<1x1x8x128xf32> to vector<8x128xf32>
    %569 = vector.shape_cast %563 : vector<8x128xf32> to vector<1x1x8x128xf32>
    tpu.vector_store %arg7[%c1_142, %c2_143, %c0_144, %c0_145], %569 {strides = array<i32>} : memref<6x6x8x128xf32, #tpu.memory_space<vmem>>, vector<1x1x8x128xf32>,
    %c2_146 = arith.constant 2 : index
    %c2_147 = arith.constant 2 : index
    %c0_148 = arith.constant 0 : index
    %c0_149 = arith.constant 0 : index
    %570 = vector.load %arg7[%c2_146, %c2_147, %c0_148, %c0_149] : memref<6x6x8x128xf32, #tpu.memory_space<vmem>>, vector<1x1x8x128xf32>
    %571 = vector.shape_cast %570 : vector<1x1x8x128xf32> to vector<8x128xf32>
    %572 = vector.shape_cast %340 : vector<8x128xf32> to vector<1x1x8x128xf32>
    tpu.vector_store %arg7[%c2_146, %c2_147, %c0_148, %c0_149], %572 {strides = array<i32>} : memref<6x6x8x128xf32, #tpu.memory_space<vmem>>, vector<1x1x8x128xf32>,
    %c3_150 = arith.constant 3 : index
    %c2_151 = arith.constant 2 : index
    %c0_152 = arith.constant 0 : index
    %c0_153 = arith.constant 0 : index
    %573 = vector.load %arg7[%c3_150, %c2_151, %c0_152, %c0_153] : memref<6x6x8x128xf32, #tpu.memory_space<vmem>>, vector<1x1x8x128xf32>
    %574 = vector.shape_cast %573 : vector<1x1x8x128xf32> to vector<8x128xf32>
    %575 = vector.shape_cast %341 : vector<8x128xf32> to vector<1x1x8x128xf32>
    tpu.vector_store %arg7[%c3_150, %c2_151, %c0_152, %c0_153], %575 {strides = array<i32>} : memref<6x6x8x128xf32, #tpu.memory_space<vmem>>, vector<1x1x8x128xf32>,
    %c4_154 = arith.constant 4 : index
    %c2_155 = arith.constant 2 : index
    %c0_156 = arith.constant 0 : index
    %c0_157 = arith.constant 0 : index
    %576 = vector.load %arg7[%c4_154, %c2_155, %c0_156, %c0_157] : memref<6x6x8x128xf32, #tpu.memory_space<vmem>>, vector<1x1x8x128xf32>
    %577 = vector.shape_cast %576 : vector<1x1x8x128xf32> to vector<8x128xf32>
    %578 = vector.shape_cast %360 : vector<8x128xf32> to vector<1x1x8x128xf32>
    tpu.vector_store %arg7[%c4_154, %c2_155, %c0_156, %c0_157], %578 {strides = array<i32>} : memref<6x6x8x128xf32, #tpu.memory_space<vmem>>, vector<1x1x8x128xf32>,
    %c5_158 = arith.constant 5 : index
    %c2_159 = arith.constant 2 : index
    %c0_160 = arith.constant 0 : index
    %c0_161 = arith.constant 0 : index
    %579 = vector.load %arg7[%c5_158, %c2_159, %c0_160, %c0_161] : memref<6x6x8x128xf32, #tpu.memory_space<vmem>>, vector<1x1x8x128xf32>
    %580 = vector.shape_cast %579 : vector<1x1x8x128xf32> to vector<8x128xf32>
    %581 = vector.shape_cast %363 : vector<8x128xf32> to vector<1x1x8x128xf32>
    tpu.vector_store %arg7[%c5_158, %c2_159, %c0_160, %c0_161], %581 {strides = array<i32>} : memref<6x6x8x128xf32, #tpu.memory_space<vmem>>, vector<1x1x8x128xf32>,
    %582 = arith.mulf %0, %562 : vector<8x128xf32>
    %583 = arith.mulf %1, %563 : vector<8x128xf32>
    %584 = arith.subf %582, %583 : vector<8x128xf32>
    %585 = arith.mulf %0, %563 : vector<8x128xf32>
    %586 = arith.mulf %1, %562 : vector<8x128xf32>
    %587 = arith.addf %585, %586 : vector<8x128xf32>
    %588 = arith.mulf %562, %562 : vector<8x128xf32>
    %589 = arith.mulf %563, %563 : vector<8x128xf32>
    %590 = arith.addf %588, %589 : vector<8x128xf32>
    %591 = vector.shape_cast %590 : vector<8x128xf32> to vector<1x8x128xf32>
    %592 = vector.broadcast %591 : vector<1x8x128xf32> to vector<8x8x128xf32>
    %593 = arith.mulf %2, %592 : vector<8x8x128xf32>
    %cst_162 = arith.constant dense<0.000000e+00> : vector<8x128xf32>
    %594 = vector.multi_reduction <add>, %593, %cst_162 [1] : vector<8x8x128xf32> to vector<8x128xf32>
    %595 = arith.addf %594, %3 : vector<8x128xf32>
    %596 = tpu.reciprocal %595 {approx = true} : vector<8x128xf32> -> vector<8x128xf32>
    %597 = arith.mulf %595, %596 : vector<8x128xf32>
    %cst_163 = arith.constant 2.000000e+00 : f32
    %598 = vector.broadcast %cst_163 : f32 to vector<8x128xf32>
    %599 = arith.subf %598, %597 : vector<8x128xf32>
    %600 = arith.mulf %596, %599 : vector<8x128xf32>
    %601 = arith.mulf %584, %600 : vector<8x128xf32>
    %602 = arith.mulf %587, %600 : vector<8x128xf32>
    %603 = arith.mulf %601, %584 : vector<8x128xf32>
    %604 = arith.mulf %602, %587 : vector<8x128xf32>
    %605 = arith.addf %603, %604 : vector<8x128xf32>
    %cst_164 = arith.constant 1.000000e+00 : f32
    %606 = vector.broadcast %cst_164 : f32 to vector<8x128xf32>
    %607 = arith.subf %606, %605 : vector<8x128xf32>
    %608 = arith.mulf %601, %587 : vector<8x128xf32>
    %609 = arith.mulf %602, %584 : vector<8x128xf32>
    %610 = arith.subf %608, %609 : vector<8x128xf32>
    %cst_165 = arith.constant 0.000000e+00 : f32
    %611 = vector.broadcast %cst_165 : f32 to vector<8x128xf32>
    %612 = arith.subf %611, %610 : vector<8x128xf32>
    %613 = arith.mulf %607, %607 : vector<8x128xf32>
    %614 = arith.mulf %612, %612 : vector<8x128xf32>
    %615 = arith.addf %613, %614 : vector<8x128xf32>
    %616 = tpu.reciprocal %615 {approx = true} : vector<8x128xf32> -> vector<8x128xf32>
    %617 = arith.mulf %615, %616 : vector<8x128xf32>
    %cst_166 = arith.constant 2.000000e+00 : f32
    %618 = vector.broadcast %cst_166 : f32 to vector<8x128xf32>
    %619 = arith.subf %618, %617 : vector<8x128xf32>
    %620 = arith.mulf %616, %619 : vector<8x128xf32>
    %621 = arith.mulf %607, %620 : vector<8x128xf32>
    %cst_167 = arith.constant 0.000000e+00 : f32
    %622 = vector.broadcast %cst_167 : f32 to vector<8x128xf32>
    %623 = arith.subf %622, %612 : vector<8x128xf32>
    %624 = arith.mulf %623, %620 : vector<8x128xf32>
    %625 = arith.mulf %0, %601 : vector<8x128xf32>
    %626 = arith.mulf %1, %602 : vector<8x128xf32>
    %627 = arith.addf %625, %626 : vector<8x128xf32>
    %628 = arith.mulf %0, %602 : vector<8x128xf32>
    %629 = arith.mulf %1, %601 : vector<8x128xf32>
    %630 = arith.subf %628, %629 : vector<8x128xf32>
    %631 = arith.mulf %627, %621 : vector<8x128xf32>
    %632 = arith.mulf %630, %624 : vector<8x128xf32>
    %633 = arith.subf %631, %632 : vector<8x128xf32>
    %634 = arith.mulf %627, %624 : vector<8x128xf32>
    %635 = arith.mulf %630, %621 : vector<8x128xf32>
    %636 = arith.addf %634, %635 : vector<8x128xf32>
    %637 = arith.mulf %601, %601 : vector<8x128xf32>
    %638 = arith.mulf %602, %602 : vector<8x128xf32>
    %639 = arith.addf %637, %638 : vector<8x128xf32>
    %640 = math.sqrt %620 : vector<8x128xf32>
    %641 = arith.mulf %639, %640 : vector<8x128xf32>
    %642 = vector.shape_cast %641 : vector<8x128xf32> to vector<8x1x128xf32>
    %643 = vector.broadcast %642 : vector<8x1x128xf32> to vector<8x8x128xf32>
    %644 = arith.mulf %2, %643 : vector<8x8x128xf32>
    %cst_168 = arith.constant dense<0.000000e+00> : vector<8x128xf32>
    %645 = vector.multi_reduction <add>, %644, %cst_168 [0] : vector<8x8x128xf32> to vector<8x128xf32>
    %646 = math.absf %645 : vector<8x128xf32>
    %647 = arith.mulf %633, %633 : vector<8x128xf32>
    %648 = arith.mulf %636, %636 : vector<8x128xf32>
    %649 = arith.addf %647, %648 : vector<8x128xf32>
    %650 = math.sqrt %649 : vector<8x128xf32>
    %651 = arith.mulf %650, %7 : vector<8x128xf32>
    %652 = arith.subf %651, %646 : vector<8x128xf32>
    %cst_169 = arith.constant 0.000000e+00 : f32
    %653 = vector.broadcast %cst_169 : f32 to vector<8x128xf32>
    %654 = arith.maximumf %652, %653 : vector<8x128xf32>
    %655 = arith.addf %646, %654 : vector<8x128xf32>
    %656 = tpu.reciprocal %655 {approx = true} : vector<8x128xf32> -> vector<8x128xf32>
    %657 = arith.mulf %655, %656 : vector<8x128xf32>
    %cst_170 = arith.constant 2.000000e+00 : f32
    %658 = vector.broadcast %cst_170 : f32 to vector<8x128xf32>
    %659 = arith.subf %658, %657 : vector<8x128xf32>
    %660 = arith.mulf %656, %659 : vector<8x128xf32>
    %661 = arith.mulf %633, %660 : vector<8x128xf32>
    %662 = arith.mulf %636, %660 : vector<8x128xf32>
    %663 = vector.broadcast %8 : f32 to vector<8x128xf32>
    %664 = arith.mulf %661, %663 : vector<8x128xf32>
    %665 = vector.broadcast %12 : f32 to vector<8x128xf32>
    %666 = arith.mulf %662, %665 : vector<8x128xf32>
    %667 = arith.subf %664, %666 : vector<8x128xf32>
    %668 = vector.broadcast %16 : f32 to vector<8x128xf32>
    %669 = arith.mulf %633, %668 : vector<8x128xf32>
    %670 = arith.addf %667, %669 : vector<8x128xf32>
    %671 = vector.broadcast %20 : f32 to vector<8x128xf32>
    %672 = arith.mulf %636, %671 : vector<8x128xf32>
    %673 = arith.subf %670, %672 : vector<8x128xf32>
    %674 = vector.broadcast %12 : f32 to vector<8x128xf32>
    %675 = arith.mulf %661, %674 : vector<8x128xf32>
    %676 = vector.broadcast %8 : f32 to vector<8x128xf32>
    %677 = arith.mulf %662, %676 : vector<8x128xf32>
    %678 = arith.addf %675, %677 : vector<8x128xf32>
    %679 = vector.broadcast %20 : f32 to vector<8x128xf32>
    %680 = arith.mulf %633, %679 : vector<8x128xf32>
    %681 = arith.addf %678, %680 : vector<8x128xf32>
    %682 = vector.broadcast %16 : f32 to vector<8x128xf32>
    %683 = arith.mulf %636, %682 : vector<8x128xf32>
    %684 = arith.addf %681, %683 : vector<8x128xf32>
    %cst_171 = arith.constant 0.000000e+00 : f32
    %685 = vector.broadcast %cst_171 : f32 to vector<8x128xf32>
    %686 = arith.maximumf %673, %685 : vector<8x128xf32>
    %cst_172 = arith.constant 0.000000e+00 : f32
    %687 = vector.broadcast %cst_172 : f32 to vector<8x128xf32>
    %688 = arith.maximumf %684, %687 : vector<8x128xf32>
    %689 = vector.broadcast %24 : f32 to vector<8x128xf32>
    %690 = arith.mulf %686, %689 : vector<8x128xf32>
    %691 = vector.broadcast %28 : f32 to vector<8x128xf32>
    %692 = arith.mulf %688, %691 : vector<8x128xf32>
    %693 = arith.subf %690, %692 : vector<8x128xf32>
    %694 = arith.addf %5, %693 : vector<8x128xf32>
    %695 = vector.broadcast %28 : f32 to vector<8x128xf32>
    %696 = arith.mulf %686, %695 : vector<8x128xf32>
    %697 = vector.broadcast %24 : f32 to vector<8x128xf32>
    %698 = arith.mulf %688, %697 : vector<8x128xf32>
    %699 = arith.addf %696, %698 : vector<8x128xf32>
    %700 = arith.addf %5, %699 : vector<8x128xf32>
    %701 = vector.broadcast %9 : f32 to vector<8x128xf32>
    %702 = arith.mulf %661, %701 : vector<8x128xf32>
    %703 = vector.broadcast %13 : f32 to vector<8x128xf32>
    %704 = arith.mulf %662, %703 : vector<8x128xf32>
    %705 = arith.subf %702, %704 : vector<8x128xf32>
    %706 = vector.broadcast %17 : f32 to vector<8x128xf32>
    %707 = arith.mulf %633, %706 : vector<8x128xf32>
    %708 = arith.addf %705, %707 : vector<8x128xf32>
    %709 = vector.broadcast %21 : f32 to vector<8x128xf32>
    %710 = arith.mulf %636, %709 : vector<8x128xf32>
    %711 = arith.subf %708, %710 : vector<8x128xf32>
    %712 = vector.broadcast %13 : f32 to vector<8x128xf32>
    %713 = arith.mulf %661, %712 : vector<8x128xf32>
    %714 = vector.broadcast %9 : f32 to vector<8x128xf32>
    %715 = arith.mulf %662, %714 : vector<8x128xf32>
    %716 = arith.addf %713, %715 : vector<8x128xf32>
    %717 = vector.broadcast %21 : f32 to vector<8x128xf32>
    %718 = arith.mulf %633, %717 : vector<8x128xf32>
    %719 = arith.addf %716, %718 : vector<8x128xf32>
    %720 = vector.broadcast %17 : f32 to vector<8x128xf32>
    %721 = arith.mulf %636, %720 : vector<8x128xf32>
    %722 = arith.addf %719, %721 : vector<8x128xf32>
    %cst_173 = arith.constant 0.000000e+00 : f32
    %723 = vector.broadcast %cst_173 : f32 to vector<8x128xf32>
    %724 = arith.maximumf %711, %723 : vector<8x128xf32>
    %cst_174 = arith.constant 0.000000e+00 : f32
    %725 = vector.broadcast %cst_174 : f32 to vector<8x128xf32>
    %726 = arith.maximumf %722, %725 : vector<8x128xf32>
    %727 = vector.broadcast %25 : f32 to vector<8x128xf32>
    %728 = arith.mulf %724, %727 : vector<8x128xf32>
    %729 = vector.broadcast %29 : f32 to vector<8x128xf32>
    %730 = arith.mulf %726, %729 : vector<8x128xf32>
    %731 = arith.subf %728, %730 : vector<8x128xf32>
    %732 = arith.addf %694, %731 : vector<8x128xf32>
    %733 = vector.broadcast %29 : f32 to vector<8x128xf32>
    %734 = arith.mulf %724, %733 : vector<8x128xf32>
    %735 = vector.broadcast %25 : f32 to vector<8x128xf32>
    %736 = arith.mulf %726, %735 : vector<8x128xf32>
    %737 = arith.addf %734, %736 : vector<8x128xf32>
    %738 = arith.addf %700, %737 : vector<8x128xf32>
    %739 = vector.broadcast %10 : f32 to vector<8x128xf32>
    %740 = arith.mulf %661, %739 : vector<8x128xf32>
    %741 = vector.broadcast %14 : f32 to vector<8x128xf32>
    %742 = arith.mulf %662, %741 : vector<8x128xf32>
    %743 = arith.subf %740, %742 : vector<8x128xf32>
    %744 = vector.broadcast %18 : f32 to vector<8x128xf32>
    %745 = arith.mulf %633, %744 : vector<8x128xf32>
    %746 = arith.addf %743, %745 : vector<8x128xf32>
    %747 = vector.broadcast %22 : f32 to vector<8x128xf32>
    %748 = arith.mulf %636, %747 : vector<8x128xf32>
    %749 = arith.subf %746, %748 : vector<8x128xf32>
    %750 = vector.broadcast %14 : f32 to vector<8x128xf32>
    %751 = arith.mulf %661, %750 : vector<8x128xf32>
    %752 = vector.broadcast %10 : f32 to vector<8x128xf32>
    %753 = arith.mulf %662, %752 : vector<8x128xf32>
    %754 = arith.addf %751, %753 : vector<8x128xf32>
    %755 = vector.broadcast %22 : f32 to vector<8x128xf32>
    %756 = arith.mulf %633, %755 : vector<8x128xf32>
    %757 = arith.addf %754, %756 : vector<8x128xf32>
    %758 = vector.broadcast %18 : f32 to vector<8x128xf32>
    %759 = arith.mulf %636, %758 : vector<8x128xf32>
    %760 = arith.addf %757, %759 : vector<8x128xf32>
    %cst_175 = arith.constant 0.000000e+00 : f32
    %761 = vector.broadcast %cst_175 : f32 to vector<8x128xf32>
    %762 = arith.maximumf %749, %761 : vector<8x128xf32>
    %cst_176 = arith.constant 0.000000e+00 : f32
    %763 = vector.broadcast %cst_176 : f32 to vector<8x128xf32>
    %764 = arith.maximumf %760, %763 : vector<8x128xf32>
    %765 = vector.broadcast %26 : f32 to vector<8x128xf32>
    %766 = arith.mulf %762, %765 : vector<8x128xf32>
    %767 = vector.broadcast %30 : f32 to vector<8x128xf32>
    %768 = arith.mulf %764, %767 : vector<8x128xf32>
    %769 = arith.subf %766, %768 : vector<8x128xf32>
    %770 = arith.addf %732, %769 : vector<8x128xf32>
    %771 = vector.broadcast %30 : f32 to vector<8x128xf32>
    %772 = arith.mulf %762, %771 : vector<8x128xf32>
    %773 = vector.broadcast %26 : f32 to vector<8x128xf32>
    %774 = arith.mulf %764, %773 : vector<8x128xf32>
    %775 = arith.addf %772, %774 : vector<8x128xf32>
    %776 = arith.addf %738, %775 : vector<8x128xf32>
    %777 = vector.broadcast %11 : f32 to vector<8x128xf32>
    %778 = arith.mulf %661, %777 : vector<8x128xf32>
    %779 = vector.broadcast %15 : f32 to vector<8x128xf32>
    %780 = arith.mulf %662, %779 : vector<8x128xf32>
    %781 = arith.subf %778, %780 : vector<8x128xf32>
    %782 = vector.broadcast %19 : f32 to vector<8x128xf32>
    %783 = arith.mulf %633, %782 : vector<8x128xf32>
    %784 = arith.addf %781, %783 : vector<8x128xf32>
    %785 = vector.broadcast %23 : f32 to vector<8x128xf32>
    %786 = arith.mulf %636, %785 : vector<8x128xf32>
    %787 = arith.subf %784, %786 : vector<8x128xf32>
    %788 = vector.broadcast %15 : f32 to vector<8x128xf32>
    %789 = arith.mulf %661, %788 : vector<8x128xf32>
    %790 = vector.broadcast %11 : f32 to vector<8x128xf32>
    %791 = arith.mulf %662, %790 : vector<8x128xf32>
    %792 = arith.addf %789, %791 : vector<8x128xf32>
    %793 = vector.broadcast %23 : f32 to vector<8x128xf32>
    %794 = arith.mulf %633, %793 : vector<8x128xf32>
    %795 = arith.addf %792, %794 : vector<8x128xf32>
    %796 = vector.broadcast %19 : f32 to vector<8x128xf32>
    %797 = arith.mulf %636, %796 : vector<8x128xf32>
    %798 = arith.addf %795, %797 : vector<8x128xf32>
    %cst_177 = arith.constant 0.000000e+00 : f32
    %799 = vector.broadcast %cst_177 : f32 to vector<8x128xf32>
    %800 = arith.maximumf %787, %799 : vector<8x128xf32>
    %cst_178 = arith.constant 0.000000e+00 : f32
    %801 = vector.broadcast %cst_178 : f32 to vector<8x128xf32>
    %802 = arith.maximumf %798, %801 : vector<8x128xf32>
    %803 = vector.broadcast %27 : f32 to vector<8x128xf32>
    %804 = arith.mulf %800, %803 : vector<8x128xf32>
    %805 = vector.broadcast %31 : f32 to vector<8x128xf32>
    %806 = arith.mulf %802, %805 : vector<8x128xf32>
    %807 = arith.subf %804, %806 : vector<8x128xf32>
    %808 = arith.addf %770, %807 : vector<8x128xf32>
    %809 = vector.broadcast %31 : f32 to vector<8x128xf32>
    %810 = arith.mulf %800, %809 : vector<8x128xf32>
    %811 = vector.broadcast %27 : f32 to vector<8x128xf32>
    %812 = arith.mulf %802, %811 : vector<8x128xf32>
    %813 = arith.addf %810, %812 : vector<8x128xf32>
    %814 = arith.addf %776, %813 : vector<8x128xf32>
    %815 = arith.mulf %808, %808 : vector<8x128xf32>
    %816 = arith.mulf %814, %814 : vector<8x128xf32>
    %817 = arith.addf %815, %816 : vector<8x128xf32>
    %818 = arith.maximumf %4, %817 : vector<8x128xf32>
    %819 = math.rsqrt %818 : vector<8x128xf32>
    %820 = arith.mulf %6, %819 : vector<8x128xf32>
    %cst_179 = arith.constant 1.000000e+00 : f32
    %821 = vector.broadcast %cst_179 : f32 to vector<8x128xf32>
    %822 = arith.minimumf %820, %821 : vector<8x128xf32>
    %823 = arith.mulf %808, %822 : vector<8x128xf32>
    %824 = arith.mulf %814, %822 : vector<8x128xf32>
    %c0_180 = arith.constant 0 : index
    %c3_181 = arith.constant 3 : index
    %c0_182 = arith.constant 0 : index
    %c0_183 = arith.constant 0 : index
    %825 = vector.load %arg7[%c0_180, %c3_181, %c0_182, %c0_183] : memref<6x6x8x128xf32, #tpu.memory_space<vmem>>, vector<1x1x8x128xf32>
    %826 = vector.shape_cast %825 : vector<1x1x8x128xf32> to vector<8x128xf32>
    %827 = vector.shape_cast %823 : vector<8x128xf32> to vector<1x1x8x128xf32>
    tpu.vector_store %arg7[%c0_180, %c3_181, %c0_182, %c0_183], %827 {strides = array<i32>} : memref<6x6x8x128xf32, #tpu.memory_space<vmem>>, vector<1x1x8x128xf32>,
    %c1_184 = arith.constant 1 : index
    %c3_185 = arith.constant 3 : index
    %c0_186 = arith.constant 0 : index
    %c0_187 = arith.constant 0 : index
    %828 = vector.load %arg7[%c1_184, %c3_185, %c0_186, %c0_187] : memref<6x6x8x128xf32, #tpu.memory_space<vmem>>, vector<1x1x8x128xf32>
    %829 = vector.shape_cast %828 : vector<1x1x8x128xf32> to vector<8x128xf32>
    %830 = vector.shape_cast %824 : vector<8x128xf32> to vector<1x1x8x128xf32>
    tpu.vector_store %arg7[%c1_184, %c3_185, %c0_186, %c0_187], %830 {strides = array<i32>} : memref<6x6x8x128xf32, #tpu.memory_space<vmem>>, vector<1x1x8x128xf32>,
    %c2_188 = arith.constant 2 : index
    %c3_189 = arith.constant 3 : index
    %c0_190 = arith.constant 0 : index
    %c0_191 = arith.constant 0 : index
    %831 = vector.load %arg7[%c2_188, %c3_189, %c0_190, %c0_191] : memref<6x6x8x128xf32, #tpu.memory_space<vmem>>, vector<1x1x8x128xf32>
    %832 = vector.shape_cast %831 : vector<1x1x8x128xf32> to vector<8x128xf32>
    %833 = vector.shape_cast %601 : vector<8x128xf32> to vector<1x1x8x128xf32>
    tpu.vector_store %arg7[%c2_188, %c3_189, %c0_190, %c0_191], %833 {strides = array<i32>} : memref<6x6x8x128xf32, #tpu.memory_space<vmem>>, vector<1x1x8x128xf32>,
    %c3_192 = arith.constant 3 : index
    %c3_193 = arith.constant 3 : index
    %c0_194 = arith.constant 0 : index
    %c0_195 = arith.constant 0 : index
    %834 = vector.load %arg7[%c3_192, %c3_193, %c0_194, %c0_195] : memref<6x6x8x128xf32, #tpu.memory_space<vmem>>, vector<1x1x8x128xf32>
    %835 = vector.shape_cast %834 : vector<1x1x8x128xf32> to vector<8x128xf32>
    %836 = vector.shape_cast %602 : vector<8x128xf32> to vector<1x1x8x128xf32>
    tpu.vector_store %arg7[%c3_192, %c3_193, %c0_194, %c0_195], %836 {strides = array<i32>} : memref<6x6x8x128xf32, #tpu.memory_space<vmem>>, vector<1x1x8x128xf32>,
    %c4_196 = arith.constant 4 : index
    %c3_197 = arith.constant 3 : index
    %c0_198 = arith.constant 0 : index
    %c0_199 = arith.constant 0 : index
    %837 = vector.load %arg7[%c4_196, %c3_197, %c0_198, %c0_199] : memref<6x6x8x128xf32, #tpu.memory_space<vmem>>, vector<1x1x8x128xf32>
    %838 = vector.shape_cast %837 : vector<1x1x8x128xf32> to vector<8x128xf32>
    %839 = vector.shape_cast %621 : vector<8x128xf32> to vector<1x1x8x128xf32>
    tpu.vector_store %arg7[%c4_196, %c3_197, %c0_198, %c0_199], %839 {strides = array<i32>} : memref<6x6x8x128xf32, #tpu.memory_space<vmem>>, vector<1x1x8x128xf32>,
    %c5_200 = arith.constant 5 : index
    %c3_201 = arith.constant 3 : index
    %c0_202 = arith.constant 0 : index
    %c0_203 = arith.constant 0 : index
    %840 = vector.load %arg7[%c5_200, %c3_201, %c0_202, %c0_203] : memref<6x6x8x128xf32, #tpu.memory_space<vmem>>, vector<1x1x8x128xf32>
    %841 = vector.shape_cast %840 : vector<1x1x8x128xf32> to vector<8x128xf32>
    %842 = vector.shape_cast %624 : vector<8x128xf32> to vector<1x1x8x128xf32>
    tpu.vector_store %arg7[%c5_200, %c3_201, %c0_202, %c0_203], %842 {strides = array<i32>} : memref<6x6x8x128xf32, #tpu.memory_space<vmem>>, vector<1x1x8x128xf32>,
    %843 = arith.mulf %0, %823 : vector<8x128xf32>
    %844 = arith.mulf %1, %824 : vector<8x128xf32>
    %845 = arith.subf %843, %844 : vector<8x128xf32>
    %846 = arith.mulf %0, %824 : vector<8x128xf32>
    %847 = arith.mulf %1, %823 : vector<8x128xf32>
    %848 = arith.addf %846, %847 : vector<8x128xf32>
    %849 = arith.mulf %823, %823 : vector<8x128xf32>
    %850 = arith.mulf %824, %824 : vector<8x128xf32>
    %851 = arith.addf %849, %850 : vector<8x128xf32>
    %852 = vector.shape_cast %851 : vector<8x128xf32> to vector<1x8x128xf32>
    %853 = vector.broadcast %852 : vector<1x8x128xf32> to vector<8x8x128xf32>
    %854 = arith.mulf %2, %853 : vector<8x8x128xf32>
    %cst_204 = arith.constant dense<0.000000e+00> : vector<8x128xf32>
    %855 = vector.multi_reduction <add>, %854, %cst_204 [1] : vector<8x8x128xf32> to vector<8x128xf32>
    %856 = arith.addf %855, %3 : vector<8x128xf32>
    %857 = tpu.reciprocal %856 {approx = true} : vector<8x128xf32> -> vector<8x128xf32>
    %858 = arith.mulf %856, %857 : vector<8x128xf32>
    %cst_205 = arith.constant 2.000000e+00 : f32
    %859 = vector.broadcast %cst_205 : f32 to vector<8x128xf32>
    %860 = arith.subf %859, %858 : vector<8x128xf32>
    %861 = arith.mulf %857, %860 : vector<8x128xf32>
    %862 = arith.mulf %845, %861 : vector<8x128xf32>
    %863 = arith.mulf %848, %861 : vector<8x128xf32>
    %864 = arith.mulf %862, %845 : vector<8x128xf32>
    %865 = arith.mulf %863, %848 : vector<8x128xf32>
    %866 = arith.addf %864, %865 : vector<8x128xf32>
    %cst_206 = arith.constant 1.000000e+00 : f32
    %867 = vector.broadcast %cst_206 : f32 to vector<8x128xf32>
    %868 = arith.subf %867, %866 : vector<8x128xf32>
    %869 = arith.mulf %862, %848 : vector<8x128xf32>
    %870 = arith.mulf %863, %845 : vector<8x128xf32>
    %871 = arith.subf %869, %870 : vector<8x128xf32>
    %cst_207 = arith.constant 0.000000e+00 : f32
    %872 = vector.broadcast %cst_207 : f32 to vector<8x128xf32>
    %873 = arith.subf %872, %871 : vector<8x128xf32>
    %874 = arith.mulf %868, %868 : vector<8x128xf32>
    %875 = arith.mulf %873, %873 : vector<8x128xf32>
    %876 = arith.addf %874, %875 : vector<8x128xf32>
    %877 = tpu.reciprocal %876 {approx = true} : vector<8x128xf32> -> vector<8x128xf32>
    %878 = arith.mulf %876, %877 : vector<8x128xf32>
    %cst_208 = arith.constant 2.000000e+00 : f32
    %879 = vector.broadcast %cst_208 : f32 to vector<8x128xf32>
    %880 = arith.subf %879, %878 : vector<8x128xf32>
    %881 = arith.mulf %877, %880 : vector<8x128xf32>
    %882 = arith.mulf %868, %881 : vector<8x128xf32>
    %cst_209 = arith.constant 0.000000e+00 : f32
    %883 = vector.broadcast %cst_209 : f32 to vector<8x128xf32>
    %884 = arith.subf %883, %873 : vector<8x128xf32>
    %885 = arith.mulf %884, %881 : vector<8x128xf32>
    %886 = arith.mulf %0, %862 : vector<8x128xf32>
    %887 = arith.mulf %1, %863 : vector<8x128xf32>
    %888 = arith.addf %886, %887 : vector<8x128xf32>
    %889 = arith.mulf %0, %863 : vector<8x128xf32>
    %890 = arith.mulf %1, %862 : vector<8x128xf32>
    %891 = arith.subf %889, %890 : vector<8x128xf32>
    %892 = arith.mulf %888, %882 : vector<8x128xf32>
    %893 = arith.mulf %891, %885 : vector<8x128xf32>
    %894 = arith.subf %892, %893 : vector<8x128xf32>
    %895 = arith.mulf %888, %885 : vector<8x128xf32>
    %896 = arith.mulf %891, %882 : vector<8x128xf32>
    %897 = arith.addf %895, %896 : vector<8x128xf32>
    %898 = arith.mulf %862, %862 : vector<8x128xf32>
    %899 = arith.mulf %863, %863 : vector<8x128xf32>
    %900 = arith.addf %898, %899 : vector<8x128xf32>
    %901 = math.sqrt %881 : vector<8x128xf32>
    %902 = arith.mulf %900, %901 : vector<8x128xf32>
    %903 = vector.shape_cast %902 : vector<8x128xf32> to vector<8x1x128xf32>
    %904 = vector.broadcast %903 : vector<8x1x128xf32> to vector<8x8x128xf32>
    %905 = arith.mulf %2, %904 : vector<8x8x128xf32>
    %cst_210 = arith.constant dense<0.000000e+00> : vector<8x128xf32>
    %906 = vector.multi_reduction <add>, %905, %cst_210 [0] : vector<8x8x128xf32> to vector<8x128xf32>
    %907 = math.absf %906 : vector<8x128xf32>
    %908 = arith.mulf %894, %894 : vector<8x128xf32>
    %909 = arith.mulf %897, %897 : vector<8x128xf32>
    %910 = arith.addf %908, %909 : vector<8x128xf32>
    %911 = math.sqrt %910 : vector<8x128xf32>
    %912 = arith.mulf %911, %7 : vector<8x128xf32>
    %913 = arith.subf %912, %907 : vector<8x128xf32>
    %cst_211 = arith.constant 0.000000e+00 : f32
    %914 = vector.broadcast %cst_211 : f32 to vector<8x128xf32>
    %915 = arith.maximumf %913, %914 : vector<8x128xf32>
    %916 = arith.addf %907, %915 : vector<8x128xf32>
    %917 = tpu.reciprocal %916 {approx = true} : vector<8x128xf32> -> vector<8x128xf32>
    %918 = arith.mulf %916, %917 : vector<8x128xf32>
    %cst_212 = arith.constant 2.000000e+00 : f32
    %919 = vector.broadcast %cst_212 : f32 to vector<8x128xf32>
    %920 = arith.subf %919, %918 : vector<8x128xf32>
    %921 = arith.mulf %917, %920 : vector<8x128xf32>
    %922 = arith.mulf %894, %921 : vector<8x128xf32>
    %923 = arith.mulf %897, %921 : vector<8x128xf32>
    %924 = vector.broadcast %8 : f32 to vector<8x128xf32>
    %925 = arith.mulf %922, %924 : vector<8x128xf32>
    %926 = vector.broadcast %12 : f32 to vector<8x128xf32>
    %927 = arith.mulf %923, %926 : vector<8x128xf32>
    %928 = arith.subf %925, %927 : vector<8x128xf32>
    %929 = vector.broadcast %16 : f32 to vector<8x128xf32>
    %930 = arith.mulf %894, %929 : vector<8x128xf32>
    %931 = arith.addf %928, %930 : vector<8x128xf32>
    %932 = vector.broadcast %20 : f32 to vector<8x128xf32>
    %933 = arith.mulf %897, %932 : vector<8x128xf32>
    %934 = arith.subf %931, %933 : vector<8x128xf32>
    %935 = vector.broadcast %12 : f32 to vector<8x128xf32>
    %936 = arith.mulf %922, %935 : vector<8x128xf32>
    %937 = vector.broadcast %8 : f32 to vector<8x128xf32>
    %938 = arith.mulf %923, %937 : vector<8x128xf32>
    %939 = arith.addf %936, %938 : vector<8x128xf32>
    %940 = vector.broadcast %20 : f32 to vector<8x128xf32>
    %941 = arith.mulf %894, %940 : vector<8x128xf32>
    %942 = arith.addf %939, %941 : vector<8x128xf32>
    %943 = vector.broadcast %16 : f32 to vector<8x128xf32>
    %944 = arith.mulf %897, %943 : vector<8x128xf32>
    %945 = arith.addf %942, %944 : vector<8x128xf32>
    %cst_213 = arith.constant 0.000000e+00 : f32
    %946 = vector.broadcast %cst_213 : f32 to vector<8x128xf32>
    %947 = arith.maximumf %934, %946 : vector<8x128xf32>
    %cst_214 = arith.constant 0.000000e+00 : f32
    %948 = vector.broadcast %cst_214 : f32 to vector<8x128xf32>
    %949 = arith.maximumf %945, %948 : vector<8x128xf32>
    %950 = vector.broadcast %24 : f32 to vector<8x128xf32>
    %951 = arith.mulf %947, %950 : vector<8x128xf32>
    %952 = vector.broadcast %28 : f32 to vector<8x128xf32>
    %953 = arith.mulf %949, %952 : vector<8x128xf32>
    %954 = arith.subf %951, %953 : vector<8x128xf32>
    %955 = arith.addf %5, %954 : vector<8x128xf32>
    %956 = vector.broadcast %28 : f32 to vector<8x128xf32>
    %957 = arith.mulf %947, %956 : vector<8x128xf32>
    %958 = vector.broadcast %24 : f32 to vector<8x128xf32>
    %959 = arith.mulf %949, %958 : vector<8x128xf32>
    %960 = arith.addf %957, %959 : vector<8x128xf32>
    %961 = arith.addf %5, %960 : vector<8x128xf32>
    %962 = vector.broadcast %9 : f32 to vector<8x128xf32>
    %963 = arith.mulf %922, %962 : vector<8x128xf32>
    %964 = vector.broadcast %13 : f32 to vector<8x128xf32>
    %965 = arith.mulf %923, %964 : vector<8x128xf32>
    %966 = arith.subf %963, %965 : vector<8x128xf32>
    %967 = vector.broadcast %17 : f32 to vector<8x128xf32>
    %968 = arith.mulf %894, %967 : vector<8x128xf32>
    %969 = arith.addf %966, %968 : vector<8x128xf32>
    %970 = vector.broadcast %21 : f32 to vector<8x128xf32>
    %971 = arith.mulf %897, %970 : vector<8x128xf32>
    %972 = arith.subf %969, %971 : vector<8x128xf32>
    %973 = vector.broadcast %13 : f32 to vector<8x128xf32>
    %974 = arith.mulf %922, %973 : vector<8x128xf32>
    %975 = vector.broadcast %9 : f32 to vector<8x128xf32>
    %976 = arith.mulf %923, %975 : vector<8x128xf32>
    %977 = arith.addf %974, %976 : vector<8x128xf32>
    %978 = vector.broadcast %21 : f32 to vector<8x128xf32>
    %979 = arith.mulf %894, %978 : vector<8x128xf32>
    %980 = arith.addf %977, %979 : vector<8x128xf32>
    %981 = vector.broadcast %17 : f32 to vector<8x128xf32>
    %982 = arith.mulf %897, %981 : vector<8x128xf32>
    %983 = arith.addf %980, %982 : vector<8x128xf32>
    %cst_215 = arith.constant 0.000000e+00 : f32
    %984 = vector.broadcast %cst_215 : f32 to vector<8x128xf32>
    %985 = arith.maximumf %972, %984 : vector<8x128xf32>
    %cst_216 = arith.constant 0.000000e+00 : f32
    %986 = vector.broadcast %cst_216 : f32 to vector<8x128xf32>
    %987 = arith.maximumf %983, %986 : vector<8x128xf32>
    %988 = vector.broadcast %25 : f32 to vector<8x128xf32>
    %989 = arith.mulf %985, %988 : vector<8x128xf32>
    %990 = vector.broadcast %29 : f32 to vector<8x128xf32>
    %991 = arith.mulf %987, %990 : vector<8x128xf32>
    %992 = arith.subf %989, %991 : vector<8x128xf32>
    %993 = arith.addf %955, %992 : vector<8x128xf32>
    %994 = vector.broadcast %29 : f32 to vector<8x128xf32>
    %995 = arith.mulf %985, %994 : vector<8x128xf32>
    %996 = vector.broadcast %25 : f32 to vector<8x128xf32>
    %997 = arith.mulf %987, %996 : vector<8x128xf32>
    %998 = arith.addf %995, %997 : vector<8x128xf32>
    %999 = arith.addf %961, %998 : vector<8x128xf32>
    %1000 = vector.broadcast %10 : f32 to vector<8x128xf32>
    %1001 = arith.mulf %922, %1000 : vector<8x128xf32>
    %1002 = vector.broadcast %14 : f32 to vector<8x128xf32>
    %1003 = arith.mulf %923, %1002 : vector<8x128xf32>
    %1004 = arith.subf %1001, %1003 : vector<8x128xf32>
    %1005 = vector.broadcast %18 : f32 to vector<8x128xf32>
    %1006 = arith.mulf %894, %1005 : vector<8x128xf32>
    %1007 = arith.addf %1004, %1006 : vector<8x128xf32>
    %1008 = vector.broadcast %22 : f32 to vector<8x128xf32>
    %1009 = arith.mulf %897, %1008 : vector<8x128xf32>
    %1010 = arith.subf %1007, %1009 : vector<8x128xf32>
    %1011 = vector.broadcast %14 : f32 to vector<8x128xf32>
    %1012 = arith.mulf %922, %1011 : vector<8x128xf32>
    %1013 = vector.broadcast %10 : f32 to vector<8x128xf32>
    %1014 = arith.mulf %923, %1013 : vector<8x128xf32>
    %1015 = arith.addf %1012, %1014 : vector<8x128xf32>
    %1016 = vector.broadcast %22 : f32 to vector<8x128xf32>
    %1017 = arith.mulf %894, %1016 : vector<8x128xf32>
    %1018 = arith.addf %1015, %1017 : vector<8x128xf32>
    %1019 = vector.broadcast %18 : f32 to vector<8x128xf32>
    %1020 = arith.mulf %897, %1019 : vector<8x128xf32>
    %1021 = arith.addf %1018, %1020 : vector<8x128xf32>
    %cst_217 = arith.constant 0.000000e+00 : f32
    %1022 = vector.broadcast %cst_217 : f32 to vector<8x128xf32>
    %1023 = arith.maximumf %1010, %1022 : vector<8x128xf32>
    %cst_218 = arith.constant 0.000000e+00 : f32
    %1024 = vector.broadcast %cst_218 : f32 to vector<8x128xf32>
    %1025 = arith.maximumf %1021, %1024 : vector<8x128xf32>
    %1026 = vector.broadcast %26 : f32 to vector<8x128xf32>
    %1027 = arith.mulf %1023, %1026 : vector<8x128xf32>
    %1028 = vector.broadcast %30 : f32 to vector<8x128xf32>
    %1029 = arith.mulf %1025, %1028 : vector<8x128xf32>
    %1030 = arith.subf %1027, %1029 : vector<8x128xf32>
    %1031 = arith.addf %993, %1030 : vector<8x128xf32>
    %1032 = vector.broadcast %30 : f32 to vector<8x128xf32>
    %1033 = arith.mulf %1023, %1032 : vector<8x128xf32>
    %1034 = vector.broadcast %26 : f32 to vector<8x128xf32>
    %1035 = arith.mulf %1025, %1034 : vector<8x128xf32>
    %1036 = arith.addf %1033, %1035 : vector<8x128xf32>
    %1037 = arith.addf %999, %1036 : vector<8x128xf32>
    %1038 = vector.broadcast %11 : f32 to vector<8x128xf32>
    %1039 = arith.mulf %922, %1038 : vector<8x128xf32>
    %1040 = vector.broadcast %15 : f32 to vector<8x128xf32>
    %1041 = arith.mulf %923, %1040 : vector<8x128xf32>
    %1042 = arith.subf %1039, %1041 : vector<8x128xf32>
    %1043 = vector.broadcast %19 : f32 to vector<8x128xf32>
    %1044 = arith.mulf %894, %1043 : vector<8x128xf32>
    %1045 = arith.addf %1042, %1044 : vector<8x128xf32>
    %1046 = vector.broadcast %23 : f32 to vector<8x128xf32>
    %1047 = arith.mulf %897, %1046 : vector<8x128xf32>
    %1048 = arith.subf %1045, %1047 : vector<8x128xf32>
    %1049 = vector.broadcast %15 : f32 to vector<8x128xf32>
    %1050 = arith.mulf %922, %1049 : vector<8x128xf32>
    %1051 = vector.broadcast %11 : f32 to vector<8x128xf32>
    %1052 = arith.mulf %923, %1051 : vector<8x128xf32>
    %1053 = arith.addf %1050, %1052 : vector<8x128xf32>
    %1054 = vector.broadcast %23 : f32 to vector<8x128xf32>
    %1055 = arith.mulf %894, %1054 : vector<8x128xf32>
    %1056 = arith.addf %1053, %1055 : vector<8x128xf32>
    %1057 = vector.broadcast %19 : f32 to vector<8x128xf32>
    %1058 = arith.mulf %897, %1057 : vector<8x128xf32>
    %1059 = arith.addf %1056, %1058 : vector<8x128xf32>
    %cst_219 = arith.constant 0.000000e+00 : f32
    %1060 = vector.broadcast %cst_219 : f32 to vector<8x128xf32>
    %1061 = arith.maximumf %1048, %1060 : vector<8x128xf32>
    %cst_220 = arith.constant 0.000000e+00 : f32
    %1062 = vector.broadcast %cst_220 : f32 to vector<8x128xf32>
    %1063 = arith.maximumf %1059, %1062 : vector<8x128xf32>
    %1064 = vector.broadcast %27 : f32 to vector<8x128xf32>
    %1065 = arith.mulf %1061, %1064 : vector<8x128xf32>
    %1066 = vector.broadcast %31 : f32 to vector<8x128xf32>
    %1067 = arith.mulf %1063, %1066 : vector<8x128xf32>
    %1068 = arith.subf %1065, %1067 : vector<8x128xf32>
    %1069 = arith.addf %1031, %1068 : vector<8x128xf32>
    %1070 = vector.broadcast %31 : f32 to vector<8x128xf32>
    %1071 = arith.mulf %1061, %1070 : vector<8x128xf32>
    %1072 = vector.broadcast %27 : f32 to vector<8x128xf32>
    %1073 = arith.mulf %1063, %1072 : vector<8x128xf32>
    %1074 = arith.addf %1071, %1073 : vector<8x128xf32>
    %1075 = arith.addf %1037, %1074 : vector<8x128xf32>
    %1076 = arith.mulf %1069, %1069 : vector<8x128xf32>
    %1077 = arith.mulf %1075, %1075 : vector<8x128xf32>
    %1078 = arith.addf %1076, %1077 : vector<8x128xf32>
    %1079 = arith.maximumf %4, %1078 : vector<8x128xf32>
    %1080 = math.rsqrt %1079 : vector<8x128xf32>
    %1081 = arith.mulf %6, %1080 : vector<8x128xf32>
    %cst_221 = arith.constant 1.000000e+00 : f32
    %1082 = vector.broadcast %cst_221 : f32 to vector<8x128xf32>
    %1083 = arith.minimumf %1081, %1082 : vector<8x128xf32>
    %1084 = arith.mulf %1069, %1083 : vector<8x128xf32>
    %1085 = arith.mulf %1075, %1083 : vector<8x128xf32>
    %c0_222 = arith.constant 0 : index
    %c4_223 = arith.constant 4 : index
    %c0_224 = arith.constant 0 : index
    %c0_225 = arith.constant 0 : index
    %1086 = vector.load %arg7[%c0_222, %c4_223, %c0_224, %c0_225] : memref<6x6x8x128xf32, #tpu.memory_space<vmem>>, vector<1x1x8x128xf32>
    %1087 = vector.shape_cast %1086 : vector<1x1x8x128xf32> to vector<8x128xf32>
    %1088 = vector.shape_cast %1084 : vector<8x128xf32> to vector<1x1x8x128xf32>
    tpu.vector_store %arg7[%c0_222, %c4_223, %c0_224, %c0_225], %1088 {strides = array<i32>} : memref<6x6x8x128xf32, #tpu.memory_space<vmem>>, vector<1x1x8x128xf32>,
    %c1_226 = arith.constant 1 : index
    %c4_227 = arith.constant 4 : index
    %c0_228 = arith.constant 0 : index
    %c0_229 = arith.constant 0 : index
    %1089 = vector.load %arg7[%c1_226, %c4_227, %c0_228, %c0_229] : memref<6x6x8x128xf32, #tpu.memory_space<vmem>>, vector<1x1x8x128xf32>
    %1090 = vector.shape_cast %1089 : vector<1x1x8x128xf32> to vector<8x128xf32>
    %1091 = vector.shape_cast %1085 : vector<8x128xf32> to vector<1x1x8x128xf32>
    tpu.vector_store %arg7[%c1_226, %c4_227, %c0_228, %c0_229], %1091 {strides = array<i32>} : memref<6x6x8x128xf32, #tpu.memory_space<vmem>>, vector<1x1x8x128xf32>,
    %c2_230 = arith.constant 2 : index
    %c4_231 = arith.constant 4 : index
    %c0_232 = arith.constant 0 : index
    %c0_233 = arith.constant 0 : index
    %1092 = vector.load %arg7[%c2_230, %c4_231, %c0_232, %c0_233] : memref<6x6x8x128xf32, #tpu.memory_space<vmem>>, vector<1x1x8x128xf32>
    %1093 = vector.shape_cast %1092 : vector<1x1x8x128xf32> to vector<8x128xf32>
    %1094 = vector.shape_cast %862 : vector<8x128xf32> to vector<1x1x8x128xf32>
    tpu.vector_store %arg7[%c2_230, %c4_231, %c0_232, %c0_233], %1094 {strides = array<i32>} : memref<6x6x8x128xf32, #tpu.memory_space<vmem>>, vector<1x1x8x128xf32>,
    %c3_234 = arith.constant 3 : index
    %c4_235 = arith.constant 4 : index
    %c0_236 = arith.constant 0 : index
    %c0_237 = arith.constant 0 : index
    %1095 = vector.load %arg7[%c3_234, %c4_235, %c0_236, %c0_237] : memref<6x6x8x128xf32, #tpu.memory_space<vmem>>, vector<1x1x8x128xf32>
    %1096 = vector.shape_cast %1095 : vector<1x1x8x128xf32> to vector<8x128xf32>
    %1097 = vector.shape_cast %863 : vector<8x128xf32> to vector<1x1x8x128xf32>
    tpu.vector_store %arg7[%c3_234, %c4_235, %c0_236, %c0_237], %1097 {strides = array<i32>} : memref<6x6x8x128xf32, #tpu.memory_space<vmem>>, vector<1x1x8x128xf32>,
    %c4_238 = arith.constant 4 : index
    %c4_239 = arith.constant 4 : index
    %c0_240 = arith.constant 0 : index
    %c0_241 = arith.constant 0 : index
    %1098 = vector.load %arg7[%c4_238, %c4_239, %c0_240, %c0_241] : memref<6x6x8x128xf32, #tpu.memory_space<vmem>>, vector<1x1x8x128xf32>
    %1099 = vector.shape_cast %1098 : vector<1x1x8x128xf32> to vector<8x128xf32>
    %1100 = vector.shape_cast %882 : vector<8x128xf32> to vector<1x1x8x128xf32>
    tpu.vector_store %arg7[%c4_238, %c4_239, %c0_240, %c0_241], %1100 {strides = array<i32>} : memref<6x6x8x128xf32, #tpu.memory_space<vmem>>, vector<1x1x8x128xf32>,
    %c5_242 = arith.constant 5 : index
    %c4_243 = arith.constant 4 : index
    %c0_244 = arith.constant 0 : index
    %c0_245 = arith.constant 0 : index
    %1101 = vector.load %arg7[%c5_242, %c4_243, %c0_244, %c0_245] : memref<6x6x8x128xf32, #tpu.memory_space<vmem>>, vector<1x1x8x128xf32>
    %1102 = vector.shape_cast %1101 : vector<1x1x8x128xf32> to vector<8x128xf32>
    %1103 = vector.shape_cast %885 : vector<8x128xf32> to vector<1x1x8x128xf32>
    tpu.vector_store %arg7[%c5_242, %c4_243, %c0_244, %c0_245], %1103 {strides = array<i32>} : memref<6x6x8x128xf32, #tpu.memory_space<vmem>>, vector<1x1x8x128xf32>,
    %1104 = arith.mulf %0, %1084 : vector<8x128xf32>
    %1105 = arith.mulf %1, %1085 : vector<8x128xf32>
    %1106 = arith.subf %1104, %1105 : vector<8x128xf32>
    %1107 = arith.mulf %0, %1085 : vector<8x128xf32>
    %1108 = arith.mulf %1, %1084 : vector<8x128xf32>
    %1109 = arith.addf %1107, %1108 : vector<8x128xf32>
    %1110 = arith.mulf %1084, %1084 : vector<8x128xf32>
    %1111 = arith.mulf %1085, %1085 : vector<8x128xf32>
    %1112 = arith.addf %1110, %1111 : vector<8x128xf32>
    %1113 = vector.shape_cast %1112 : vector<8x128xf32> to vector<1x8x128xf32>
    %1114 = vector.broadcast %1113 : vector<1x8x128xf32> to vector<8x8x128xf32>
    %1115 = arith.mulf %2, %1114 : vector<8x8x128xf32>
    %cst_246 = arith.constant dense<0.000000e+00> : vector<8x128xf32>
    %1116 = vector.multi_reduction <add>, %1115, %cst_246 [1] : vector<8x8x128xf32> to vector<8x128xf32>
    %1117 = arith.addf %1116, %3 : vector<8x128xf32>
    %1118 = tpu.reciprocal %1117 {approx = true} : vector<8x128xf32> -> vector<8x128xf32>
    %1119 = arith.mulf %1117, %1118 : vector<8x128xf32>
    %cst_247 = arith.constant 2.000000e+00 : f32
    %1120 = vector.broadcast %cst_247 : f32 to vector<8x128xf32>
    %1121 = arith.subf %1120, %1119 : vector<8x128xf32>
    %1122 = arith.mulf %1118, %1121 : vector<8x128xf32>
    %1123 = arith.mulf %1106, %1122 : vector<8x128xf32>
    %1124 = arith.mulf %1109, %1122 : vector<8x128xf32>
    %1125 = arith.mulf %1123, %1106 : vector<8x128xf32>
    %1126 = arith.mulf %1124, %1109 : vector<8x128xf32>
    %1127 = arith.addf %1125, %1126 : vector<8x128xf32>
    %cst_248 = arith.constant 1.000000e+00 : f32
    %1128 = vector.broadcast %cst_248 : f32 to vector<8x128xf32>
    %1129 = arith.subf %1128, %1127 : vector<8x128xf32>
    %1130 = arith.mulf %1123, %1109 : vector<8x128xf32>
    %1131 = arith.mulf %1124, %1106 : vector<8x128xf32>
    %1132 = arith.subf %1130, %1131 : vector<8x128xf32>
    %cst_249 = arith.constant 0.000000e+00 : f32
    %1133 = vector.broadcast %cst_249 : f32 to vector<8x128xf32>
    %1134 = arith.subf %1133, %1132 : vector<8x128xf32>
    %1135 = arith.mulf %1129, %1129 : vector<8x128xf32>
    %1136 = arith.mulf %1134, %1134 : vector<8x128xf32>
    %1137 = arith.addf %1135, %1136 : vector<8x128xf32>
    %1138 = tpu.reciprocal %1137 {approx = true} : vector<8x128xf32> -> vector<8x128xf32>
    %1139 = arith.mulf %1137, %1138 : vector<8x128xf32>
    %cst_250 = arith.constant 2.000000e+00 : f32
    %1140 = vector.broadcast %cst_250 : f32 to vector<8x128xf32>
    %1141 = arith.subf %1140, %1139 : vector<8x128xf32>
    %1142 = arith.mulf %1138, %1141 : vector<8x128xf32>
    %1143 = arith.mulf %1129, %1142 : vector<8x128xf32>
    %cst_251 = arith.constant 0.000000e+00 : f32
    %1144 = vector.broadcast %cst_251 : f32 to vector<8x128xf32>
    %1145 = arith.subf %1144, %1134 : vector<8x128xf32>
    %1146 = arith.mulf %1145, %1142 : vector<8x128xf32>
    %1147 = arith.mulf %0, %1123 : vector<8x128xf32>
    %1148 = arith.mulf %1, %1124 : vector<8x128xf32>
    %1149 = arith.addf %1147, %1148 : vector<8x128xf32>
    %1150 = arith.mulf %0, %1124 : vector<8x128xf32>
    %1151 = arith.mulf %1, %1123 : vector<8x128xf32>
    %1152 = arith.subf %1150, %1151 : vector<8x128xf32>
    %1153 = arith.mulf %1149, %1143 : vector<8x128xf32>
    %1154 = arith.mulf %1152, %1146 : vector<8x128xf32>
    %1155 = arith.subf %1153, %1154 : vector<8x128xf32>
    %1156 = arith.mulf %1149, %1146 : vector<8x128xf32>
    %1157 = arith.mulf %1152, %1143 : vector<8x128xf32>
    %1158 = arith.addf %1156, %1157 : vector<8x128xf32>
    %1159 = arith.mulf %1123, %1123 : vector<8x128xf32>
    %1160 = arith.mulf %1124, %1124 : vector<8x128xf32>
    %1161 = arith.addf %1159, %1160 : vector<8x128xf32>
    %1162 = math.sqrt %1142 : vector<8x128xf32>
    %1163 = arith.mulf %1161, %1162 : vector<8x128xf32>
    %1164 = vector.shape_cast %1163 : vector<8x128xf32> to vector<8x1x128xf32>
    %1165 = vector.broadcast %1164 : vector<8x1x128xf32> to vector<8x8x128xf32>
    %1166 = arith.mulf %2, %1165 : vector<8x8x128xf32>
    %cst_252 = arith.constant dense<0.000000e+00> : vector<8x128xf32>
    %1167 = vector.multi_reduction <add>, %1166, %cst_252 [0] : vector<8x8x128xf32> to vector<8x128xf32>
    %1168 = math.absf %1167 : vector<8x128xf32>
    %1169 = arith.mulf %1155, %1155 : vector<8x128xf32>
    %1170 = arith.mulf %1158, %1158 : vector<8x128xf32>
    %1171 = arith.addf %1169, %1170 : vector<8x128xf32>
    %1172 = math.sqrt %1171 : vector<8x128xf32>
    %1173 = arith.mulf %1172, %7 : vector<8x128xf32>
    %1174 = arith.subf %1173, %1168 : vector<8x128xf32>
    %cst_253 = arith.constant 0.000000e+00 : f32
    %1175 = vector.broadcast %cst_253 : f32 to vector<8x128xf32>
    %1176 = arith.maximumf %1174, %1175 : vector<8x128xf32>
    %1177 = arith.addf %1168, %1176 : vector<8x128xf32>
    %1178 = tpu.reciprocal %1177 {approx = true} : vector<8x128xf32> -> vector<8x128xf32>
    %1179 = arith.mulf %1177, %1178 : vector<8x128xf32>
    %cst_254 = arith.constant 2.000000e+00 : f32
    %1180 = vector.broadcast %cst_254 : f32 to vector<8x128xf32>
    %1181 = arith.subf %1180, %1179 : vector<8x128xf32>
    %1182 = arith.mulf %1178, %1181 : vector<8x128xf32>
    %1183 = arith.mulf %1155, %1182 : vector<8x128xf32>
    %1184 = arith.mulf %1158, %1182 : vector<8x128xf32>
    %1185 = vector.broadcast %8 : f32 to vector<8x128xf32>
    %1186 = arith.mulf %1183, %1185 : vector<8x128xf32>
    %1187 = vector.broadcast %12 : f32 to vector<8x128xf32>
    %1188 = arith.mulf %1184, %1187 : vector<8x128xf32>
    %1189 = arith.subf %1186, %1188 : vector<8x128xf32>
    %1190 = vector.broadcast %16 : f32 to vector<8x128xf32>
    %1191 = arith.mulf %1155, %1190 : vector<8x128xf32>
    %1192 = arith.addf %1189, %1191 : vector<8x128xf32>
    %1193 = vector.broadcast %20 : f32 to vector<8x128xf32>
    %1194 = arith.mulf %1158, %1193 : vector<8x128xf32>
    %1195 = arith.subf %1192, %1194 : vector<8x128xf32>
    %1196 = vector.broadcast %12 : f32 to vector<8x128xf32>
    %1197 = arith.mulf %1183, %1196 : vector<8x128xf32>
    %1198 = vector.broadcast %8 : f32 to vector<8x128xf32>
    %1199 = arith.mulf %1184, %1198 : vector<8x128xf32>
    %1200 = arith.addf %1197, %1199 : vector<8x128xf32>
    %1201 = vector.broadcast %20 : f32 to vector<8x128xf32>
    %1202 = arith.mulf %1155, %1201 : vector<8x128xf32>
    %1203 = arith.addf %1200, %1202 : vector<8x128xf32>
    %1204 = vector.broadcast %16 : f32 to vector<8x128xf32>
    %1205 = arith.mulf %1158, %1204 : vector<8x128xf32>
    %1206 = arith.addf %1203, %1205 : vector<8x128xf32>
    %cst_255 = arith.constant 0.000000e+00 : f32
    %1207 = vector.broadcast %cst_255 : f32 to vector<8x128xf32>
    %1208 = arith.maximumf %1195, %1207 : vector<8x128xf32>
    %cst_256 = arith.constant 0.000000e+00 : f32
    %1209 = vector.broadcast %cst_256 : f32 to vector<8x128xf32>
    %1210 = arith.maximumf %1206, %1209 : vector<8x128xf32>
    %1211 = vector.broadcast %24 : f32 to vector<8x128xf32>
    %1212 = arith.mulf %1208, %1211 : vector<8x128xf32>
    %1213 = vector.broadcast %28 : f32 to vector<8x128xf32>
    %1214 = arith.mulf %1210, %1213 : vector<8x128xf32>
    %1215 = arith.subf %1212, %1214 : vector<8x128xf32>
    %1216 = arith.addf %5, %1215 : vector<8x128xf32>
    %1217 = vector.broadcast %28 : f32 to vector<8x128xf32>
    %1218 = arith.mulf %1208, %1217 : vector<8x128xf32>
    %1219 = vector.broadcast %24 : f32 to vector<8x128xf32>
    %1220 = arith.mulf %1210, %1219 : vector<8x128xf32>
    %1221 = arith.addf %1218, %1220 : vector<8x128xf32>
    %1222 = arith.addf %5, %1221 : vector<8x128xf32>
    %1223 = vector.broadcast %9 : f32 to vector<8x128xf32>
    %1224 = arith.mulf %1183, %1223 : vector<8x128xf32>
    %1225 = vector.broadcast %13 : f32 to vector<8x128xf32>
    %1226 = arith.mulf %1184, %1225 : vector<8x128xf32>
    %1227 = arith.subf %1224, %1226 : vector<8x128xf32>
    %1228 = vector.broadcast %17 : f32 to vector<8x128xf32>
    %1229 = arith.mulf %1155, %1228 : vector<8x128xf32>
    %1230 = arith.addf %1227, %1229 : vector<8x128xf32>
    %1231 = vector.broadcast %21 : f32 to vector<8x128xf32>
    %1232 = arith.mulf %1158, %1231 : vector<8x128xf32>
    %1233 = arith.subf %1230, %1232 : vector<8x128xf32>
    %1234 = vector.broadcast %13 : f32 to vector<8x128xf32>
    %1235 = arith.mulf %1183, %1234 : vector<8x128xf32>
    %1236 = vector.broadcast %9 : f32 to vector<8x128xf32>
    %1237 = arith.mulf %1184, %1236 : vector<8x128xf32>
    %1238 = arith.addf %1235, %1237 : vector<8x128xf32>
    %1239 = vector.broadcast %21 : f32 to vector<8x128xf32>
    %1240 = arith.mulf %1155, %1239 : vector<8x128xf32>
    %1241 = arith.addf %1238, %1240 : vector<8x128xf32>
    %1242 = vector.broadcast %17 : f32 to vector<8x128xf32>
    %1243 = arith.mulf %1158, %1242 : vector<8x128xf32>
    %1244 = arith.addf %1241, %1243 : vector<8x128xf32>
    %cst_257 = arith.constant 0.000000e+00 : f32
    %1245 = vector.broadcast %cst_257 : f32 to vector<8x128xf32>
    %1246 = arith.maximumf %1233, %1245 : vector<8x128xf32>
    %cst_258 = arith.constant 0.000000e+00 : f32
    %1247 = vector.broadcast %cst_258 : f32 to vector<8x128xf32>
    %1248 = arith.maximumf %1244, %1247 : vector<8x128xf32>
    %1249 = vector.broadcast %25 : f32 to vector<8x128xf32>
    %1250 = arith.mulf %1246, %1249 : vector<8x128xf32>
    %1251 = vector.broadcast %29 : f32 to vector<8x128xf32>
    %1252 = arith.mulf %1248, %1251 : vector<8x128xf32>
    %1253 = arith.subf %1250, %1252 : vector<8x128xf32>
    %1254 = arith.addf %1216, %1253 : vector<8x128xf32>
    %1255 = vector.broadcast %29 : f32 to vector<8x128xf32>
    %1256 = arith.mulf %1246, %1255 : vector<8x128xf32>
    %1257 = vector.broadcast %25 : f32 to vector<8x128xf32>
    %1258 = arith.mulf %1248, %1257 : vector<8x128xf32>
    %1259 = arith.addf %1256, %1258 : vector<8x128xf32>
    %1260 = arith.addf %1222, %1259 : vector<8x128xf32>
    %1261 = vector.broadcast %10 : f32 to vector<8x128xf32>
    %1262 = arith.mulf %1183, %1261 : vector<8x128xf32>
    %1263 = vector.broadcast %14 : f32 to vector<8x128xf32>
    %1264 = arith.mulf %1184, %1263 : vector<8x128xf32>
    %1265 = arith.subf %1262, %1264 : vector<8x128xf32>
    %1266 = vector.broadcast %18 : f32 to vector<8x128xf32>
    %1267 = arith.mulf %1155, %1266 : vector<8x128xf32>
    %1268 = arith.addf %1265, %1267 : vector<8x128xf32>
    %1269 = vector.broadcast %22 : f32 to vector<8x128xf32>
    %1270 = arith.mulf %1158, %1269 : vector<8x128xf32>
    %1271 = arith.subf %1268, %1270 : vector<8x128xf32>
    %1272 = vector.broadcast %14 : f32 to vector<8x128xf32>
    %1273 = arith.mulf %1183, %1272 : vector<8x128xf32>
    %1274 = vector.broadcast %10 : f32 to vector<8x128xf32>
    %1275 = arith.mulf %1184, %1274 : vector<8x128xf32>
    %1276 = arith.addf %1273, %1275 : vector<8x128xf32>
    %1277 = vector.broadcast %22 : f32 to vector<8x128xf32>
    %1278 = arith.mulf %1155, %1277 : vector<8x128xf32>
    %1279 = arith.addf %1276, %1278 : vector<8x128xf32>
    %1280 = vector.broadcast %18 : f32 to vector<8x128xf32>
    %1281 = arith.mulf %1158, %1280 : vector<8x128xf32>
    %1282 = arith.addf %1279, %1281 : vector<8x128xf32>
    %cst_259 = arith.constant 0.000000e+00 : f32
    %1283 = vector.broadcast %cst_259 : f32 to vector<8x128xf32>
    %1284 = arith.maximumf %1271, %1283 : vector<8x128xf32>
    %cst_260 = arith.constant 0.000000e+00 : f32
    %1285 = vector.broadcast %cst_260 : f32 to vector<8x128xf32>
    %1286 = arith.maximumf %1282, %1285 : vector<8x128xf32>
    %1287 = vector.broadcast %26 : f32 to vector<8x128xf32>
    %1288 = arith.mulf %1284, %1287 : vector<8x128xf32>
    %1289 = vector.broadcast %30 : f32 to vector<8x128xf32>
    %1290 = arith.mulf %1286, %1289 : vector<8x128xf32>
    %1291 = arith.subf %1288, %1290 : vector<8x128xf32>
    %1292 = arith.addf %1254, %1291 : vector<8x128xf32>
    %1293 = vector.broadcast %30 : f32 to vector<8x128xf32>
    %1294 = arith.mulf %1284, %1293 : vector<8x128xf32>
    %1295 = vector.broadcast %26 : f32 to vector<8x128xf32>
    %1296 = arith.mulf %1286, %1295 : vector<8x128xf32>
    %1297 = arith.addf %1294, %1296 : vector<8x128xf32>
    %1298 = arith.addf %1260, %1297 : vector<8x128xf32>
    %1299 = vector.broadcast %11 : f32 to vector<8x128xf32>
    %1300 = arith.mulf %1183, %1299 : vector<8x128xf32>
    %1301 = vector.broadcast %15 : f32 to vector<8x128xf32>
    %1302 = arith.mulf %1184, %1301 : vector<8x128xf32>
    %1303 = arith.subf %1300, %1302 : vector<8x128xf32>
    %1304 = vector.broadcast %19 : f32 to vector<8x128xf32>
    %1305 = arith.mulf %1155, %1304 : vector<8x128xf32>
    %1306 = arith.addf %1303, %1305 : vector<8x128xf32>
    %1307 = vector.broadcast %23 : f32 to vector<8x128xf32>
    %1308 = arith.mulf %1158, %1307 : vector<8x128xf32>
    %1309 = arith.subf %1306, %1308 : vector<8x128xf32>
    %1310 = vector.broadcast %15 : f32 to vector<8x128xf32>
    %1311 = arith.mulf %1183, %1310 : vector<8x128xf32>
    %1312 = vector.broadcast %11 : f32 to vector<8x128xf32>
    %1313 = arith.mulf %1184, %1312 : vector<8x128xf32>
    %1314 = arith.addf %1311, %1313 : vector<8x128xf32>
    %1315 = vector.broadcast %23 : f32 to vector<8x128xf32>
    %1316 = arith.mulf %1155, %1315 : vector<8x128xf32>
    %1317 = arith.addf %1314, %1316 : vector<8x128xf32>
    %1318 = vector.broadcast %19 : f32 to vector<8x128xf32>
    %1319 = arith.mulf %1158, %1318 : vector<8x128xf32>
    %1320 = arith.addf %1317, %1319 : vector<8x128xf32>
    %cst_261 = arith.constant 0.000000e+00 : f32
    %1321 = vector.broadcast %cst_261 : f32 to vector<8x128xf32>
    %1322 = arith.maximumf %1309, %1321 : vector<8x128xf32>
    %cst_262 = arith.constant 0.000000e+00 : f32
    %1323 = vector.broadcast %cst_262 : f32 to vector<8x128xf32>
    %1324 = arith.maximumf %1320, %1323 : vector<8x128xf32>
    %1325 = vector.broadcast %27 : f32 to vector<8x128xf32>
    %1326 = arith.mulf %1322, %1325 : vector<8x128xf32>
    %1327 = vector.broadcast %31 : f32 to vector<8x128xf32>
    %1328 = arith.mulf %1324, %1327 : vector<8x128xf32>
    %1329 = arith.subf %1326, %1328 : vector<8x128xf32>
    %1330 = arith.addf %1292, %1329 : vector<8x128xf32>
    %1331 = vector.broadcast %31 : f32 to vector<8x128xf32>
    %1332 = arith.mulf %1322, %1331 : vector<8x128xf32>
    %1333 = vector.broadcast %27 : f32 to vector<8x128xf32>
    %1334 = arith.mulf %1324, %1333 : vector<8x128xf32>
    %1335 = arith.addf %1332, %1334 : vector<8x128xf32>
    %1336 = arith.addf %1298, %1335 : vector<8x128xf32>
    %1337 = arith.mulf %1330, %1330 : vector<8x128xf32>
    %1338 = arith.mulf %1336, %1336 : vector<8x128xf32>
    %1339 = arith.addf %1337, %1338 : vector<8x128xf32>
    %1340 = arith.maximumf %4, %1339 : vector<8x128xf32>
    %1341 = math.rsqrt %1340 : vector<8x128xf32>
    %1342 = arith.mulf %6, %1341 : vector<8x128xf32>
    %cst_263 = arith.constant 1.000000e+00 : f32
    %1343 = vector.broadcast %cst_263 : f32 to vector<8x128xf32>
    %1344 = arith.minimumf %1342, %1343 : vector<8x128xf32>
    %1345 = arith.mulf %1330, %1344 : vector<8x128xf32>
    %1346 = arith.mulf %1336, %1344 : vector<8x128xf32>
    %c0_264 = arith.constant 0 : index
    %c5_265 = arith.constant 5 : index
    %c0_266 = arith.constant 0 : index
    %c0_267 = arith.constant 0 : index
    %1347 = vector.load %arg7[%c0_264, %c5_265, %c0_266, %c0_267] : memref<6x6x8x128xf32, #tpu.memory_space<vmem>>, vector<1x1x8x128xf32>
    %1348 = vector.shape_cast %1347 : vector<1x1x8x128xf32> to vector<8x128xf32>
    %1349 = vector.shape_cast %1345 : vector<8x128xf32> to vector<1x1x8x128xf32>
    tpu.vector_store %arg7[%c0_264, %c5_265, %c0_266, %c0_267], %1349 {strides = array<i32>} : memref<6x6x8x128xf32, #tpu.memory_space<vmem>>, vector<1x1x8x128xf32>,
    %c1_268 = arith.constant 1 : index
    %c5_269 = arith.constant 5 : index
    %c0_270 = arith.constant 0 : index
    %c0_271 = arith.constant 0 : index
    %1350 = vector.load %arg7[%c1_268, %c5_269, %c0_270, %c0_271] : memref<6x6x8x128xf32, #tpu.memory_space<vmem>>, vector<1x1x8x128xf32>
    %1351 = vector.shape_cast %1350 : vector<1x1x8x128xf32> to vector<8x128xf32>
    %1352 = vector.shape_cast %1346 : vector<8x128xf32> to vector<1x1x8x128xf32>
    tpu.vector_store %arg7[%c1_268, %c5_269, %c0_270, %c0_271], %1352 {strides = array<i32>} : memref<6x6x8x128xf32, #tpu.memory_space<vmem>>, vector<1x1x8x128xf32>,
    %c2_272 = arith.constant 2 : index
    %c5_273 = arith.constant 5 : index
    %c0_274 = arith.constant 0 : index
    %c0_275 = arith.constant 0 : index
    %1353 = vector.load %arg7[%c2_272, %c5_273, %c0_274, %c0_275] : memref<6x6x8x128xf32, #tpu.memory_space<vmem>>, vector<1x1x8x128xf32>
    %1354 = vector.shape_cast %1353 : vector<1x1x8x128xf32> to vector<8x128xf32>
    %1355 = vector.shape_cast %1123 : vector<8x128xf32> to vector<1x1x8x128xf32>
    tpu.vector_store %arg7[%c2_272, %c5_273, %c0_274, %c0_275], %1355 {strides = array<i32>} : memref<6x6x8x128xf32, #tpu.memory_space<vmem>>, vector<1x1x8x128xf32>,
    %c3_276 = arith.constant 3 : index
    %c5_277 = arith.constant 5 : index
    %c0_278 = arith.constant 0 : index
    %c0_279 = arith.constant 0 : index
    %1356 = vector.load %arg7[%c3_276, %c5_277, %c0_278, %c0_279] : memref<6x6x8x128xf32, #tpu.memory_space<vmem>>, vector<1x1x8x128xf32>
    %1357 = vector.shape_cast %1356 : vector<1x1x8x128xf32> to vector<8x128xf32>
    %1358 = vector.shape_cast %1124 : vector<8x128xf32> to vector<1x1x8x128xf32>
    tpu.vector_store %arg7[%c3_276, %c5_277, %c0_278, %c0_279], %1358 {strides = array<i32>} : memref<6x6x8x128xf32, #tpu.memory_space<vmem>>, vector<1x1x8x128xf32>,
    %c4_280 = arith.constant 4 : index
    %c5_281 = arith.constant 5 : index
    %c0_282 = arith.constant 0 : index
    %c0_283 = arith.constant 0 : index
    %1359 = vector.load %arg7[%c4_280, %c5_281, %c0_282, %c0_283] : memref<6x6x8x128xf32, #tpu.memory_space<vmem>>, vector<1x1x8x128xf32>
    %1360 = vector.shape_cast %1359 : vector<1x1x8x128xf32> to vector<8x128xf32>
    %1361 = vector.shape_cast %1143 : vector<8x128xf32> to vector<1x1x8x128xf32>
    tpu.vector_store %arg7[%c4_280, %c5_281, %c0_282, %c0_283], %1361 {strides = array<i32>} : memref<6x6x8x128xf32, #tpu.memory_space<vmem>>, vector<1x1x8x128xf32>,
    %c5_284 = arith.constant 5 : index
    %c5_285 = arith.constant 5 : index
    %c0_286 = arith.constant 0 : index
    %c0_287 = arith.constant 0 : index
    %1362 = vector.load %arg7[%c5_284, %c5_285, %c0_286, %c0_287] : memref<6x6x8x128xf32, #tpu.memory_space<vmem>>, vector<1x1x8x128xf32>
    %1363 = vector.shape_cast %1362 : vector<1x1x8x128xf32> to vector<8x128xf32>
    %1364 = vector.shape_cast %1146 : vector<8x128xf32> to vector<1x1x8x128xf32>
    tpu.vector_store %arg7[%c5_284, %c5_285, %c0_286, %c0_287], %1364 {strides = array<i32>} : memref<6x6x8x128xf32, #tpu.memory_space<vmem>>, vector<1x1x8x128xf32>,
    return
  }
  func.func @transform_0(%arg0: i32) -> (i32, i32) {
    %c0_i32 = arith.constant 0 : i32
    %c0_i32_0 = arith.constant 0 : i32
    %c0_i32_1 = arith.constant 0 : i32
    return %c0_i32, %c0_i32_0 : i32, i32
  }
  func.func @transform_1(%arg0: i32) -> (i32, i32) {
    %c0_i32 = arith.constant 0 : i32
    %c0_i32_0 = arith.constant 0 : i32
    return %c0_i32, %arg0 : i32, i32
  }
  func.func @transform_2(%arg0: i32) -> (i32, i32) {
    %c0_i32 = arith.constant 0 : i32
    %c0_i32_0 = arith.constant 0 : i32
    return %c0_i32, %arg0 : i32, i32
  }
  func.func @transform_3(%arg0: i32) -> (i32, i32, i32) {
    %c0_i32 = arith.constant 0 : i32
    %c0_i32_0 = arith.constant 0 : i32
    %c0_i32_1 = arith.constant 0 : i32
    return %c0_i32, %c0_i32_0, %arg0 : i32, i32, i32
  }
  func.func @transform_4(%arg0: i32) -> (i32, i32) {
    %c0_i32 = arith.constant 0 : i32
    %c0_i32_0 = arith.constant 0 : i32
    return %c0_i32, %arg0 : i32, i32
  }
  func.func @transform_5(%arg0: i32) -> (i32, i32) {
    %c0_i32 = arith.constant 0 : i32
    %c0_i32_0 = arith.constant 0 : i32
    return %c0_i32, %arg0 : i32, i32
  }
  func.func @transform_6(%arg0: i32) -> (i32, i32, i32, i32) {
    %c0_i32 = arith.constant 0 : i32
    %c0_i32_0 = arith.constant 0 : i32
    %c0_i32_1 = arith.constant 0 : i32
    %c0_i32_2 = arith.constant 0 : i32
    return %c0_i32, %c0_i32_0, %c0_i32_1, %arg0 : i32, i32, i32, i32
  }
}

</mosaic_0001>

<bundles_post_ra>
// kernel: tpu_custom_call.1
= control target key start
LH: loop header
LB: loop body
LE: loop exit
PB: predicated region body
PF: predicated region fallthrough
CT: control target
= control target key end

     0   :  { %11 = vsyncpa [#allocation5], 0  ;;  %s3370_s0 = inlined_call_operand.vmem [shape: f32[6,4], index: 0, kind: input, shape index: {}]   ;;  %s3371_s1 = inlined_call_operand.vmem [shape: f32[8,128], index: 1, kind: input, shape index: {}]   ;;  %s3372_s2 = inlined_call_operand.hbm [shape: f32[8,128], index: 2, kind: input, shape index: {}]   ;;  %s3373_s3 = inlined_call_operand.hbm [shape: f32[8,8,128], index: 3, kind: input, shape index: {}]   ;;  %s3374_s4 = inlined_call_operand.hbm [shape: f32[8,128], index: 4, kind: input, shape index: {}]   ;;  %s3375_s5 = inlined_call_operand.vmem [shape: f32[8,128], index: 5, kind: input, shape index: {}]   ;;  %s3376_s6 = inlined_call_operand.hbm [shape: f32[6,6,8,128], index: 6, kind: output, shape index: {}]  }
   0x1   :  { %12 = vsyncpa [#allocation3], 0 }
   0x2   :  { %13 = vsyncpa [#allocation8], 0  ;;  %s41_s23 = sshll.u32 %s3373_s3, 4  ;;  %s42_s23 = int_to_ptr.hbm [resolvable:$true] %s41_s23 }
   0x3   :  { %14 = vsyncpa [#allocation4], 0  ;;  %s2376_s24 = smov [#allocation7]   ;;  %s20_s28 = sshll.u32 %s3370_s0, 4  ;;  %s21_s28 = int_to_ptr.vmem [resolvable:$true] %s20_s28 }
   0x4   :  { %s43_s25 = sshll.u32 %s2376_s24, 4  ;;  %s2377_s29 = smov 128   ;;  %s44_s25 = int_to_ptr.vmem [resolvable:$true] %s43_s25 }
   0x5   :  { %s2378_s30 = smov 8   ;;  %s2379_s7 = smov [#allocation2]  }
   0x6   :  { %49 = dma.hbm_to_vmem [thread:$0]  %s42_s23, 1024, %s44_s25, [#allocation8], %s2377_s29, %s2377_s29, %s2378_s30  }
   0x7   :  { %23 = dma.vmem_to_smem %s21_s28, 128, %s2379_s7, [#allocation5]  }
   0x8   :  { %s31_s9 = sshll.u32 %s3372_s2, 4  ;;  %s2380_s10 = smov [#allocation6]   ;;  %s32_s9 = int_to_ptr.hbm [resolvable:$true] %s31_s9 }
   0x9   :  { %s33_s11 = sshll.u32 %s2380_s10, 4  ;;  %s55_s0 = sshll.u32 %s3374_s4, 4  ;;  %s34_s11 = int_to_ptr.vmem [resolvable:$true] %s33_s11  ;;  %s56_s0 = int_to_ptr.hbm [resolvable:$true] %s55_s0 }
   0xa   :  { %36 = dma.hbm_to_vmem [thread:$0]  %s32_s9, 128, %s34_s11, [#allocation3]  }
   0xb   :  { %s2381_s14 = smov [#allocation9]  }
   0xc   :  { %s57_s15 = sshll.u32 %s2381_s14, 4  ;;  %s58_s15 = int_to_ptr.vmem [resolvable:$true] %s57_s15 }
   0xd   :  { %60 = dma.hbm_to_vmem [thread:$0]  %s56_s0, 128, %s58_s15, [#allocation8]  }
   0xe   :  { %2368 = dma.done.wait [#allocation5], 128  }
   0xf   :  { %2369 = vsyncadd [#allocation5], 4294967168 }
  0x10   :  { %2370 = dma.done.wait [#allocation3], 128  }
  0x11   :  { %2371 = vsyncadd [#allocation3], 4294967168 }
  0x12   :  { %2372 = dma.done.wait [#allocation8], 1152  }
  0x13   :  { %2373 = vsyncadd [#allocation8], 4294966144 }
  0x14   :  { %79 = sfence }
  0x15   :  { %v2437_v0 = vld [vmem:[%s3371_s1] sm:$0xff]  ;;  %v2473_v30 = vld [vmem:[#allocation7] sm:$0xff]  ;;  %v2475_v31 = vld [vmem:[#allocation7 + $0x8] sm:$0xff]  ;;  %vm297_vm8 = vcmask 1041409   ;;  %vm300_vm9 = vcmask 1042434   ;;  %vm303_vm10 = vcmask 1043459  }
  0x16   :  { %v2439_v1 = vld [vmem:[#allocation6] sm:$0xff]  ;;  %v138_v3 = vmul.f32 %v2437_v0, %v2437_v0  ;;  %v2477_v32 = vld [vmem:[#allocation9] sm:$0xff]  ;;  %v2482_v34 = vld [vmem:[#allocation7 + $0x10] sm:$0xff]  ;;  %vm306_vm11 = vcmask 1044484   ;;  %vm309_vm12 = vcmask 1045509   ;;  %vm312_vm13 = vcmask 1046534  }
  0x17   :  { %v2444_v2 = vld [vmem:[%s3375_s5] sm:$0xff]  ;;  %v139_v4 = vmul.f32 %v2439_v1, %v2439_v1  ;;  %v2486_v36 = vld [vmem:[#allocation7 + $0x20] sm:$0xff]  ;;  %v2488_v37 = vld [vmem:[#allocation7 + $0x28] sm:$0xff]  ;;  %v2495_v41 = vrot.slane %v2477_v32, 1  ;;  %v2498_v42 = vrot.slane %v2477_v32, 2  ;;  %v2501_v43 = vrot.slane %v2477_v32, 3 }
  0x18   :  { %2101 = vrsqrt.f32 %v2444_v2  ;;  %vm110_vm0 = vweird.f32 %v2444_v2  ;;  %vm99_vm3 = vcmp.eq.f32.partialorder %v2444_v2, inf  ;;  %v102_v15 = vand.u32 2147483648, %v2444_v2  ;;  %v2484_v35 = vld [vmem:[#allocation7 + $0x18] sm:$0xff]  ;;  %v2490_v38 = vld [vmem:[#allocation7 + $0x30] sm:$0xff]  ;;  %s2565_s18 = sld [smem:[#allocation2]] }
  0x19   :  { %v140_v5 = vadd.f32 %v139_v4, %v138_v3  ;;  %vm101_vm6 = vcmp.eq.f32.partialorder %v2444_v2, 0.0  ;;  %v2492_v39 = vld [vmem:[#allocation7 + $0x38] sm:$0xff]  ;;  %3468 = vst [vmem:[#allocation16_spill] sm:$0xff] %v2498_v42  ;;  %v2504_v44 = vrot.slane %v2477_v32, 4  ;;  %vm315_vm14 = vcmask 1047559   ;;  %s2567_s19 = sld [smem:[#allocation2 + $0x1]] }
  0x1a   :  { %3469 = vst [vmem:[#allocation17_spill] sm:$0xff] %v2501_v43  ;;  %s2570_s20 = sld [smem:[#allocation2 + $0x2]] }
  0x1b   :  { %2103 = vrsqrt.f32 %v140_v5  ;;  %vm147_vm4 = vweird.f32 %v140_v5  ;;  %3470 = vst [vmem:[#allocation18_spill] sm:$0xff] %v2504_v44  ;;  %s2572_s21 = sld [smem:[#allocation2 + $0x3]] }
  0x1c   :  { %s2073_s22 = sld [smem:[#allocation2 + $0x80]] }
  0x1d   :  { %s2574_s23 = sld [smem:[#allocation2 + $0x81]] }
  0x1e   :  { %v2102_v6 = vpop.eup %2101  ;;  %s2577_s24 = sld [smem:[#allocation2 + $0x82]] }
  0x1f   :  { %v93_v7 = vmul.f32 %v2102_v6, %v2444_v2  ;;  %vm111_vm1 = vweird.f32 %v2102_v6  ;;  %s2579_s25 = sld [smem:[#allocation2 + $0x83]] }
  0x20   :  { %vm112_vm2 = vmor %vm110_vm0, %vm111_vm1  ;;  %s2077_s26 = sld [smem:[#allocation2 + $0x100]] }
  0x21   :  { %v94_v8 = vmul.f32 %v2102_v6, %v93_v7  ;;  %v2104_v9 = vpop.eup %2103  ;;  %s2078_s27 = sld [smem:[#allocation2 + $0x101]] }
  0x22   :  { %v142_v11 = vmul.f32 %v2104_v9, %v140_v5  ;;  %vm148_vm5 = vweird.f32 %v2104_v9  ;;  %s2081_s28 = sld [smem:[#allocation2 + $0x180]] }
  0x23   :  { %v95_v10 = vmul.f32 0.5, %v94_v8  ;;  %vm149_vm7 = vmor %vm147_vm4, %vm148_vm5  ;;  %s2082_s7 = sld [smem:[#allocation2 + $0x181]] }
  0x24   :  { %v143_v13 = vmul.f32 %v2104_v9, %v142_v11  ;;  %s2079_s8 = sld [smem:[#allocation2 + $0x102]] }
  0x25   :  { %v96_v12 = vsub.f32 1.5, %v95_v10  ;;  %s2581_s3 = sld [smem:[#allocation2 + $0x103]] }
  0x26   :  { %v144_v16 = vmul.f32 0.5, %v143_v13  ;;  %s2083_s9 = sld [smem:[#allocation2 + $0x182]] }
  0x27   :  { %v97_v14 = vmul.f32 %v2102_v6, %v96_v12  ;;  %s2583_s10 = sld [smem:[#allocation2 + $0x183]] }
  0x28   :  { %v145_v19 = vsub.f32 1.5, %v144_v16  ;;  %s2585_s11 = sld [smem:[#allocation2 + $0x200]] }
  0x29   :  { %v98_v17 = vmul.f32 %v97_v14, %v2444_v2  ;;  %v2457_v18 = vsel %vm112_vm2, %v2102_v6, %v97_v14  ;;  %s2587_s12 = sld [smem:[#allocation2 + $0x201]] }
  0x2a   :  { %3467 = vst [vmem:[#allocation15_spill] sm:$0xff] %v2457_v18  ;;  %v146_v22 = vmul.f32 %v2104_v9, %v145_v19  ;;  %s2589_s13 = sld [smem:[#allocation2 + $0x202]] }
  0x2b   :  { %v100_v20 = vsel %vm99_vm3, %v2444_v2, %v98_v17  ;;  %s2597_s0 = sld [smem:[#allocation2 + $0x280]] }
  0x2c   :  { %v2460_v21 = vsel %vm101_vm6, %v102_v15, %v100_v20  ;;  %v150_v25 = vsel %vm149_vm7, %v2104_v9, %v146_v22  ;;  %s2601_s14 = sld [smem:[#allocation2 + $0x281]] }
  0x2d   :  { %v151_v23 = vmul.f32 %v2460_v21, %v2437_v0  ;;  %v153_v24 = vsub.f32 0.0, %v2460_v21  ;;  %s2611_s15 = sld [smem:[#allocation2 + $0x282]] }
  0x2e   :  { %s2713_s2 = sld [smem:[#allocation2 + $0x203]] }
  0x2f   :  { %v2465_v26 = vmul.f32 %v151_v23, %v150_v25  ;;  %v154_v27 = vmul.f32 %v153_v24, %v2439_v1  ;;  %s2715_s16 = sld [smem:[#allocation2 + $0x283]] }
  0x31   :  { %156 = vst [vmem:[#allocation10] sm:$0xff] %v2465_v26  ;;  %v173_v28 = vmul.f32 %v2465_v26, %v2465_v26  ;;  %v2471_v29 = vmul.f32 %v154_v27, %v150_v25 }
  0x33   :  { %158 = vst [vmem:[#allocation10 + $0x30] sm:$0xff] %v2471_v29  ;;  %v174_v33 = vmul.f32 %v2471_v29, %v2471_v29 }
  0x35   :  { %v175_v40 = vadd.f32 %v174_v33, %v173_v28 }
  0x37   :  { %v176_v45 = vmul.f32 %v175_v40, %v2473_v30  ;;  %v177_v46 = vmul.f32 %v175_v40, %v2475_v31  ;;  %v178_v47 = vmul.f32 %v175_v40, %v2482_v34  ;;  %v179_v48 = vmul.f32 %v175_v40, %v2484_v35 }
  0x38   :  { %v180_v49 = vmul.f32 %v175_v40, %v2486_v36  ;;  %v181_v50 = vmul.f32 %v175_v40, %v2488_v37  ;;  %v182_v51 = vmul.f32 %v175_v40, %v2490_v38  ;;  %v183_v52 = vmul.f32 %v175_v40, %v2492_v39 }
  0x39   :  { %v184_v53 = vrot.slane %v176_v45, 4  ;;  %v190_v54 = vrot.slane %v177_v46, 4  ;;  %v196_v55 = vrot.slane %v178_v47, 4  ;;  %v202_v56 = vrot.slane %v179_v48, 4 }
  0x3a   :  { %v208_v57 = vrot.slane %v180_v49, 4  ;;  %v214_v58 = vrot.slane %v181_v50, 4  ;;  %v220_v59 = vrot.slane %v182_v51, 4  ;;  %v226_v60 = vrot.slane %v183_v52, 4 }
  0x3b   :  { %v185_v61 = vadd.f32 %v184_v53, %v176_v45  ;;  %v191_v62 = vadd.f32 %v190_v54, %v177_v46  ;;  %v197_v63 = vadd.f32 %v196_v55, %v178_v47  ;;  %v203_v3 = vadd.f32 %v202_v56, %v179_v48 }
  0x3c   :  { %v209_v4 = vadd.f32 %v208_v57, %v180_v49  ;;  %v215_v5 = vadd.f32 %v214_v58, %v181_v50  ;;  %v221_v6 = vadd.f32 %v220_v59, %v182_v51  ;;  %v227_v7 = vadd.f32 %v226_v60, %v183_v52 }
  0x3d   :  { %v186_v8 = vrot.slane %v185_v61, 2  ;;  %v192_v9 = vrot.slane %v191_v62, 2  ;;  %v198_v10 = vrot.slane %v197_v63, 2  ;;  %v204_v11 = vrot.slane %v203_v3, 2 }
  0x3e   :  { %v210_v12 = vrot.slane %v209_v4, 2  ;;  %v216_v13 = vrot.slane %v215_v5, 2  ;;  %v222_v14 = vrot.slane %v221_v6, 2  ;;  %v228_v15 = vrot.slane %v227_v7, 2 }
  0x3f   :  { %v187_v16 = vadd.f32 %v186_v8, %v185_v61  ;;  %v193_v17 = vadd.f32 %v192_v9, %v191_v62  ;;  %v199_v19 = vadd.f32 %v198_v10, %v197_v63  ;;  %v205_v20 = vadd.f32 %v204_v11, %v203_v3 }
  0x40   :  { %v211_v22 = vadd.f32 %v210_v12, %v209_v4  ;;  %v217_v23 = vadd.f32 %v216_v13, %v215_v5  ;;  %v223_v24 = vadd.f32 %v222_v14, %v221_v6  ;;  %v229_v25 = vadd.f32 %v228_v15, %v227_v7 }
  0x41   :  { %v188_v27 = vrot.slane %v187_v16, 1  ;;  %v194_v28 = vrot.slane %v193_v17, 1  ;;  %v200_v33 = vrot.slane %v199_v19, 1  ;;  %v206_v40 = vrot.slane %v205_v20, 1 }
  0x42   :  { %v212_v45 = vrot.slane %v211_v22, 1  ;;  %v218_v46 = vrot.slane %v217_v23, 1  ;;  %v224_v47 = vrot.slane %v223_v24, 1  ;;  %v230_v48 = vrot.slane %v229_v25, 1 }
  0x43   :  { %v189_v49 = vadd.f32 %v188_v27, %v187_v16  ;;  %v195_v50 = vadd.f32 %v194_v28, %v193_v17  ;;  %v201_v51 = vadd.f32 %v200_v33, %v199_v19  ;;  %v207_v52 = vadd.f32 %v206_v40, %v205_v20 }
  0x44   :  { %v213_v53 = vadd.f32 %v212_v45, %v211_v22  ;;  %v219_v54 = vadd.f32 %v218_v46, %v217_v23  ;;  %v2515_v55 = vrot.slane %v2477_v32, 5  ;;  %v2518_v56 = vrot.slane %v2477_v32, 6 }
  0x45   :  { %v225_v57 = vadd.f32 %v224_v47, %v223_v24  ;;  %v248_v58 = vadd.f32 %v189_v49, %v2477_v32  ;;  %v249_v59 = vadd.f32 %v2495_v41, %v195_v50  ;;  %v250_v60 = vadd.f32 %v2498_v42, %v201_v51 }
  0x46   :  { %3471 = vst [vmem:[#allocation19_spill] sm:$0xff] %v2515_v55  ;;  %v231_v61 = vadd.f32 %v230_v48, %v229_v25  ;;  %v2524_v62 = vrot.slane %v2477_v32, 7  ;;  %v251_v63 = vadd.f32 %v2501_v43, %v207_v52  ;;  %v252_v3 = vadd.f32 %v2504_v44, %v213_v53 }
  0x47   :  { %3472 = vst [vmem:[#allocation20_spill] sm:$0xff] %v2518_v56  ;;  %2105 = vrcp.f32 %v248_v58  ;;  %v253_v4 = vadd.f32 %v2515_v55, %v219_v54  ;;  %v254_v5 = vadd.f32 %v2518_v56, %v225_v57  ;;  %v167_v8 = vmul.f32 %v2465_v26, %v2437_v0 }
  0x48   :  { %3473 = vst [vmem:[#allocation21_spill] sm:$0xff] %v2524_v62  ;;  %2107 = vrcp.f32 %v249_v59  ;;  %v255_v6 = vadd.f32 %v2524_v62, %v231_v61  ;;  %v168_v9 = vmul.f32 %v2471_v29, %v2439_v1  ;;  %v171_v15 = vmul.f32 %v2465_v26, %v2439_v1 }
  0x49   :  { %2109 = vrcp.f32 %v250_v60  ;;  %v170_v22 = vmul.f32 %v2471_v29, %v2437_v0 }
  0x4a   :  { %2111 = vrcp.f32 %v251_v63  ;;  %v169_v20 = vsub.f32 %v167_v8, %v168_v9 }
  0x4b   :  { %2113 = vrcp.f32 %v252_v3  ;;  %v172_v9 = vadd.f32 %v171_v15, %v170_v22 }
  0x4c   :  { %2115 = vrcp.f32 %v253_v4 }
  0x4d   :  { %v2106_v7 = vpop.eup %2105  ;;  %2117 = vrcp.f32 %v254_v5 }
  0x4e   :  { %v2108_v10 = vpop.eup %2107  ;;  %2119 = vrcp.f32 %v255_v6  ;;  %v264_v11 = vmul.f32 %v2106_v7, %v248_v58 }
  0x4f   :  { %v2110_v12 = vpop.eup %2109  ;;  %v265_v13 = vmul.f32 %v2108_v10, %v249_v59 }
  0x50   :  { %v2112_v14 = vpop.eup %2111  ;;  %v266_v16 = vmul.f32 %v2110_v12, %v250_v60  ;;  %v272_v17 = vsub.f32 2.0, %v264_v11 }
  0x51   :  { %v2114_v19 = vpop.eup %2113  ;;  %v267_v23 = vmul.f32 %v2112_v14, %v251_v63  ;;  %v273_v24 = vsub.f32 2.0, %v265_v13 }
  0x52   :  { %v2116_v25 = vpop.eup %2115  ;;  %v268_v27 = vmul.f32 %v2114_v19, %v252_v3  ;;  %v274_v28 = vsub.f32 2.0, %v266_v16  ;;  %v280_v46 = vmul.f32 %v2106_v7, %v272_v17 }
  0x53   :  { %v2118_v33 = vpop.eup %2117  ;;  %v269_v40 = vmul.f32 %v2116_v25, %v253_v4  ;;  %v275_v45 = vsub.f32 2.0, %v267_v23  ;;  %v281_v47 = vmul.f32 %v2108_v10, %v273_v24 }
  0x54   :  { %v2120_v26 = vpop.eup %2119  ;;  %v270_v48 = vmul.f32 %v2118_v33, %v254_v5  ;;  %v276_v49 = vsub.f32 2.0, %v268_v27  ;;  %v282_v50 = vmul.f32 %v2110_v12, %v274_v28 }
  0x55   :  { %v271_v51 = vmul.f32 %v2120_v26, %v255_v6  ;;  %v277_v52 = vsub.f32 2.0, %v269_v40  ;;  %v283_v29 = vmul.f32 %v2112_v14, %v275_v45  ;;  %v296_v53 = vrot.slane %v281_v47, 7 }
  0x56   :  { %v278_v54 = vsub.f32 2.0, %v270_v48  ;;  %v284_v57 = vmul.f32 %v2114_v19, %v276_v49  ;;  %v299_v58 = vrot.slane %v282_v50, 6 }
  0x57   :  { %v279_v59 = vsub.f32 2.0, %v271_v51  ;;  %v285_v60 = vmul.f32 %v2116_v25, %v277_v52  ;;  %v298_v61 = vsel %vm297_vm8, %v296_v53, %v280_v46  ;;  %v302_v63 = vrot.slane %v283_v29, 5 }
  0x58   :  { %v286_v3 = vmul.f32 %v2118_v33, %v278_v54  ;;  %v301_v4 = vsel %vm300_vm9, %v299_v58, %v298_v61  ;;  %v305_v5 = vrot.slane %v284_v57, 4  ;;  %v2382_v51 = vmov 0.0  }
  0x59   :  { %v287_v7 = vmul.f32 %v2120_v26, %v279_v59  ;;  %v304_v6 = vsel %vm303_vm10, %v302_v63, %v301_v4  ;;  %v308_v8 = vrot.slane %v285_v60, 3  ;;  %160 = vst [vmem:[#allocation10 + $0x60] sm:$0xff] %v2382_v51 }
  0x5a   :  { %v307_v10 = vsel %vm306_vm11, %v305_v5, %v304_v6  ;;  %v311_v11 = vrot.slane %v286_v3, 2  ;;  %162 = vst [vmem:[#allocation10 + $0x90] sm:$0xff] %v2382_v51 }
  0x5b   :  { %v310_v12 = vsel %vm309_vm12, %v308_v8, %v307_v10  ;;  %v314_v13 = vrot.slane %v287_v7, 1  ;;  %164 = vst [vmem:[#allocation10 + $0xc0] sm:$0xff] %v2382_v51 }
  0x5c   :  { %v313_v14 = vsel %vm312_vm13, %v311_v11, %v310_v12  ;;  %166 = vst [vmem:[#allocation10 + $0xf0] sm:$0xff] %v2382_v51 }
  0x5d   :  { %v316_v16 = vsel %vm315_vm14, %v314_v13, %v313_v14 }
  0x5e   :  { %v318_v17 = vmul.f32 %v316_v16, %v169_v20  ;;  %v319_v19 = vmul.f32 %v316_v16, %v172_v9 }
  0x60   :  { %v320_v23 = vmul.f32 %v318_v17, %v169_v20  ;;  %v321_v24 = vmul.f32 %v319_v19, %v172_v9  ;;  %v324_v25 = vmul.f32 %v318_v17, %v172_v9  ;;  %v325_v27 = vmul.f32 %v319_v19, %v169_v20  ;;  %574 = vst [vmem:[#allocation10 + $0x68] sm:$0xff] %v318_v17 }
  0x61   :  { %576 = vst [vmem:[#allocation10 + $0x98] sm:$0xff] %v319_v19  ;;  %v338_v26 = vmul.f32 %v318_v17, %v2437_v0  ;;  %v339_v49 = vmul.f32 %v319_v19, %v2439_v1  ;;  %v341_v50 = vmul.f32 %v319_v19, %v2437_v0  ;;  %v342_v20 = vmul.f32 %v318_v17, %v2439_v1 }
  0x62   :  { %v322_v15 = vadd.f32 %v321_v24, %v320_v23  ;;  %v326_v22 = vsub.f32 %v324_v25, %v325_v27  ;;  %v350_v11 = vmul.f32 %v318_v17, %v318_v17  ;;  %v351_v12 = vmul.f32 %v319_v19, %v319_v19 }
  0x63   :  { %v340_v54 = vadd.f32 %v339_v49, %v338_v26  ;;  %v343_v57 = vsub.f32 %v341_v50, %v342_v20 }
  0x64   :  { %v323_v28 = vsub.f32 1.0, %v322_v15  ;;  %v327_v33 = vsub.f32 0.0, %v326_v22  ;;  %v352_v24 = vadd.f32 %v351_v12, %v350_v11 }
  0x66   :  { %v328_v40 = vmul.f32 %v323_v28, %v323_v28  ;;  %v329_v45 = vmul.f32 %v327_v33, %v327_v33  ;;  %v336_v29 = vsub.f32 0.0, %v327_v33 }
  0x68   :  { %v330_v46 = vadd.f32 %v329_v45, %v328_v40 }
  0x6a   :  { %2121 = vrcp.f32 %v330_v46 }
  0x70   :  { %v2122_v47 = vpop.eup %2121 }
  0x71   :  { %v332_v48 = vmul.f32 %v2122_v47, %v330_v46 }
  0x73   :  { %v333_v52 = vsub.f32 2.0, %v332_v48 }
  0x75   :  { %v334_v53 = vmul.f32 %v2122_v47, %v333_v52 }
  0x77   :  { %v335_v58 = vmul.f32 %v334_v53, %v323_v28  ;;  %v337_v59 = vmul.f32 %v336_v29, %v334_v53  ;;  %2123 = vrsqrt.f32 %v334_v53  ;;  %vm360_vm15 = vcmp.eq.f32.partialorder %v334_v53, inf }
  0x78   :  { %v363_v23 = vand.u32 2147483648, %v334_v53  ;;  %vm362_vm0 = vcmp.eq.f32.partialorder %v334_v53, 0.0 }
  0x79   :  { %v344_v60 = vmul.f32 %v340_v54, %v335_v58  ;;  %v345_v61 = vmul.f32 %v343_v57, %v337_v59  ;;  %v347_v63 = vmul.f32 %v340_v54, %v337_v59  ;;  %v348_v3 = vmul.f32 %v343_v57, %v335_v58  ;;  %578 = vst [vmem:[#allocation10 + $0xc8] sm:$0xff] %v335_v58 }
  0x7a   :  { %580 = vst [vmem:[#allocation10 + $0xf8] sm:$0xff] %v337_v59 }
  0x7b   :  { %v2550_v0 = vsub.f32 %v344_v60, %v345_v61  ;;  %v2552_v1 = vadd.f32 %v348_v3, %v347_v63 }
  0x7d   :  { %v2124_v4 = vpop.eup %2123  ;;  %v406_v5 = vmul.f32 %v2550_v0, %v2550_v0  ;;  %v407_v7 = vmul.f32 %v2552_v1, %v2552_v1 }
  0x7e   :  { %v354_v6 = vmul.f32 %v2124_v4, %v334_v53 }
  0x7f   :  { %v408_v8 = vadd.f32 %v407_v7, %v406_v5 }
  0x80   :  { %v355_v9 = vmul.f32 %v2124_v4, %v354_v6 }
  0x81   :  { %2125 = vrsqrt.f32 %v408_v8  ;;  %vm416_vm1 = vcmp.eq.f32.partialorder %v408_v8, inf  ;;  %vm418_vm2 = vcmp.eq.f32.partialorder %v408_v8, 0.0 }
  0x82   :  { %v356_v10 = vmul.f32 0.5, %v355_v9 }
  0x84   :  { %v357_v13 = vsub.f32 1.5, %v356_v10  ;;  %v419_v10 = vand.u32 2147483648, %v408_v8 }
  0x86   :  { %v358_v14 = vmul.f32 %v2124_v4, %v357_v13 }
  0x87   :  { %v2126_v16 = vpop.eup %2125 }
  0x88   :  { %v359_v25 = vmul.f32 %v358_v14, %v334_v53  ;;  %v410_v27 = vmul.f32 %v2126_v16, %v408_v8 }
  0x8a   :  { %v361_v15 = vsel %vm360_vm15, %v334_v53, %v359_v25  ;;  %v411_v22 = vmul.f32 %v2126_v16, %v410_v27 }
  0x8b   :  { %v364_v28 = vsel %vm362_vm0, %v363_v23, %v361_v15 }
  0x8c   :  { %v365_v33 = vmul.f32 %v364_v28, %v352_v24  ;;  %v412_v40 = vmul.f32 0.5, %v411_v22 }
  0x8e   :  { %v367_v45 = vrot.slane %v365_v33, 1  ;;  %v368_v46 = vrot.slane %v365_v33, 2  ;;  %v374_v47 = vperm.slane %v365_v33, 0  ;;  %v369_v26 = vrot.slane %v365_v33, 3 }
  0x8f   :  { %v370_v17 = vrot.slane %v365_v33, 4  ;;  %v371_v19 = vrot.slane %v365_v33, 5  ;;  %v372_v51 = vrot.slane %v365_v33, 6  ;;  %v413_v54 = vsub.f32 1.5, %v412_v40 }
  0x90   :  { %v375_v48 = vperm.slane %v367_v45, 0  ;;  %v376_v49 = vperm.slane %v368_v46, 0  ;;  %v377_v50 = vperm.slane %v369_v26, 0  ;;  %v390_v20 = vmul.f32 %v374_v47, %v2473_v30 }
  0x91   :  { %v378_v52 = vperm.slane %v370_v17, 0  ;;  %v373_v57 = vrot.slane %v365_v33, 7  ;;  %v379_v58 = vperm.slane %v371_v19, 0  ;;  %v414_v61 = vmul.f32 %v2126_v16, %v413_v54 }
  0x92   :  { %v391_v29 = vmul.f32 %v375_v48, %v2475_v31  ;;  %v392_v53 = vmul.f32 %v376_v49, %v2482_v34  ;;  %v393_v59 = vmul.f32 %v377_v50, %v2484_v35  ;;  %v380_v63 = vperm.slane %v372_v51, 0 }
  0x93   :  { %v394_v3 = vmul.f32 %v378_v52, %v2486_v36  ;;  %v415_v5 = vmul.f32 %v414_v61, %v408_v8  ;;  %v381_v7 = vperm.slane %v373_v57, 0  ;;  %v395_v6 = vmul.f32 %v379_v58, %v2488_v37 }
  0x94   :  { %v398_v60 = vadd.f32 %v391_v29, %v390_v20  ;;  %v396_v11 = vmul.f32 %v380_v63, %v2490_v38  ;;  %v2591_v33 = vstv %s2077_s26  ;;  %v2593_v40 = vstv %s2081_s28  ;;  %s2055_s26 = sshll.u32 %s3376_s6, 4  ;;  %s2056_s26 = int_to_ptr.hbm [resolvable:$true] %s2055_s26 }
  0x95   :  { %v417_v13 = vsel %vm416_vm1, %v408_v8, %v415_v5  ;;  %v397_v14 = vmul.f32 %v381_v7, %v2492_v39  ;;  %3474 = vst [vmem:[#allocation22_spill] sm:$0xff] %v2591_v33  ;;  %v2595_v45 = vstv %s2078_s27  ;;  %v2599_v46 = vstv %s2082_s7 }
  0x96   :  { %v399_v4 = vadd.f32 %v398_v60, %v392_v53  ;;  %v420_v23 = vsel %vm418_vm2, %v419_v10, %v417_v13  ;;  %3475 = vst [vmem:[#allocation23_spill] sm:$0xff] %v2593_v40  ;;  %v2604_v47 = vstv %s2565_s18  ;;  %v2606_v26 = vstv %s2073_s22 }
  0x97   :  { %v421_v27 = vmul.f32 %v420_v23, %v2457_v18  ;;  %3476 = vst [vmem:[#allocation24_spill] sm:$0xff] %v2595_v45  ;;  %v2609_v17 = vstv %s2567_s19  ;;  %v437_v48 = vmul.f32 %v2591_v33, %v2550_v0  ;;  %v445_v49 = vmul.f32 %v2593_v40, %v2550_v0 }
  0x98   :  { %v400_v9 = vadd.f32 %v399_v4, %v393_v59  ;;  %3477 = vst [vmem:[#allocation25_spill] sm:$0xff] %v2599_v46  ;;  %v2618_v50 = vstv %s2574_s23  ;;  %v467_v20 = vmul.f32 %v2595_v45, %v2550_v0  ;;  %v475_v52 = vmul.f32 %v2599_v46, %v2550_v0 }
  0x99   :  { %3478 = vst [vmem:[#allocation26_spill] sm:$0xff] %v2604_v47  ;;  %v2625_v29 = vstv %s2570_s20  ;;  %v2627_v53 = vstv %s2079_s8  ;;  %v440_v54 = vmul.f32 %v2593_v40, %v2552_v1  ;;  %v447_v57 = vmul.f32 %v2591_v33, %v2552_v1 }
  0x9a   :  { %v401_v12 = vadd.f32 %v400_v9, %v394_v3  ;;  %3479 = vst [vmem:[#allocation27_spill] sm:$0xff] %v2606_v26  ;;  %v2634_v58 = vstv %s2577_s24  ;;  %v2636_v59 = vstv %s2083_s9  ;;  %v470_v61 = vmul.f32 %v2599_v46, %v2552_v1 }
  0x9b   :  { %3480 = vst [vmem:[#allocation28_spill] sm:$0xff] %v2609_v17  ;;  %v477_v63 = vmul.f32 %v2595_v45, %v2552_v1  ;;  %v2643_v3 = vstv %s2581_s3  ;;  %v497_v4 = vmul.f32 %v2627_v53, %v2550_v0  ;;  %v2649_v5 = vmul.f32 %v2636_v59, %v2552_v1 }
  0x9c   :  { %v402_v16 = vadd.f32 %v401_v12, %v395_v6  ;;  %3481 = vst [vmem:[#allocation29_spill] sm:$0xff] %v2618_v50  ;;  %v2652_v7 = vstv %s2572_s21  ;;  %v2655_v6 = vstv %s2579_s25  ;;  %v505_v10 = vmul.f32 %v2636_v59, %v2550_v0 }
  0x9d   :  { %3482 = vst [vmem:[#allocation30_spill] sm:$0xff] %v2625_v29  ;;  %v2662_v12 = vstv %s2583_s10  ;;  %v2665_v13 = vstv %s2585_s11  ;;  %v527_v23 = vmul.f32 %v2643_v3, %v2550_v0 }
  0x9e   :  { %v403_v24 = vadd.f32 %v402_v16, %v396_v11  ;;  %3483 = vst [vmem:[#allocation31_spill] sm:$0xff] %v2627_v53  ;;  %v507_v11 = vmul.f32 %v2627_v53, %v2552_v1  ;;  %v2671_v16 = vstv %s2587_s12 }
  0x9f   :  { %3484 = vst [vmem:[#allocation32_spill] sm:$0xff] %v2634_v58 }
  0xa0   :  { %v404_v25 = vadd.f32 %v403_v24, %v397_v14  ;;  %3485 = vst [vmem:[#allocation33_spill] sm:$0xff] %v2636_v59  ;;  %v2668_v14 = vstv %s2597_s0 }
  0xa1   :  { %3486 = vst [vmem:[#allocation34_spill] sm:$0xff] %v2643_v3 }
  0xa2   :  { %v405_v8 = vand.u32 2147483647, %v404_v25  ;;  %3487 = vst [vmem:[#allocation35_spill] sm:$0xff] %v2662_v12 }
  0xa4   :  { %v422_v15 = vsub.f32 %v421_v27, %v405_v8  ;;  %v2678_v27 = vstv %s2601_s14 }
  0xa6   :  { %v423_v22 = vmax.f32 %v422_v15, 0.0  ;;  %v2685_v15 = vstv %s2589_s13 }
  0xa8   :  { %v424_v28 = vadd.f32 %v423_v22, %v405_v8  ;;  %v2682_v8 = vmul.f32 %v2662_v12, %v2552_v1  ;;  %v2688_v22 = vstv %s2611_s15 }
  0xaa   :  { %2127 = vrcp.f32 %v424_v28 }
  0xb0   :  { %v2128_v19 = vpop.eup %2127 }
  0xb1   :  { %v426_v51 = vmul.f32 %v2128_v19, %v424_v28  ;;  %v2692_v28 = vmul.f32 %v2662_v12, %v2550_v0 }
  0xb3   :  { %v427_v60 = vsub.f32 2.0, %v426_v51 }
  0xb5   :  { %v428_v9 = vmul.f32 %v2128_v19, %v427_v60  ;;  %v2696_v19 = vmul.f32 %v2643_v3, %v2552_v1 }
  0xb7   :  { %v429_v24 = vmul.f32 %v428_v9, %v2550_v0  ;;  %v430_v25 = vmul.f32 %v428_v9, %v2552_v1 }
  0xb9   :  { %v432_v51 = vmul.f32 %v2604_v47, %v429_v24  ;;  %v434_v60 = vmul.f32 %v2606_v26, %v430_v25  ;;  %v442_v9 = vmul.f32 %v2606_v26, %v429_v24  ;;  %v443_v59 = vmul.f32 %v2604_v47, %v430_v25 }
  0xba   :  { %v462_v53 = vmul.f32 %v2609_v17, %v429_v24  ;;  %v464_v46 = vmul.f32 %v2618_v50, %v430_v25  ;;  %v472_v45 = vmul.f32 %v2618_v50, %v429_v24  ;;  %v473_v0 = vmul.f32 %v2609_v17, %v430_v25 }
  0xbb   :  { %v435_v12 = vsub.f32 %v432_v51, %v434_v60  ;;  %v444_v40 = vadd.f32 %v443_v59, %v442_v9  ;;  %v492_v1 = vmul.f32 %v2625_v29, %v429_v24  ;;  %v494_v3 = vmul.f32 %v2634_v58, %v430_v25 }
  0xbc   :  { %v465_v33 = vsub.f32 %v462_v53, %v464_v46  ;;  %v474_v18 = vadd.f32 %v473_v0, %v472_v45  ;;  %v502_v26 = vmul.f32 %v2634_v58, %v429_v24  ;;  %v503_v47 = vmul.f32 %v2625_v29, %v430_v25 }
  0xbd   :  { %v438_v62 = vadd.f32 %v437_v48, %v435_v12  ;;  %v446_v56 = vadd.f32 %v445_v49, %v444_v40  ;;  %v495_v55 = vsub.f32 %v492_v1, %v494_v3  ;;  %v522_v44 = vmul.f32 %v2652_v7, %v429_v24 }
  0xbe   :  { %v468_v50 = vadd.f32 %v467_v20, %v465_v33  ;;  %v476_v43 = vadd.f32 %v475_v52, %v474_v18  ;;  %v504_v17 = vadd.f32 %v503_v47, %v502_v26  ;;  %v524_v59 = vmul.f32 %v2655_v6, %v430_v25 }
  0xbf   :  { %v441_v51 = vsub.f32 %v438_v62, %v440_v54  ;;  %v448_v60 = vadd.f32 %v447_v57, %v446_v56  ;;  %v498_v9 = vadd.f32 %v497_v4, %v495_v55  ;;  %v532_v46 = vmul.f32 %v2655_v6, %v429_v24 }
  0xc0   :  { %v471_v45 = vsub.f32 %v468_v50, %v470_v61  ;;  %v478_v53 = vadd.f32 %v477_v63, %v476_v43  ;;  %v506_v0 = vadd.f32 %v505_v10, %v504_v17  ;;  %v525_v48 = vsub.f32 %v522_v44, %v524_v59 }
  0xc1   :  { %v449_v40 = vmax.f32 %v441_v51, 0.0  ;;  %v450_v49 = vmax.f32 %v448_v60, 0.0  ;;  %v501_v18 = vsub.f32 %v498_v9, %v2649_v5  ;;  %v533_v33 = vmul.f32 %v2652_v7, %v430_v25 }
  0xc2   :  { %v479_v47 = vmax.f32 %v471_v45, 0.0  ;;  %v480_v62 = vmax.f32 %v478_v53, 0.0  ;;  %v508_v56 = vadd.f32 %v507_v11, %v506_v0  ;;  %v528_v55 = vadd.f32 %v527_v23, %v525_v48 }
  0xc3   :  { %v452_v26 = vmul.f32 %v2665_v13, %v449_v40  ;;  %v454_v20 = vmul.f32 %v2668_v14, %v450_v49  ;;  %v457_v43 = vmul.f32 %v2668_v14, %v449_v40  ;;  %v458_v44 = vmul.f32 %v2665_v13, %v450_v49 }
  0xc4   :  { %v482_v17 = vmul.f32 %v2671_v16, %v479_v47  ;;  %v484_v50 = vmul.f32 %v2678_v27, %v480_v62  ;;  %v487_v52 = vmul.f32 %v2678_v27, %v479_v47  ;;  %v488_v54 = vmul.f32 %v2671_v16, %v480_v62 }
  0xc5   :  { %v455_v57 = vsub.f32 %v452_v26, %v454_v20  ;;  %v459_v61 = vadd.f32 %v458_v44, %v457_v43  ;;  %v509_v63 = vmax.f32 %v501_v18, 0.0  ;;  %v510_v3 = vmax.f32 %v508_v56, 0.0 }
  0xc6   :  { %v485_v4 = vsub.f32 %v482_v17, %v484_v50  ;;  %v489_v5 = vadd.f32 %v488_v54, %v487_v52  ;;  %v531_v10 = vsub.f32 %v528_v55, %v2682_v8  ;;  %v534_v11 = vadd.f32 %v533_v33, %v532_v46 }
  0xc7   :  { %v512_v12 = vmul.f32 %v2685_v15, %v509_v63  ;;  %v514_v23 = vmul.f32 %v2688_v22, %v510_v3  ;;  %v517_v24 = vmul.f32 %v2688_v22, %v509_v63  ;;  %v518_v25 = vmul.f32 %v2685_v15, %v510_v3 }
  0xc8   :  { %v536_v1 = vadd.f32 %v2692_v28, %v534_v11  ;;  %v539_v59 = vmax.f32 %v531_v10, 0.0  ;;  %v486_v51 = vadd.f32 %v485_v4, %v455_v57  ;;  %v2734_v60 = vstv %s2713_s2 }
  0xc9   :  { %v2737_v9 = vstv %s2715_s16  ;;  %v490_v45 = vadd.f32 %v489_v5, %v459_v61  ;;  %v515_v53 = vsub.f32 %v512_v12, %v514_v23  ;;  %v519_v8 = vadd.f32 %v518_v25, %v517_v24 }
  0xca   :  { %v538_v46 = vadd.f32 %v2696_v19, %v536_v1  ;;  %v542_v48 = vmul.f32 %v2734_v60, %v539_v59  ;;  %v547_v40 = vmul.f32 %v2737_v9, %v539_v59 }
  0xcb   :  { %v516_v49 = vadd.f32 %v515_v53, %v486_v51  ;;  %v520_v18 = vadd.f32 %v519_v8, %v490_v45 }
  0xcc   :  { %v540_v0 = vmax.f32 %v538_v46, 0.0 }
  0xce   :  { %v544_v28 = vmul.f32 %v2737_v9, %v540_v0  ;;  %v548_v33 = vmul.f32 %v2734_v60, %v540_v0 }
  0xd0   :  { %v545_v47 = vsub.f32 %v542_v48, %v544_v28  ;;  %v549_v62 = vadd.f32 %v548_v33, %v547_v40 }
  0xd2   :  { %v546_v56 = vadd.f32 %v545_v47, %v516_v49  ;;  %v550_v55 = vadd.f32 %v549_v62, %v520_v18 }
  0xd4   :  { %v551_v26 = vmul.f32 %v546_v56, %v546_v56  ;;  %v552_v20 = vmul.f32 %v550_v55, %v550_v55 }
  0xd6   :  { %v553_v43 = vadd.f32 %v552_v20, %v551_v26 }
  0xd8   :  { %v554_v19 = vmax.f32 %v2444_v2, %v553_v43 }
  0xda   :  { %2129 = vrsqrt.f32 %v554_v19  ;;  %vm561_vm3 = vweird.f32 %v554_v19 }
  0xe0   :  { %v2130_v44 = vpop.eup %2129 }
  0xe1   :  { %v556_v17 = vmul.f32 %v2130_v44, %v554_v19  ;;  %vm562_vm4 = vweird.f32 %v2130_v44 }
  0xe2   :  { %vm563_vm5 = vmor %vm561_vm3, %vm562_vm4 }
  0xe3   :  { %v557_v50 = vmul.f32 %v2130_v44, %v556_v17 }
  0xe5   :  { %v558_v52 = vmul.f32 0.5, %v557_v50 }
  0xe7   :  { %v559_v54 = vsub.f32 1.5, %v558_v52 }
  0xe9   :  { %v560_v57 = vmul.f32 %v2130_v44, %v559_v54 }
  0xeb   :  { %v564_v61 = vsel %vm563_vm5, %v2130_v44, %v560_v57 }
  0xec   :  { %v565_v63 = vmul.f32 %v564_v61, %v2460_v21 }
  0xee   :  { %v566_v3 = vmin.f32 %v565_v63, 1.0 }
  0xf0   :  { %v2746_v4 = vmul.f32 %v566_v3, %v546_v56  ;;  %v2748_v5 = vmul.f32 %v566_v3, %v550_v55 }
  0xf2   :  { %570 = vst [vmem:[#allocation10 + $0x8] sm:$0xff] %v2746_v4  ;;  %v587_v2 = vmul.f32 %v2746_v4, %v2746_v4  ;;  %v588_v10 = vmul.f32 %v2748_v5, %v2748_v5 }
  0xf3   :  { %572 = vst [vmem:[#allocation10 + $0x38] sm:$0xff] %v2748_v5 }
  0xf4   :  { %v589_v11 = vadd.f32 %v588_v10, %v587_v2 }
  0xf6   :  { %v590_v12 = vmul.f32 %v589_v11, %v2473_v30  ;;  %v591_v23 = vmul.f32 %v589_v11, %v2475_v31  ;;  %v592_v24 = vmul.f32 %v589_v11, %v2482_v34  ;;  %v593_v25 = vmul.f32 %v589_v11, %v2484_v35 }
  0xf7   :  { %v594_v1 = vmul.f32 %v589_v11, %v2486_v36  ;;  %v595_v59 = vmul.f32 %v589_v11, %v2488_v37  ;;  %v596_v51 = vmul.f32 %v589_v11, %v2490_v38  ;;  %v597_v45 = vmul.f32 %v589_v11, %v2492_v39 }
  0xf8   :  { %v598_v53 = vrot.slane %v590_v12, 4  ;;  %v604_v8 = vrot.slane %v591_v23, 4  ;;  %v610_v46 = vrot.slane %v592_v24, 4  ;;  %v616_v0 = vrot.slane %v593_v25, 4 }
  0xf9   :  { %v622_v48 = vrot.slane %v594_v1, 4  ;;  %v628_v30 = vrot.slane %v595_v59, 4  ;;  %v634_v40 = vrot.slane %v596_v51, 4  ;;  %v640_v31 = vrot.slane %v597_v45, 4 }
  0xfa   :  { %v599_v49 = vadd.f32 %v598_v53, %v590_v12  ;;  %v605_v34 = vadd.f32 %v604_v8, %v591_v23  ;;  %v611_v18 = vadd.f32 %v610_v46, %v592_v24  ;;  %v617_v35 = vadd.f32 %v616_v0, %v593_v25 }
  0xfb   :  { %v623_v28 = vadd.f32 %v622_v48, %v594_v1  ;;  %v629_v36 = vadd.f32 %v628_v30, %v595_v59  ;;  %v635_v33 = vadd.f32 %v634_v40, %v596_v51  ;;  %v641_v37 = vadd.f32 %v640_v31, %v597_v45  ;;  %v3488_v30 = vld [vmem:[#allocation17_spill] sm:$0xff]  ;;  %v3489_v31 = vld [vmem:[#allocation18_spill] sm:$0xff] }
  0xfc   :  { %v600_v47 = vrot.slane %v599_v49, 2  ;;  %v606_v38 = vrot.slane %v605_v34, 2  ;;  %v612_v62 = vrot.slane %v611_v18, 2  ;;  %v618_v39 = vrot.slane %v617_v35, 2 }
  0xfd   :  { %v624_v56 = vrot.slane %v623_v28, 2  ;;  %v630_v55 = vrot.slane %v629_v36, 2  ;;  %v636_v26 = vrot.slane %v635_v33, 2  ;;  %v642_v20 = vrot.slane %v641_v37, 2 }
  0xfe   :  { %v601_v43 = vadd.f32 %v600_v47, %v599_v49  ;;  %v607_v19 = vadd.f32 %v606_v38, %v605_v34  ;;  %v613_v44 = vadd.f32 %v612_v62, %v611_v18  ;;  %v619_v17 = vadd.f32 %v618_v39, %v617_v35  ;;  %v3490_v34 = vld [vmem:[#allocation19_spill] sm:$0xff]  ;;  %v3491_v35 = vld [vmem:[#allocation20_spill] sm:$0xff] }
  0xff   :  { %v625_v50 = vadd.f32 %v624_v56, %v623_v28  ;;  %v631_v52 = vadd.f32 %v630_v55, %v629_v36  ;;  %v637_v54 = vadd.f32 %v636_v26, %v635_v33  ;;  %v643_v57 = vadd.f32 %v642_v20, %v641_v37  ;;  %v3492_v36 = vld [vmem:[#allocation21_spill] sm:$0xff] }
 0x100   :  { %v602_v61 = vrot.slane %v601_v43, 1  ;;  %v608_v63 = vrot.slane %v607_v19, 1  ;;  %v614_v3 = vrot.slane %v613_v44, 1  ;;  %v620_v2 = vrot.slane %v619_v17, 1 }
 0x101   :  { %v626_v10 = vrot.slane %v625_v50, 1  ;;  %v632_v11 = vrot.slane %v631_v52, 1  ;;  %v638_v12 = vrot.slane %v637_v54, 1  ;;  %v644_v23 = vrot.slane %v643_v57, 1 }
 0x102   :  { %v603_v24 = vadd.f32 %v602_v61, %v601_v43  ;;  %v609_v25 = vadd.f32 %v608_v63, %v607_v19  ;;  %v615_v1 = vadd.f32 %v614_v3, %v613_v44  ;;  %v621_v59 = vadd.f32 %v620_v2, %v619_v17  ;;  %v2775_v44 = vld [vmem:[%s3371_s1] sm:$0xff] }
 0x103   :  { %v627_v51 = vadd.f32 %v626_v10, %v625_v50  ;;  %v633_v45 = vadd.f32 %v632_v11, %v631_v52  ;;  %v639_v53 = vadd.f32 %v638_v12, %v637_v54  ;;  %v645_v48 = vadd.f32 %v644_v23, %v643_v57  ;;  %3493 = vst [vmem:[#allocation36_spill] sm:$0xff] %v2775_v44  ;;  %v2779_v50 = vld [vmem:[#allocation6] sm:$0xff] }
 0x104   :  { %v646_v8 = vadd.f32 %v603_v24, %v2477_v32  ;;  %v647_v46 = vadd.f32 %v609_v25, %v2495_v41  ;;  %v648_v0 = vadd.f32 %v615_v1, %v2498_v42  ;;  %v649_v40 = vadd.f32 %v621_v59, %v3488_v30  ;;  %3494 = vst [vmem:[#allocation37_spill] sm:$0xff] %v2779_v50 }
 0x105   :  { %v650_v49 = vadd.f32 %v627_v51, %v3489_v31  ;;  %v651_v18 = vadd.f32 %v633_v45, %v3490_v34  ;;  %v652_v28 = vadd.f32 %v639_v53, %v3491_v35  ;;  %v653_v33 = vadd.f32 %v645_v48, %v3492_v36 }
 0x106   :  { %2131 = vrcp.f32 %v646_v8  ;;  %v581_v17 = vmul.f32 %v2775_v44, %v2746_v4  ;;  %v585_v52 = vmul.f32 %v2779_v50, %v2746_v4  ;;  %v582_v12 = vmul.f32 %v2779_v50, %v2748_v5 }
 0x107   :  { %2133 = vrcp.f32 %v647_v46  ;;  %v584_v4 = vmul.f32 %v2775_v44, %v2748_v5 }
 0x108   :  { %2135 = vrcp.f32 %v648_v0 }
 0x109   :  { %2137 = vrcp.f32 %v649_v40 }
 0x10a   :  { %2139 = vrcp.f32 %v650_v49 }
 0x10b   :  { %2141 = vrcp.f32 %v651_v18 }
 0x10c   :  { %v2132_v32 = vpop.eup %2131  ;;  %2143 = vrcp.f32 %v652_v28 }
 0x10d   :  { %v2134_v37 = vpop.eup %2133  ;;  %2145 = vrcp.f32 %v653_v33  ;;  %v662_v47 = vmul.f32 %v2132_v32, %v646_v8 }
 0x10e   :  { %v2136_v38 = vpop.eup %2135  ;;  %v663_v62 = vmul.f32 %v2134_v37, %v647_v46 }
 0x10f   :  { %v2138_v39 = vpop.eup %2137  ;;  %v664_v56 = vmul.f32 %v2136_v38, %v648_v0  ;;  %v670_v55 = vsub.f32 2.0, %v662_v47 }
 0x110   :  { %v2140_v26 = vpop.eup %2139  ;;  %v665_v20 = vmul.f32 %v2138_v39, %v649_v40  ;;  %v671_v43 = vsub.f32 2.0, %v663_v62  ;;  %v586_v62 = vadd.f32 %v585_v52, %v584_v4 }
 0x111   :  { %v2142_v19 = vpop.eup %2141  ;;  %v666_v54 = vmul.f32 %v2140_v26, %v650_v49  ;;  %v672_v57 = vsub.f32 2.0, %v664_v56  ;;  %v678_v2 = vmul.f32 %v2132_v32, %v670_v55 }
 0x112   :  { %v2144_v61 = vpop.eup %2143  ;;  %v667_v63 = vmul.f32 %v2142_v19, %v651_v18  ;;  %v673_v3 = vsub.f32 2.0, %v665_v20  ;;  %v679_v10 = vmul.f32 %v2134_v37, %v671_v43 }
 0x113   :  { %v2146_v11 = vpop.eup %2145  ;;  %v668_v23 = vmul.f32 %v2144_v61, %v652_v28  ;;  %v674_v24 = vsub.f32 2.0, %v666_v54  ;;  %v680_v25 = vmul.f32 %v2136_v38, %v672_v57  ;;  %v583_v38 = vsub.f32 %v581_v17, %v582_v12 }
 0x114   :  { %v669_v1 = vmul.f32 %v2146_v11, %v653_v33  ;;  %v675_v59 = vsub.f32 2.0, %v667_v63  ;;  %v681_v51 = vmul.f32 %v2138_v39, %v673_v3  ;;  %v694_v45 = vrot.slane %v679_v10, 7 }
 0x115   :  { %v676_v53 = vsub.f32 2.0, %v668_v23  ;;  %v682_v8 = vmul.f32 %v2140_v26, %v674_v24  ;;  %v696_v46 = vrot.slane %v680_v25, 6 }
 0x116   :  { %v677_v0 = vsub.f32 2.0, %v669_v1  ;;  %v683_v48 = vmul.f32 %v2142_v19, %v675_v59  ;;  %v695_v40 = vsel %vm297_vm8, %v694_v45, %v678_v2  ;;  %v698_v49 = vrot.slane %v681_v51, 5 }
 0x117   :  { %v684_v18 = vmul.f32 %v2144_v61, %v676_v53  ;;  %v697_v28 = vsel %vm300_vm9, %v696_v46, %v695_v40  ;;  %v700_v32 = vrot.slane %v682_v8, 4 }
 0x118   :  { %v685_v37 = vmul.f32 %v2146_v11, %v677_v0  ;;  %v699_v33 = vsel %vm303_vm10, %v698_v49, %v697_v28  ;;  %v702_v47 = vrot.slane %v683_v48, 3 }
 0x119   :  { %v701_v5 = vsel %vm306_vm11, %v700_v32, %v699_v33  ;;  %v704_v39 = vrot.slane %v684_v18, 2 }
 0x11a   :  { %v703_v56 = vsel %vm309_vm12, %v702_v47, %v701_v5  ;;  %v706_v55 = vrot.slane %v685_v37, 1 }
 0x11b   :  { %v705_v26 = vsel %vm312_vm13, %v704_v39, %v703_v56 }
 0x11c   :  { %v707_v20 = vsel %vm315_vm14, %v706_v55, %v705_v26 }
 0x11d   :  { %v709_v43 = vmul.f32 %v707_v20, %v583_v38  ;;  %v710_v19 = vmul.f32 %v707_v20, %v586_v62 }
 0x11f   :  { %v711_v54 = vmul.f32 %v709_v43, %v583_v38  ;;  %v712_v57 = vmul.f32 %v710_v19, %v586_v62  ;;  %v715_v61 = vmul.f32 %v709_v43, %v586_v62  ;;  %v716_v63 = vmul.f32 %v710_v19, %v583_v38  ;;  %941 = vst [vmem:[#allocation10 + $0x70] sm:$0xff] %v709_v43 }
 0x120   :  { %943 = vst [vmem:[#allocation10 + $0xa0] sm:$0xff] %v710_v19  ;;  %v729_v24 = vmul.f32 %v2775_v44, %v709_v43  ;;  %v730_v1 = vmul.f32 %v2779_v50, %v710_v19  ;;  %v732_v59 = vmul.f32 %v2775_v44, %v710_v19  ;;  %v733_v51 = vmul.f32 %v2779_v50, %v709_v43 }
 0x121   :  { %v713_v17 = vadd.f32 %v712_v57, %v711_v54  ;;  %v717_v52 = vsub.f32 %v715_v61, %v716_v63  ;;  %v741_v55 = vmul.f32 %v709_v43, %v709_v43  ;;  %v742_v26 = vmul.f32 %v710_v19, %v710_v19 }
 0x122   :  { %v731_v8 = vadd.f32 %v730_v1, %v729_v24  ;;  %v734_v46 = vsub.f32 %v732_v59, %v733_v51 }
 0x123   :  { %v714_v3 = vsub.f32 1.0, %v713_v17  ;;  %v718_v2 = vsub.f32 0.0, %v717_v52  ;;  %v743_v63 = vadd.f32 %v742_v26, %v741_v55  ;;  %v2822_v55 = vld [vmem:[#allocation7 + $0x20] sm:$0xff] }
 0x125   :  { %v719_v10 = vmul.f32 %v714_v3, %v714_v3  ;;  %v720_v11 = vmul.f32 %v718_v2, %v718_v2  ;;  %v727_v4 = vsub.f32 0.0, %v718_v2 }
 0x127   :  { %v721_v12 = vadd.f32 %v720_v11, %v719_v10 }
 0x129   :  { %2147 = vrcp.f32 %v721_v12 }
 0x12f   :  { %v2148_v23 = vpop.eup %2147 }
 0x130   :  { %v723_v25 = vmul.f32 %v2148_v23, %v721_v12 }
 0x132   :  { %v724_v45 = vsub.f32 2.0, %v723_v25 }
 0x134   :  { %v725_v53 = vmul.f32 %v2148_v23, %v724_v45 }
 0x136   :  { %v726_v0 = vmul.f32 %v725_v53, %v714_v3  ;;  %v728_v48 = vmul.f32 %v727_v4, %v725_v53  ;;  %2149 = vrsqrt.f32 %v725_v53  ;;  %vm751_vm6 = vcmp.eq.f32.partialorder %v725_v53, inf  ;;  %v2810_v4 = vld [vmem:[#allocation7] sm:$0xff] }
 0x137   :  { %v754_v61 = vand.u32 2147483648, %v725_v53  ;;  %vm753_vm7 = vcmp.eq.f32.partialorder %v725_v53, 0.0 }
 0x138   :  { %v735_v40 = vmul.f32 %v731_v8, %v726_v0  ;;  %v736_v49 = vmul.f32 %v734_v46, %v728_v48  ;;  %v738_v18 = vmul.f32 %v731_v8, %v728_v48  ;;  %v739_v28 = vmul.f32 %v734_v46, %v726_v0  ;;  %945 = vst [vmem:[#allocation10 + $0xd0] sm:$0xff] %v726_v0 }
 0x139   :  { %947 = vst [vmem:[#allocation10 + $0x100] sm:$0xff] %v728_v48 }
 0x13a   :  { %v2798_v32 = vsub.f32 %v735_v40, %v736_v49  ;;  %v2800_v37 = vadd.f32 %v739_v28, %v738_v18  ;;  %v2816_v40 = vld [vmem:[#allocation7 + $0x10] sm:$0xff] }
 0x13c   :  { %v2150_v33 = vpop.eup %2149  ;;  %v797_v47 = vmul.f32 %v2798_v32, %v2798_v32  ;;  %v798_v38 = vmul.f32 %v2800_v37, %v2800_v37 }
 0x13d   :  { %v745_v62 = vmul.f32 %v2150_v33, %v725_v53 }
 0x13e   :  { %v2806_v5 = vadd.f32 %v798_v38, %v797_v47  ;;  %v2819_v47 = vld [vmem:[#allocation7 + $0x18] sm:$0xff] }
 0x13f   :  { %v746_v39 = vmul.f32 %v2150_v33, %v745_v62 }
 0x140   :  { %2151 = vrsqrt.f32 %v2806_v5  ;;  %vm807_vm15 = vcmp.eq.f32.partialorder %v2806_v5, inf  ;;  %vm809_vm0 = vcmp.eq.f32.partialorder %v2806_v5, 0.0 }
 0x141   :  { %v747_v56 = vmul.f32 0.5, %v746_v39 }
 0x143   :  { %v748_v20 = vsub.f32 1.5, %v747_v56 }
 0x145   :  { %v749_v54 = vmul.f32 %v2150_v33, %v748_v20 }
 0x146   :  { %v2152_v57 = vpop.eup %2151 }
 0x147   :  { %v750_v17 = vmul.f32 %v749_v54, %v725_v53  ;;  %v801_v52 = vmul.f32 %v2152_v57, %v2806_v5 }
 0x149   :  { %v752_v3 = vsel %vm751_vm6, %v725_v53, %v750_v17  ;;  %v802_v2 = vmul.f32 %v2152_v57, %v801_v52  ;;  %v2813_v53 = vld [vmem:[#allocation7 + $0x8] sm:$0xff] }
 0x14a   :  { %v755_v10 = vsel %vm753_vm7, %v754_v61, %v752_v3  ;;  %v810_v3 = vand.u32 2147483648, %v2806_v5 }
 0x14b   :  { %v756_v11 = vmul.f32 %v755_v10, %v743_v63  ;;  %v803_v12 = vmul.f32 0.5, %v802_v2  ;;  %v2827_v63 = vld [vmem:[#allocation7 + $0x28] sm:$0xff]  ;;  %v2831_v2 = vld [vmem:[#allocation7 + $0x30] sm:$0xff] }
 0x14d   :  { %v758_v23 = vrot.slane %v756_v11, 1  ;;  %v759_v24 = vrot.slane %v756_v11, 2  ;;  %v765_v25 = vperm.slane %v756_v11, 0  ;;  %v760_v43 = vrot.slane %v756_v11, 3 }
 0x14e   :  { %v761_v19 = vrot.slane %v756_v11, 4  ;;  %v762_v1 = vrot.slane %v756_v11, 5  ;;  %v763_v46 = vrot.slane %v756_v11, 6  ;;  %v804_v18 = vsub.f32 1.5, %v803_v12  ;;  %v2836_v12 = vld [vmem:[#allocation7 + $0x38] sm:$0xff] }
 0x14f   :  { %v766_v59 = vperm.slane %v758_v23, 0  ;;  %v767_v51 = vperm.slane %v759_v24, 0  ;;  %v768_v45 = vperm.slane %v760_v43, 0  ;;  %v781_v8 = vmul.f32 %v2810_v4, %v765_v25 }
 0x150   :  { %v769_v0 = vperm.slane %v761_v19, 0  ;;  %v764_v28 = vrot.slane %v756_v11, 7  ;;  %v770_v33 = vperm.slane %v762_v1, 0  ;;  %v805_v39 = vmul.f32 %v2152_v57, %v804_v18  ;;  %v3495_v1 = vld [vmem:[#allocation15_spill] sm:$0xff]  ;;  %v3496_v18 = vld [vmem:[#allocation22_spill] sm:$0xff] }
 0x151   :  { %v782_v48 = vmul.f32 %v2813_v53, %v766_v59  ;;  %v783_v49 = vmul.f32 %v2816_v40, %v767_v51  ;;  %v784_v38 = vmul.f32 %v2819_v47, %v768_v45  ;;  %v771_v56 = vperm.slane %v763_v46, 0 }
 0x152   :  { %v785_v26 = vmul.f32 %v2822_v55, %v769_v0  ;;  %v806_v54 = vmul.f32 %v805_v39, %v2806_v5  ;;  %v772_v61 = vperm.slane %v764_v28, 0  ;;  %v786_v17 = vmul.f32 %v2827_v63, %v770_v33  ;;  %v3497_v28 = vld [vmem:[#allocation23_spill] sm:$0xff] }
 0x153   :  { %v789_v62 = vadd.f32 %v782_v48, %v781_v8  ;;  %v787_v57 = vmul.f32 %v2831_v2, %v771_v56  ;;  %v832_v33 = vmul.f32 %v2798_v32, %v3497_v28  ;;  %v827_v56 = vmul.f32 %v2800_v37, %v3497_v28 }
 0x154   :  { %v808_v11 = vsel %vm807_vm15, %v2806_v5, %v806_v54  ;;  %v788_v23 = vmul.f32 %v2836_v12, %v772_v61  ;;  %v825_v5 = vmul.f32 %v2798_v32, %v3496_v18 }
 0x155   :  { %v790_v20 = vadd.f32 %v789_v62, %v783_v49  ;;  %v811_v25 = vsel %vm809_vm0, %v810_v3, %v808_v11 }
 0x156   :  { %v812_v59 = vmul.f32 %v811_v25, %v3495_v1 }
 0x157   :  { %v791_v52 = vadd.f32 %v790_v20, %v784_v38  ;;  %v3498_v38 = vld [vmem:[#allocation24_spill] sm:$0xff]  ;;  %v3499_v20 = vld [vmem:[#allocation25_spill] sm:$0xff] }
 0x158   :  { %v849_v62 = vmul.f32 %v2798_v32, %v3498_v38  ;;  %v856_v54 = vmul.f32 %v2798_v32, %v3499_v20  ;;  %v851_v61 = vmul.f32 %v2800_v37, %v3499_v20 }
 0x159   :  { %v792_v10 = vadd.f32 %v791_v52, %v785_v26  ;;  %v834_v26 = vmul.f32 %v2800_v37, %v3496_v18  ;;  %v3500_v52 = vld [vmem:[#allocation31_spill] sm:$0xff] }
 0x15a   :  { %v873_v3 = vmul.f32 %v2798_v32, %v3500_v52  ;;  %v882_v25 = vmul.f32 %v2800_v37, %v3500_v52  ;;  %v3506_v52 = vld [vmem:[#allocation28_spill] sm:$0xff] }
 0x15b   :  { %v793_v24 = vadd.f32 %v792_v10, %v786_v17  ;;  %v858_v17 = vmul.f32 %v2800_v37, %v3498_v38  ;;  %v3507_v38 = vld [vmem:[#allocation29_spill] sm:$0xff] }
 0x15d   :  { %v794_v43 = vadd.f32 %v793_v24, %v787_v57  ;;  %v3501_v57 = vld [vmem:[#allocation33_spill] sm:$0xff] }
 0x15e   :  { %v880_v10 = vmul.f32 %v2798_v32, %v3501_v57  ;;  %v875_v24 = vmul.f32 %v2800_v37, %v3501_v57 }
 0x15f   :  { %v795_v19 = vadd.f32 %v794_v43, %v788_v23  ;;  %v3502_v43 = vld [vmem:[#allocation34_spill] sm:$0xff] }
 0x161   :  { %v796_v51 = vand.u32 2147483647, %v795_v19  ;;  %v897_v19 = vmul.f32 %v2798_v32, %v3502_v43 }
 0x163   :  { %v813_v45 = vsub.f32 %v812_v59, %v796_v51  ;;  %v3503_v59 = vld [vmem:[#allocation35_spill] sm:$0xff] }
 0x165   :  { %v814_v8 = vmax.f32 %v813_v45, 0.0  ;;  %v904_v45 = vmul.f32 %v2798_v32, %v3503_v59 }
 0x167   :  { %v815_v46 = vadd.f32 %v814_v8, %v796_v51  ;;  %v2870_v51 = vmul.f32 %v2800_v37, %v3503_v59  ;;  %v2876_v8 = vmul.f32 %v2800_v37, %v3502_v43 }
 0x169   :  { %2153 = vrcp.f32 %v815_v46 }
 0x16f   :  { %v2154_v0 = vpop.eup %2153 }
 0x170   :  { %v817_v48 = vmul.f32 %v2154_v0, %v815_v46  ;;  %v3504_v46 = vld [vmem:[#allocation26_spill] sm:$0xff] }
 0x172   :  { %v818_v49 = vsub.f32 2.0, %v817_v48  ;;  %v3505_v48 = vld [vmem:[#allocation27_spill] sm:$0xff] }
 0x174   :  { %v819_v39 = vmul.f32 %v2154_v0, %v818_v49 }
 0x176   :  { %v820_v11 = vmul.f32 %v819_v39, %v2798_v32  ;;  %v821_v23 = vmul.f32 %v819_v39, %v2800_v37 }
 0x178   :  { %v822_v0 = vmul.f32 %v820_v11, %v3504_v46  ;;  %v823_v49 = vmul.f32 %v821_v23, %v3505_v48  ;;  %v829_v39 = vmul.f32 %v820_v11, %v3505_v48  ;;  %v830_v57 = vmul.f32 %v821_v23, %v3504_v46 }
 0x179   :  { %v846_v20 = vmul.f32 %v820_v11, %v3506_v52  ;;  %v847_v28 = vmul.f32 %v821_v23, %v3507_v38  ;;  %v853_v18 = vmul.f32 %v820_v11, %v3507_v38  ;;  %v854_v32 = vmul.f32 %v821_v23, %v3506_v52 }
 0x17a   :  { %v824_v59 = vsub.f32 %v822_v0, %v823_v49  ;;  %v831_v1 = vadd.f32 %v830_v57, %v829_v39  ;;  %v870_v37 = vmul.f32 %v820_v11, %v2625_v29  ;;  %v871_v43 = vmul.f32 %v821_v23, %v2634_v58 }
 0x17b   :  { %v848_v50 = vsub.f32 %v846_v20, %v847_v28  ;;  %v855_v44 = vadd.f32 %v854_v32, %v853_v18  ;;  %v877_v48 = vmul.f32 %v820_v11, %v2634_v58  ;;  %v878_v46 = vmul.f32 %v821_v23, %v2625_v29 }
 0x17c   :  { %v826_v36 = vadd.f32 %v825_v5, %v824_v59  ;;  %v833_v35 = vadd.f32 %v832_v33, %v831_v1  ;;  %v872_v34 = vsub.f32 %v870_v37, %v871_v43  ;;  %v894_v31 = vmul.f32 %v820_v11, %v2652_v7 }
 0x17d   :  { %v850_v38 = vadd.f32 %v849_v62, %v848_v50  ;;  %v857_v30 = vadd.f32 %v856_v54, %v855_v44  ;;  %v879_v52 = vadd.f32 %v878_v46, %v877_v48  ;;  %v895_v57 = vmul.f32 %v821_v23, %v2655_v6 }
 0x17e   :  { %v828_v0 = vsub.f32 %v826_v36, %v827_v56  ;;  %v835_v49 = vadd.f32 %v834_v26, %v833_v35  ;;  %v874_v39 = vadd.f32 %v873_v3, %v872_v34  ;;  %v901_v28 = vmul.f32 %v820_v11, %v2655_v6 }
 0x17f   :  { %v852_v18 = vsub.f32 %v850_v38, %v851_v61  ;;  %v859_v20 = vadd.f32 %v858_v17, %v857_v30  ;;  %v881_v32 = vadd.f32 %v880_v10, %v879_v52  ;;  %v896_v58 = vsub.f32 %v894_v31, %v895_v57 }
 0x180   :  { %v836_v29 = vmax.f32 %v828_v0, 0.0  ;;  %v837_v5 = vmax.f32 %v835_v49, 0.0  ;;  %v876_v1 = vsub.f32 %v874_v39, %v875_v24  ;;  %v902_v33 = vmul.f32 %v821_v23, %v2652_v7 }
 0x181   :  { %v860_v43 = vmax.f32 %v852_v18, 0.0  ;;  %v861_v50 = vmax.f32 %v859_v20, 0.0  ;;  %v883_v44 = vadd.f32 %v882_v25, %v881_v32  ;;  %v898_v62 = vadd.f32 %v897_v19, %v896_v58 }
 0x182   :  { %v838_v54 = vmul.f32 %v836_v29, %v2665_v13  ;;  %v839_v35 = vmul.f32 %v837_v5, %v2668_v14  ;;  %v842_v34 = vmul.f32 %v836_v29, %v2668_v14  ;;  %v843_v36 = vmul.f32 %v837_v5, %v2665_v13 }
 0x183   :  { %v862_v30 = vmul.f32 %v860_v43, %v2671_v16  ;;  %v863_v31 = vmul.f32 %v861_v50, %v2678_v27  ;;  %v866_v38 = vmul.f32 %v860_v43, %v2678_v27  ;;  %v867_v56 = vmul.f32 %v861_v50, %v2671_v16 }
 0x184   :  { %v840_v26 = vsub.f32 %v838_v54, %v839_v35  ;;  %v844_v61 = vadd.f32 %v843_v36, %v842_v34  ;;  %v884_v17 = vmax.f32 %v876_v1, 0.0  ;;  %v885_v58 = vmax.f32 %v883_v44, 0.0 }
 0x185   :  { %v864_v52 = vsub.f32 %v862_v30, %v863_v31  ;;  %v868_v3 = vadd.f32 %v867_v56, %v866_v38  ;;  %v900_v10 = vsub.f32 %v898_v62, %v2870_v51  ;;  %v903_v11 = vadd.f32 %v902_v33, %v901_v28 }
 0x186   :  { %v886_v29 = vmul.f32 %v884_v17, %v2685_v15  ;;  %v887_v23 = vmul.f32 %v885_v58, %v2688_v22  ;;  %v890_v24 = vmul.f32 %v884_v17, %v2688_v22  ;;  %v891_v25 = vmul.f32 %v885_v58, %v2685_v15 }
 0x187   :  { %v905_v19 = vadd.f32 %v904_v45, %v903_v11  ;;  %v908_v59 = vmax.f32 %v900_v10, 0.0  ;;  %v865_v46 = vadd.f32 %v864_v52, %v840_v26  ;;  %v869_v48 = vadd.f32 %v868_v3, %v844_v61 }
 0x188   :  { %v888_v37 = vsub.f32 %v886_v29, %v887_v23  ;;  %v892_v57 = vadd.f32 %v891_v25, %v890_v24 }
 0x189   :  { %v907_v0 = vadd.f32 %v2876_v8, %v905_v19  ;;  %v910_v51 = vmul.f32 %v908_v59, %v2734_v60  ;;  %v914_v39 = vmul.f32 %v908_v59, %v2737_v9  ;;  %v2915_v8 = vld [vmem:[%s3375_s5] sm:$0xff] }
 0x18a   :  { %v889_v28 = vadd.f32 %v888_v37, %v865_v46  ;;  %v893_v18 = vadd.f32 %v892_v57, %v869_v48 }
 0x18b   :  { %v909_v49 = vmax.f32 %v907_v0, 0.0 }
 0x18d   :  { %v911_v20 = vmul.f32 %v909_v49, %v2737_v9  ;;  %v915_v32 = vmul.f32 %v909_v49, %v2734_v60 }
 0x18f   :  { %v912_v5 = vsub.f32 %v910_v51, %v911_v20  ;;  %v916_v45 = vadd.f32 %v915_v32, %v914_v39 }
 0x191   :  { %v913_v1 = vadd.f32 %v912_v5, %v889_v28  ;;  %v917_v33 = vadd.f32 %v916_v45, %v893_v18 }
 0x193   :  { %v918_v43 = vmul.f32 %v913_v1, %v913_v1  ;;  %v919_v50 = vmul.f32 %v917_v33, %v917_v33 }
 0x195   :  { %v920_v44 = vadd.f32 %v919_v50, %v918_v43 }
 0x197   :  { %v921_v62 = vmax.f32 %v2915_v8, %v920_v44 }
 0x199   :  { %2155 = vrsqrt.f32 %v921_v62  ;;  %vm928_vm1 = vweird.f32 %v921_v62 }
 0x19f   :  { %v2156_v54 = vpop.eup %2155 }
 0x1a0   :  { %v923_v35 = vmul.f32 %v2156_v54, %v921_v62  ;;  %vm929_vm2 = vweird.f32 %v2156_v54 }
 0x1a1   :  { %vm930_vm3 = vmor %vm928_vm1, %vm929_vm2 }
 0x1a2   :  { %v924_v34 = vmul.f32 %v2156_v54, %v923_v35 }
 0x1a4   :  { %v925_v36 = vmul.f32 0.5, %v924_v34 }
 0x1a6   :  { %v926_v30 = vsub.f32 1.5, %v925_v36 }
 0x1a8   :  { %v927_v31 = vmul.f32 %v2156_v54, %v926_v30 }
 0x1aa   :  { %v931_v38 = vsel %vm930_vm3, %v2156_v54, %v927_v31 }
 0x1ab   :  { %v932_v56 = vmul.f32 %v931_v38, %v2460_v21 }
 0x1ad   :  { %v933_v26 = vmin.f32 %v932_v56, 1.0 }
 0x1af   :  { %v2919_v61 = vmul.f32 %v933_v26, %v913_v1  ;;  %v2921_v17 = vmul.f32 %v933_v26, %v917_v33 }
 0x1b1   :  { %937 = vst [vmem:[#allocation10 + $0x10] sm:$0xff] %v2919_v61  ;;  %v954_v58 = vmul.f32 %v2919_v61, %v2919_v61  ;;  %v955_v52 = vmul.f32 %v2921_v17, %v2921_v17 }
 0x1b2   :  { %939 = vst [vmem:[#allocation10 + $0x40] sm:$0xff] %v2921_v17 }
 0x1b3   :  { %v956_v3 = vadd.f32 %v955_v52, %v954_v58 }
 0x1b5   :  { %v957_v10 = vmul.f32 %v2810_v4, %v956_v3  ;;  %v958_v11 = vmul.f32 %v2813_v53, %v956_v3  ;;  %v959_v29 = vmul.f32 %v2816_v40, %v956_v3  ;;  %v960_v23 = vmul.f32 %v2819_v47, %v956_v3 }
 0x1b6   :  { %v961_v24 = vmul.f32 %v2822_v55, %v956_v3  ;;  %v962_v25 = vmul.f32 %v2827_v63, %v956_v3  ;;  %v963_v19 = vmul.f32 %v2831_v2, %v956_v3  ;;  %v964_v59 = vmul.f32 %v2836_v12, %v956_v3 }
 0x1b7   :  { %v965_v46 = vrot.slane %v957_v10, 4  ;;  %v971_v48 = vrot.slane %v958_v11, 4  ;;  %v977_v37 = vrot.slane %v959_v29, 4  ;;  %v983_v57 = vrot.slane %v960_v23, 4 }
 0x1b8   :  { %v989_v0 = vrot.slane %v961_v24, 4  ;;  %v995_v49 = vrot.slane %v962_v25, 4  ;;  %v1001_v51 = vrot.slane %v963_v19, 4  ;;  %v1007_v39 = vrot.slane %v964_v59, 4 }
 0x1b9   :  { %v966_v28 = vadd.f32 %v965_v46, %v957_v10  ;;  %v972_v18 = vadd.f32 %v971_v48, %v958_v11  ;;  %v978_v20 = vadd.f32 %v977_v37, %v959_v29  ;;  %v984_v32 = vadd.f32 %v983_v57, %v960_v23 }
 0x1ba   :  { %v990_v5 = vadd.f32 %v989_v0, %v961_v24  ;;  %v996_v45 = vadd.f32 %v995_v49, %v962_v25  ;;  %v1002_v1 = vadd.f32 %v1001_v51, %v963_v19  ;;  %v1008_v33 = vadd.f32 %v1007_v39, %v964_v59  ;;  %v2937_v39 = vld [vmem:[#allocation9] sm:$0xff] }
 0x1bb   :  { %v967_v43 = vrot.slane %v966_v28, 2  ;;  %v973_v50 = vrot.slane %v972_v18, 2  ;;  %v979_v44 = vrot.slane %v978_v20, 2  ;;  %v985_v62 = vrot.slane %v984_v32, 2 }
 0x1bc   :  { %v991_v54 = vrot.slane %v990_v5, 2  ;;  %v997_v35 = vrot.slane %v996_v45, 2  ;;  %v1003_v34 = vrot.slane %v1002_v1, 2  ;;  %v1009_v36 = vrot.slane %v1008_v33, 2 }
 0x1bd   :  { %v968_v30 = vadd.f32 %v967_v43, %v966_v28  ;;  %v974_v31 = vadd.f32 %v973_v50, %v972_v18  ;;  %v980_v38 = vadd.f32 %v979_v44, %v978_v20  ;;  %v986_v56 = vadd.f32 %v985_v62, %v984_v32  ;;  %v3510_v43 = vld [vmem:[#allocation19_spill] sm:$0xff]  ;;  %v3511_v44 = vld [vmem:[#allocation20_spill] sm:$0xff] }
 0x1be   :  { %v992_v26 = vadd.f32 %v991_v54, %v990_v5  ;;  %v998_v58 = vadd.f32 %v997_v35, %v996_v45  ;;  %v1004_v52 = vadd.f32 %v1003_v34, %v1002_v1  ;;  %v1010_v3 = vadd.f32 %v1009_v36, %v1008_v33  ;;  %v3508_v5 = vld [vmem:[#allocation17_spill] sm:$0xff]  ;;  %v3509_v1 = vld [vmem:[#allocation18_spill] sm:$0xff] }
 0x1bf   :  { %v969_v10 = vrot.slane %v968_v30, 1  ;;  %v975_v11 = vrot.slane %v974_v31, 1  ;;  %v981_v29 = vrot.slane %v980_v38, 1  ;;  %v987_v23 = vrot.slane %v986_v56, 1  ;;  %v3512_v54 = vld [vmem:[#allocation21_spill] sm:$0xff] }
 0x1c0   :  { %v993_v24 = vrot.slane %v992_v26, 1  ;;  %v999_v25 = vrot.slane %v998_v58, 1  ;;  %v1005_v19 = vrot.slane %v1004_v52, 1  ;;  %v1011_v59 = vrot.slane %v1010_v3, 1 }
 0x1c1   :  { %v970_v46 = vadd.f32 %v969_v10, %v968_v30  ;;  %v976_v48 = vadd.f32 %v975_v11, %v974_v31  ;;  %v982_v37 = vadd.f32 %v981_v29, %v980_v38  ;;  %v988_v57 = vadd.f32 %v987_v23, %v986_v56  ;;  %v3513_v29 = vld [vmem:[#allocation36_spill] sm:$0xff] }
 0x1c2   :  { %v994_v0 = vadd.f32 %v993_v24, %v992_v26  ;;  %v1000_v49 = vadd.f32 %v999_v25, %v998_v58  ;;  %v1006_v51 = vadd.f32 %v1005_v19, %v1004_v52  ;;  %v1012_v32 = vadd.f32 %v1011_v59, %v1010_v3  ;;  %v3514_v24 = vld [vmem:[#allocation37_spill] sm:$0xff] }
 0x1c3   :  { %v1013_v28 = vadd.f32 %v2937_v39, %v970_v46  ;;  %v1014_v18 = vadd.f32 %v976_v48, %v2495_v41  ;;  %v1015_v20 = vadd.f32 %v982_v37, %v2498_v42  ;;  %v1016_v45 = vadd.f32 %v988_v57, %v3508_v5 }
 0x1c4   :  { %v1017_v33 = vadd.f32 %v994_v0, %v3509_v1  ;;  %v1018_v50 = vadd.f32 %v1000_v49, %v3510_v43  ;;  %v1019_v62 = vadd.f32 %v1006_v51, %v3511_v44  ;;  %v1020_v35 = vadd.f32 %v1012_v32, %v3512_v54 }
 0x1c5   :  { %2157 = vrcp.f32 %v1013_v28  ;;  %v948_v23 = vmul.f32 %v3513_v29, %v2919_v61  ;;  %v952_v25 = vmul.f32 %v3514_v24, %v2919_v61  ;;  %v949_v51 = vmul.f32 %v3514_v24, %v2921_v17 }
 0x1c6   :  { %2159 = vrcp.f32 %v1014_v18  ;;  %v951_v61 = vmul.f32 %v3513_v29, %v2921_v17 }
 0x1c7   :  { %2161 = vrcp.f32 %v1015_v20 }
 0x1c8   :  { %2163 = vrcp.f32 %v1016_v45 }
 0x1c9   :  { %2165 = vrcp.f32 %v1017_v33 }
 0x1ca   :  { %2167 = vrcp.f32 %v1018_v50 }
 0x1cb   :  { %v2158_v34 = vpop.eup %2157  ;;  %2169 = vrcp.f32 %v1019_v62 }
 0x1cc   :  { %v2160_v36 = vpop.eup %2159  ;;  %2171 = vrcp.f32 %v1020_v35  ;;  %v1029_v30 = vmul.f32 %v2158_v34, %v1013_v28 }
 0x1cd   :  { %v2162_v31 = vpop.eup %2161  ;;  %v1030_v38 = vmul.f32 %v2160_v36, %v1014_v18 }
 0x1ce   :  { %v2164_v56 = vpop.eup %2163  ;;  %v1031_v26 = vmul.f32 %v2162_v31, %v1015_v20  ;;  %v1037_v58 = vsub.f32 2.0, %v1029_v30 }
 0x1cf   :  { %v2166_v52 = vpop.eup %2165  ;;  %v1032_v3 = vmul.f32 %v2164_v56, %v1016_v45  ;;  %v1038_v10 = vsub.f32 2.0, %v1030_v38 }
 0x1d0   :  { %v2168_v11 = vpop.eup %2167  ;;  %v1033_v19 = vmul.f32 %v2166_v52, %v1017_v33  ;;  %v1039_v59 = vsub.f32 2.0, %v1031_v26  ;;  %v1045_v57 = vmul.f32 %v2158_v34, %v1037_v58 }
 0x1d1   :  { %v2170_v46 = vpop.eup %2169  ;;  %v1034_v48 = vmul.f32 %v2168_v11, %v1018_v50  ;;  %v1040_v37 = vsub.f32 2.0, %v1032_v3  ;;  %v1046_v0 = vmul.f32 %v2160_v36, %v1038_v10 }
 0x1d2   :  { %v2172_v49 = vpop.eup %2171  ;;  %v1035_v28 = vmul.f32 %v2170_v46, %v1019_v62  ;;  %v1041_v18 = vsub.f32 2.0, %v1033_v19  ;;  %v1047_v20 = vmul.f32 %v2162_v31, %v1039_v59  ;;  %v950_v59 = vsub.f32 %v948_v23, %v949_v51 }
 0x1d3   :  { %v1036_v32 = vmul.f32 %v2172_v49, %v1020_v35  ;;  %v1042_v45 = vsub.f32 2.0, %v1034_v48  ;;  %v1048_v30 = vmul.f32 %v2164_v56, %v1040_v37  ;;  %v1061_v38 = vrot.slane %v1046_v0, 7 }
 0x1d4   :  { %v1043_v33 = vsub.f32 2.0, %v1035_v28  ;;  %v1049_v26 = vmul.f32 %v2166_v52, %v1041_v18  ;;  %v1063_v50 = vrot.slane %v1047_v20, 6  ;;  %v953_v48 = vadd.f32 %v952_v25, %v951_v61 }
 0x1d5   :  { %v1044_v3 = vsub.f32 2.0, %v1036_v32  ;;  %v1050_v34 = vmul.f32 %v2168_v11, %v1042_v45  ;;  %v1062_v36 = vsel %vm297_vm8, %v1061_v38, %v1045_v57  ;;  %v1065_v58 = vrot.slane %v1048_v30, 5 }
 0x1d6   :  { %v1051_v10 = vmul.f32 %v2170_v46, %v1043_v33  ;;  %v1064_v62 = vsel %vm300_vm9, %v1063_v50, %v1062_v36  ;;  %v1067_v19 = vrot.slane %v1049_v26, 4 }
 0x1d7   :  { %v1052_v31 = vmul.f32 %v2172_v49, %v1044_v3  ;;  %v1066_v35 = vsel %vm303_vm10, %v1065_v58, %v1064_v62  ;;  %v1069_v56 = vrot.slane %v1050_v34, 3 }
 0x1d8   :  { %v1068_v17 = vsel %vm306_vm11, %v1067_v19, %v1066_v35  ;;  %v1071_v37 = vrot.slane %v1051_v10, 2 }
 0x1d9   :  { %v1070_v52 = vsel %vm309_vm12, %v1069_v56, %v1068_v17  ;;  %v1073_v0 = vrot.slane %v1052_v31, 1 }
 0x1da   :  { %v1072_v11 = vsel %vm312_vm13, %v1071_v37, %v1070_v52 }
 0x1db   :  { %v1074_v57 = vsel %vm315_vm14, %v1073_v0, %v1072_v11 }
 0x1dc   :  { %v1076_v46 = vmul.f32 %v1074_v57, %v950_v59  ;;  %v1077_v28 = vmul.f32 %v1074_v57, %v953_v48 }
 0x1de   :  { %v1078_v18 = vmul.f32 %v1076_v46, %v950_v59  ;;  %v1079_v20 = vmul.f32 %v1077_v28, %v953_v48  ;;  %v1082_v49 = vmul.f32 %v1076_v46, %v953_v48  ;;  %v1083_v32 = vmul.f32 %v1077_v28, %v950_v59  ;;  %1308 = vst [vmem:[#allocation10 + $0x78] sm:$0xff] %v1076_v46 }
 0x1df   :  { %1310 = vst [vmem:[#allocation10 + $0xa8] sm:$0xff] %v1077_v28  ;;  %v1096_v26 = vmul.f32 %v3513_v29, %v1076_v46  ;;  %v1097_v3 = vmul.f32 %v3514_v24, %v1077_v28  ;;  %v1099_v34 = vmul.f32 %v3513_v29, %v1077_v28  ;;  %v1100_v36 = vmul.f32 %v3514_v24, %v1076_v46 }
 0x1e0   :  { %v1080_v23 = vadd.f32 %v1079_v20, %v1078_v18  ;;  %v1084_v25 = vsub.f32 %v1082_v49, %v1083_v32  ;;  %v1108_v32 = vmul.f32 %v1076_v46, %v1076_v46 }
 0x1e1   :  { %v1098_v19 = vadd.f32 %v1097_v3, %v1096_v26  ;;  %v1101_v31 = vsub.f32 %v1099_v34, %v1100_v36 }
 0x1e2   :  { %v1081_v51 = vsub.f32 1.0, %v1080_v23  ;;  %v1085_v45 = vsub.f32 0.0, %v1084_v25  ;;  %v1109_v23 = vmul.f32 %v1077_v28, %v1077_v28 }
 0x1e4   :  { %v1086_v30 = vmul.f32 %v1081_v51, %v1081_v51  ;;  %v1087_v38 = vmul.f32 %v1085_v45, %v1085_v45  ;;  %v1094_v10 = vsub.f32 0.0, %v1085_v45 }
 0x1e6   :  { %v1088_v61 = vadd.f32 %v1087_v38, %v1086_v30  ;;  %v1110_v38 = vadd.f32 %v1109_v23, %v1108_v32 }
 0x1e8   :  { %2173 = vrcp.f32 %v1088_v61 }
 0x1ee   :  { %v2174_v33 = vpop.eup %2173 }
 0x1ef   :  { %v1090_v50 = vmul.f32 %v2174_v33, %v1088_v61 }
 0x1f1   :  { %v1091_v58 = vsub.f32 2.0, %v1090_v50 }
 0x1f3   :  { %v1092_v62 = vmul.f32 %v2174_v33, %v1091_v58 }
 0x1f5   :  { %v1093_v35 = vmul.f32 %v1092_v62, %v1081_v51  ;;  %v1095_v56 = vmul.f32 %v1094_v10, %v1092_v62  ;;  %2175 = vrsqrt.f32 %v1092_v62  ;;  %vm1118_vm4 = vcmp.eq.f32.partialorder %v1092_v62, inf }
 0x1f6   :  { %v1121_v30 = vand.u32 2147483648, %v1092_v62  ;;  %vm1120_vm5 = vcmp.eq.f32.partialorder %v1092_v62, 0.0 }
 0x1f7   :  { %v1102_v59 = vmul.f32 %v1098_v19, %v1093_v35  ;;  %v1103_v48 = vmul.f32 %v1101_v31, %v1095_v56  ;;  %v1105_v17 = vmul.f32 %v1098_v19, %v1095_v56  ;;  %v1106_v37 = vmul.f32 %v1101_v31, %v1093_v35  ;;  %1312 = vst [vmem:[#allocation10 + $0xd8] sm:$0xff] %v1093_v35 }
 0x1f8   :  { %1314 = vst [vmem:[#allocation10 + $0x108] sm:$0xff] %v1095_v56 }
 0x1f9   :  { %v2966_v52 = vsub.f32 %v1102_v59, %v1103_v48  ;;  %v2968_v0 = vadd.f32 %v1106_v37, %v1105_v17 }
 0x1fb   :  { %v2176_v29 = vpop.eup %2175  ;;  %v1164_v24 = vmul.f32 %v2966_v52, %v2966_v52  ;;  %v1165_v11 = vmul.f32 %v2968_v0, %v2968_v0 }
 0x1fc   :  { %v1112_v57 = vmul.f32 %v2176_v29, %v1092_v62 }
 0x1fd   :  { %v1166_v18 = vadd.f32 %v1165_v11, %v1164_v24 }
 0x1fe   :  { %v1113_v20 = vmul.f32 %v2176_v29, %v1112_v57 }
 0x1ff   :  { %2177 = vrsqrt.f32 %v1166_v18  ;;  %vm1174_vm6 = vcmp.eq.f32.partialorder %v1166_v18, inf  ;;  %vm1176_vm7 = vcmp.eq.f32.partialorder %v1166_v18, 0.0 }
 0x200   :  { %v1114_v49 = vmul.f32 0.5, %v1113_v20 }
 0x202   :  { %v1115_v25 = vsub.f32 1.5, %v1114_v49 }
 0x204   :  { %v1116_v51 = vmul.f32 %v2176_v29, %v1115_v25 }
 0x205   :  { %v2178_v45 = vpop.eup %2177 }
 0x206   :  { %v1117_v61 = vmul.f32 %v1116_v51, %v1092_v62  ;;  %v1168_v33 = vmul.f32 %v2178_v45, %v1166_v18 }
 0x208   :  { %v1119_v26 = vsel %vm1118_vm4, %v1092_v62, %v1117_v61  ;;  %v1169_v50 = vmul.f32 %v2178_v45, %v1168_v33  ;;  %v1177_v33 = vand.u32 2147483648, %v1166_v18 }
 0x209   :  { %v1122_v3 = vsel %vm1120_vm5, %v1121_v30, %v1119_v26 }
 0x20a   :  { %v1123_v34 = vmul.f32 %v1122_v3, %v1110_v38  ;;  %v1170_v36 = vmul.f32 0.5, %v1169_v50 }
 0x20c   :  { %v1125_v58 = vrot.slane %v1123_v34, 1  ;;  %v1126_v10 = vrot.slane %v1123_v34, 2  ;;  %v1132_v19 = vperm.slane %v1123_v34, 0  ;;  %v1127_v31 = vrot.slane %v1123_v34, 3 }
 0x20d   :  { %v1128_v46 = vrot.slane %v1123_v34, 4  ;;  %v1129_v28 = vrot.slane %v1123_v34, 5  ;;  %v1130_v17 = vrot.slane %v1123_v34, 6  ;;  %v1171_v24 = vsub.f32 1.5, %v1170_v36 }
 0x20e   :  { %v1133_v35 = vperm.slane %v1125_v58, 0  ;;  %v1134_v56 = vperm.slane %v1126_v10, 0  ;;  %v1135_v59 = vperm.slane %v1127_v31, 0  ;;  %v1148_v48 = vmul.f32 %v2810_v4, %v1132_v19  ;;  %v3515_v19 = vld [vmem:[#allocation15_spill] sm:$0xff] }
 0x20f   :  { %v1136_v37 = vperm.slane %v1128_v46, 0  ;;  %v1131_v11 = vrot.slane %v1123_v34, 7  ;;  %v1137_v57 = vperm.slane %v1129_v28, 0  ;;  %v1172_v32 = vmul.f32 %v2178_v45, %v1171_v24  ;;  %v3518_v24 = vld [vmem:[#allocation24_spill] sm:$0xff] }
 0x210   :  { %v1149_v29 = vmul.f32 %v2813_v53, %v1133_v35  ;;  %v1150_v62 = vmul.f32 %v2816_v40, %v1134_v56  ;;  %v1151_v20 = vmul.f32 %v2819_v47, %v1135_v59  ;;  %v1138_v23 = vperm.slane %v1130_v17, 0 }
 0x211   :  { %v1152_v25 = vmul.f32 %v2822_v55, %v1136_v37  ;;  %v1173_v30 = vmul.f32 %v1172_v32, %v1166_v18  ;;  %v1139_v4 = vperm.slane %v1131_v11, 0  ;;  %v1153_v38 = vmul.f32 %v2827_v63, %v1137_v57  ;;  %v3516_v37 = vld [vmem:[#allocation22_spill] sm:$0xff]  ;;  %v3519_v32 = vld [vmem:[#allocation25_spill] sm:$0xff] }
 0x212   :  { %v1156_v49 = vadd.f32 %v1149_v29, %v1148_v48  ;;  %v1154_v26 = vmul.f32 %v2831_v2, %v1138_v23  ;;  %v1192_v29 = vmul.f32 %v2966_v52, %v3516_v37  ;;  %v1216_v11 = vmul.f32 %v2966_v52, %v3518_v24 }
 0x213   :  { %v1175_v3 = vsel %vm1174_vm6, %v1166_v18, %v1173_v30  ;;  %v1155_v34 = vmul.f32 %v2836_v12, %v1139_v4  ;;  %v3517_v18 = vld [vmem:[#allocation23_spill] sm:$0xff]  ;;  %v1223_v23 = vmul.f32 %v2966_v52, %v3519_v32 }
 0x214   :  { %v1157_v51 = vadd.f32 %v1156_v49, %v1150_v62  ;;  %v1178_v45 = vsel %vm1176_vm7, %v1177_v33, %v1175_v3  ;;  %v1199_v62 = vmul.f32 %v2966_v52, %v3517_v18  ;;  %v1201_v49 = vmul.f32 %v2968_v0, %v3516_v37  ;;  %v3520_v30 = vld [vmem:[#allocation31_spill] sm:$0xff] }
 0x215   :  { %v1179_v31 = vmul.f32 %v1178_v45, %v3515_v19  ;;  %v1240_v4 = vmul.f32 %v2966_v52, %v3520_v30  ;;  %v1249_v3 = vmul.f32 %v2968_v0, %v3520_v30  ;;  %v3523_v45 = vld [vmem:[#allocation35_spill] sm:$0xff] }
 0x216   :  { %v1158_v61 = vadd.f32 %v1157_v51, %v1151_v20  ;;  %v1194_v20 = vmul.f32 %v2968_v0, %v3517_v18  ;;  %v1225_v51 = vmul.f32 %v2968_v0, %v3518_v24  ;;  %v3529_v18 = vld [vmem:[#allocation32_spill] sm:$0xff] }
 0x218   :  { %v1159_v50 = vadd.f32 %v1158_v61, %v1152_v25  ;;  %v1218_v25 = vmul.f32 %v2968_v0, %v3519_v32 }
 0x21a   :  { %v1160_v36 = vadd.f32 %v1159_v50, %v1153_v38  ;;  %v3521_v38 = vld [vmem:[#allocation33_spill] sm:$0xff] }
 0x21b   :  { %v1247_v61 = vmul.f32 %v2966_v52, %v3521_v38  ;;  %v1242_v50 = vmul.f32 %v2968_v0, %v3521_v38  ;;  %v3527_v38 = vld [vmem:[#allocation29_spill] sm:$0xff] }
 0x21c   :  { %v1161_v58 = vadd.f32 %v1160_v36, %v1154_v26 }
 0x21e   :  { %v1162_v10 = vadd.f32 %v1161_v58, %v1155_v34  ;;  %v3522_v34 = vld [vmem:[#allocation34_spill] sm:$0xff]  ;;  %v3013_v58 = vmul.f32 %v2968_v0, %v3523_v45 }
 0x21f   :  { %v1264_v36 = vmul.f32 %v2966_v52, %v3522_v34 }
 0x220   :  { %v1163_v46 = vand.u32 2147483647, %v1162_v10  ;;  %v1271_v10 = vmul.f32 %v2966_v52, %v3523_v45 }
 0x222   :  { %v1180_v28 = vsub.f32 %v1179_v31, %v1163_v46  ;;  %v3019_v31 = vmul.f32 %v2968_v0, %v3522_v34 }
 0x224   :  { %v1181_v35 = vmax.f32 %v1180_v28, 0.0 }
 0x226   :  { %v1182_v56 = vadd.f32 %v1181_v35, %v1163_v46  ;;  %v3524_v46 = vld [vmem:[#allocation26_spill] sm:$0xff]  ;;  %v3525_v35 = vld [vmem:[#allocation27_spill] sm:$0xff] }
 0x228   :  { %2179 = vrcp.f32 %v1182_v56 }
 0x22e   :  { %v2180_v59 = vpop.eup %2179 }
 0x22f   :  { %v1184_v48 = vmul.f32 %v2180_v59, %v1182_v56 }
 0x231   :  { %v1185_v17 = vsub.f32 2.0, %v1184_v48 }
 0x233   :  { %v1186_v57 = vmul.f32 %v2180_v59, %v1185_v17  ;;  %v3526_v17 = vld [vmem:[#allocation28_spill] sm:$0xff] }
 0x235   :  { %v1187_v33 = vmul.f32 %v1186_v57, %v2966_v52  ;;  %v1188_v26 = vmul.f32 %v1186_v57, %v2968_v0  ;;  %v3528_v0 = vld [vmem:[#allocation30_spill] sm:$0xff] }
 0x237   :  { %v1189_v28 = vmul.f32 %v1187_v33, %v3524_v46  ;;  %v1190_v56 = vmul.f32 %v1188_v26, %v3525_v35  ;;  %v1196_v59 = vmul.f32 %v1187_v33, %v3525_v35  ;;  %v1197_v48 = vmul.f32 %v1188_v26, %v3524_v46 }
 0x238   :  { %v1213_v57 = vmul.f32 %v1187_v33, %v3526_v17  ;;  %v1214_v30 = vmul.f32 %v1188_v26, %v3527_v38  ;;  %v1220_v32 = vmul.f32 %v1187_v33, %v3527_v38  ;;  %v1221_v52 = vmul.f32 %v1188_v26, %v3526_v17 }
 0x239   :  { %v1191_v45 = vsub.f32 %v1189_v28, %v1190_v56  ;;  %v1198_v24 = vadd.f32 %v1197_v48, %v1196_v59  ;;  %v1237_v34 = vmul.f32 %v1187_v33, %v3528_v0  ;;  %v1238_v37 = vmul.f32 %v1188_v26, %v3529_v18 }
 0x23a   :  { %v1215_v19 = vsub.f32 %v1213_v57, %v1214_v30  ;;  %v1222_v54 = vadd.f32 %v1221_v52, %v1220_v32  ;;  %v1244_v35 = vmul.f32 %v1187_v33, %v3529_v18  ;;  %v1245_v46 = vmul.f32 %v1188_v26, %v3528_v0 }
 0x23b   :  { %v1193_v44 = vadd.f32 %v1192_v29, %v1191_v45  ;;  %v1200_v43 = vadd.f32 %v1199_v62, %v1198_v24  ;;  %v1239_v1 = vsub.f32 %v1237_v34, %v1238_v37  ;;  %v1261_v5 = vmul.f32 %v1187_v33, %v2652_v7 }
 0x23c   :  { %v1217_v38 = vadd.f32 %v1216_v11, %v1215_v19  ;;  %v1224_v42 = vadd.f32 %v1223_v23, %v1222_v54  ;;  %v1246_v17 = vadd.f32 %v1245_v46, %v1244_v35  ;;  %v1262_v28 = vmul.f32 %v1188_v26, %v2655_v6 }
 0x23d   :  { %v1195_v56 = vsub.f32 %v1193_v44, %v1194_v20  ;;  %v1202_v59 = vadd.f32 %v1201_v49, %v1200_v43  ;;  %v1241_v48 = vadd.f32 %v1240_v4, %v1239_v1  ;;  %v1268_v30 = vmul.f32 %v1187_v33, %v2655_v6 }
 0x23e   :  { %v1219_v32 = vsub.f32 %v1217_v38, %v1218_v25  ;;  %v1226_v57 = vadd.f32 %v1225_v51, %v1224_v42  ;;  %v1248_v52 = vadd.f32 %v1247_v61, %v1246_v17  ;;  %v1263_v18 = vsub.f32 %v1261_v5, %v1262_v28 }
 0x23f   :  { %v1203_v0 = vmax.f32 %v1195_v56, 0.0  ;;  %v1204_v29 = vmax.f32 %v1202_v59, 0.0  ;;  %v1243_v62 = vsub.f32 %v1241_v48, %v1242_v50  ;;  %v1269_v37 = vmul.f32 %v1188_v26, %v2652_v7 }
 0x240   :  { %v1227_v24 = vmax.f32 %v1219_v32, 0.0  ;;  %v1228_v19 = vmax.f32 %v1226_v57, 0.0  ;;  %v1250_v54 = vadd.f32 %v1249_v3, %v1248_v52  ;;  %v1265_v11 = vadd.f32 %v1264_v36, %v1263_v18 }
 0x241   :  { %v1205_v23 = vmul.f32 %v1203_v0, %v2665_v13  ;;  %v1206_v43 = vmul.f32 %v1204_v29, %v2668_v14  ;;  %v1209_v1 = vmul.f32 %v1203_v0, %v2668_v14  ;;  %v1210_v44 = vmul.f32 %v1204_v29, %v2665_v13 }
 0x242   :  { %v1229_v42 = vmul.f32 %v1227_v24, %v2671_v16  ;;  %v1230_v5 = vmul.f32 %v1228_v19, %v2678_v27  ;;  %v1233_v20 = vmul.f32 %v1227_v24, %v2678_v27  ;;  %v1234_v49 = vmul.f32 %v1228_v19, %v2671_v16 }
 0x243   :  { %v1207_v25 = vsub.f32 %v1205_v23, %v1206_v43  ;;  %v1211_v51 = vadd.f32 %v1210_v44, %v1209_v1  ;;  %v1251_v4 = vmax.f32 %v1243_v62, 0.0  ;;  %v1252_v18 = vmax.f32 %v1250_v54, 0.0 }
 0x244   :  { %v1231_v38 = vsub.f32 %v1229_v42, %v1230_v5  ;;  %v1235_v61 = vadd.f32 %v1234_v49, %v1233_v20  ;;  %v1267_v33 = vsub.f32 %v1265_v11, %v3013_v58  ;;  %v1270_v26 = vadd.f32 %v1269_v37, %v1268_v30 }
 0x245   :  { %v1253_v50 = vmul.f32 %v1251_v4, %v2685_v15  ;;  %v1254_v3 = vmul.f32 %v1252_v18, %v2688_v22  ;;  %v1257_v34 = vmul.f32 %v1251_v4, %v2688_v22  ;;  %v1258_v36 = vmul.f32 %v1252_v18, %v2685_v15 }
 0x246   :  { %v1272_v45 = vadd.f32 %v1271_v10, %v1270_v26  ;;  %v1275_v46 = vmax.f32 %v1267_v33, 0.0  ;;  %v1232_v35 = vadd.f32 %v1231_v38, %v1207_v25  ;;  %v1236_v17 = vadd.f32 %v1235_v61, %v1211_v51  ;;  %v3067_v38 = vld [vmem:[#allocation7] sm:$0xff] }
 0x247   :  { %v1255_v0 = vsub.f32 %v1253_v50, %v1254_v3  ;;  %v1259_v28 = vadd.f32 %v1258_v36, %v1257_v34 }
 0x248   :  { %v1274_v56 = vadd.f32 %v3019_v31, %v1272_v45  ;;  %v1277_v58 = vmul.f32 %v1275_v46, %v2734_v60  ;;  %v1281_v48 = vmul.f32 %v1275_v46, %v2737_v9 }
 0x249   :  { %v1256_v30 = vadd.f32 %v1255_v0, %v1232_v35  ;;  %v1260_v32 = vadd.f32 %v1259_v28, %v1236_v17 }
 0x24a   :  { %v1276_v59 = vmax.f32 %v1274_v56, 0.0 }
 0x24c   :  { %v1278_v57 = vmul.f32 %v1276_v59, %v2737_v9  ;;  %v1282_v52 = vmul.f32 %v1276_v59, %v2734_v60 }
 0x24e   :  { %v1279_v29 = vsub.f32 %v1277_v58, %v1278_v57  ;;  %v1283_v10 = vadd.f32 %v1282_v52, %v1281_v48 }
 0x250   :  { %v1280_v62 = vadd.f32 %v1279_v29, %v1256_v30  ;;  %v1284_v37 = vadd.f32 %v1283_v10, %v1260_v32 }
 0x252   :  { %v1285_v24 = vmul.f32 %v1280_v62, %v1280_v62  ;;  %v1286_v19 = vmul.f32 %v1284_v37, %v1284_v37 }
 0x254   :  { %v1287_v54 = vadd.f32 %v1286_v19, %v1285_v24 }
 0x256   :  { %v1288_v31 = vmax.f32 %v2915_v8, %v1287_v54 }
 0x258   :  { %2181 = vrsqrt.f32 %v1288_v31  ;;  %vm1295_vm15 = vweird.f32 %v1288_v31 }
 0x25e   :  { %v2182_v11 = vpop.eup %2181 }
 0x25f   :  { %v1290_v23 = vmul.f32 %v2182_v11, %v1288_v31  ;;  %vm1296_vm0 = vweird.f32 %v2182_v11 }
 0x260   :  { %vm1297_vm1 = vmor %vm1295_vm15, %vm1296_vm0 }
 0x261   :  { %v1291_v43 = vmul.f32 %v2182_v11, %v1290_v23 }
 0x263   :  { %v1292_v1 = vmul.f32 0.5, %v1291_v43 }
 0x265   :  { %v1293_v44 = vsub.f32 1.5, %v1292_v1 }
 0x267   :  { %v1294_v42 = vmul.f32 %v2182_v11, %v1293_v44 }
 0x269   :  { %v1298_v5 = vsel %vm1297_vm1, %v2182_v11, %v1294_v42 }
 0x26a   :  { %v1299_v20 = vmul.f32 %v1298_v5, %v2460_v21 }
 0x26c   :  { %v1300_v49 = vmin.f32 %v1299_v20, 1.0 }
 0x26e   :  { %v3057_v25 = vmul.f32 %v1300_v49, %v1280_v62  ;;  %v3059_v51 = vmul.f32 %v1300_v49, %v1284_v37 }
 0x270   :  { %1304 = vst [vmem:[#allocation10 + $0x18] sm:$0xff] %v3057_v25  ;;  %v1321_v8 = vmul.f32 %v3057_v25, %v3057_v25  ;;  %v1322_v4 = vmul.f32 %v3059_v51, %v3059_v51 }
 0x271   :  { %1306 = vst [vmem:[#allocation10 + $0x48] sm:$0xff] %v3059_v51 }
 0x272   :  { %v1323_v18 = vadd.f32 %v1322_v4, %v1321_v8 }
 0x274   :  { %v1324_v61 = vmul.f32 %v3067_v38, %v1323_v18  ;;  %v1325_v33 = vmul.f32 %v2813_v53, %v1323_v18  ;;  %v1326_v26 = vmul.f32 %v2816_v40, %v1323_v18  ;;  %v1327_v50 = vmul.f32 %v2819_v47, %v1323_v18 }
 0x275   :  { %v1328_v3 = vmul.f32 %v2822_v55, %v1323_v18  ;;  %v1329_v34 = vmul.f32 %v2827_v63, %v1323_v18  ;;  %v1330_v36 = vmul.f32 %v2831_v2, %v1323_v18  ;;  %v1331_v45 = vmul.f32 %v2836_v12, %v1323_v18 }
 0x276   :  { %v1332_v46 = vrot.slane %v1324_v61, 4  ;;  %v1338_v35 = vrot.slane %v1325_v33, 4  ;;  %v1344_v17 = vrot.slane %v1326_v26, 4  ;;  %v1350_v0 = vrot.slane %v1327_v50, 4 }
 0x277   :  { %v1356_v28 = vrot.slane %v1328_v3, 4  ;;  %v1362_v56 = vrot.slane %v1329_v34, 4  ;;  %v1368_v59 = vrot.slane %v1330_v36, 4  ;;  %v1374_v53 = vrot.slane %v1331_v45, 4 }
 0x278   :  { %v1333_v58 = vadd.f32 %v1332_v46, %v1324_v61  ;;  %v1339_v40 = vadd.f32 %v1338_v35, %v1325_v33  ;;  %v1345_v48 = vadd.f32 %v1344_v17, %v1326_v26  ;;  %v1351_v47 = vadd.f32 %v1350_v0, %v1327_v50  ;;  %v3530_v35 = vld [vmem:[#allocation16_spill] sm:$0xff] }
 0x279   :  { %v1357_v30 = vadd.f32 %v1356_v28, %v1328_v3  ;;  %v1363_v55 = vadd.f32 %v1362_v56, %v1329_v34  ;;  %v1369_v32 = vadd.f32 %v1368_v59, %v1330_v36  ;;  %v1375_v63 = vadd.f32 %v1374_v53, %v1331_v45  ;;  %v3531_v28 = vld [vmem:[#allocation17_spill] sm:$0xff]  ;;  %v3532_v59 = vld [vmem:[#allocation18_spill] sm:$0xff] }
 0x27a   :  { %v1334_v57 = vrot.slane %v1333_v58, 2  ;;  %v1340_v2 = vrot.slane %v1339_v40, 2  ;;  %v1346_v52 = vrot.slane %v1345_v48, 2  ;;  %v1352_v12 = vrot.slane %v1351_v47, 2 }
 0x27b   :  { %v1358_v29 = vrot.slane %v1357_v30, 2  ;;  %v1364_v10 = vrot.slane %v1363_v55, 2  ;;  %v1370_v62 = vrot.slane %v1369_v32, 2  ;;  %v1376_v37 = vrot.slane %v1375_v63, 2 }
 0x27c   :  { %v1335_v24 = vadd.f32 %v1334_v57, %v1333_v58  ;;  %v1341_v19 = vadd.f32 %v1340_v2, %v1339_v40  ;;  %v1347_v54 = vadd.f32 %v1346_v52, %v1345_v48  ;;  %v1353_v31 = vadd.f32 %v1352_v12, %v1351_v47  ;;  %v3533_v58 = vld [vmem:[#allocation19_spill] sm:$0xff]  ;;  %v3534_v48 = vld [vmem:[#allocation20_spill] sm:$0xff] }
 0x27d   :  { %v1359_v11 = vadd.f32 %v1358_v29, %v1357_v30  ;;  %v1365_v23 = vadd.f32 %v1364_v10, %v1363_v55  ;;  %v1371_v43 = vadd.f32 %v1370_v62, %v1369_v32  ;;  %v1377_v1 = vadd.f32 %v1376_v37, %v1375_v63  ;;  %v3535_v30 = vld [vmem:[#allocation21_spill] sm:$0xff] }
 0x27e   :  { %v1336_v44 = vrot.slane %v1335_v24, 1  ;;  %v1342_v42 = vrot.slane %v1341_v19, 1  ;;  %v1348_v5 = vrot.slane %v1347_v54, 1  ;;  %v1354_v20 = vrot.slane %v1353_v31, 1 }
 0x27f   :  { %v1360_v49 = vrot.slane %v1359_v11, 1  ;;  %v1366_v8 = vrot.slane %v1365_v23, 1  ;;  %v1372_v4 = vrot.slane %v1371_v43, 1  ;;  %v1378_v18 = vrot.slane %v1377_v1, 1 }
 0x280   :  { %v1337_v61 = vadd.f32 %v1336_v44, %v1335_v24  ;;  %v1343_v33 = vadd.f32 %v1342_v42, %v1341_v19  ;;  %v1349_v26 = vadd.f32 %v1348_v5, %v1347_v54  ;;  %v1355_v50 = vadd.f32 %v1354_v20, %v1353_v31  ;;  %v3088_v19 = vld [vmem:[%s3371_s1] sm:$0xff] }
 0x281   :  { %v1361_v3 = vadd.f32 %v1360_v49, %v1359_v11  ;;  %v1367_v34 = vadd.f32 %v1366_v8, %v1365_v23  ;;  %v1373_v36 = vadd.f32 %v1372_v4, %v1371_v43  ;;  %v1379_v0 = vadd.f32 %v1378_v18, %v1377_v1  ;;  %3536 = vst [vmem:[#allocation36_spill] sm:$0xff] %v3088_v19  ;;  %v3092_v31 = vld [vmem:[#allocation6] sm:$0xff] }
 0x282   :  { %v1380_v45 = vadd.f32 %v2937_v39, %v1337_v61  ;;  %v1381_v46 = vadd.f32 %v1343_v33, %v2495_v41  ;;  %v1382_v17 = vadd.f32 %v1349_v26, %v3530_v35  ;;  %v1383_v56 = vadd.f32 %v1355_v50, %v3531_v28  ;;  %3537 = vst [vmem:[#allocation37_spill] sm:$0xff] %v3092_v31 }
 0x283   :  { %v1384_v53 = vadd.f32 %v1361_v3, %v3532_v59  ;;  %v1385_v40 = vadd.f32 %v1367_v34, %v3533_v58  ;;  %v1386_v47 = vadd.f32 %v1373_v36, %v3534_v48  ;;  %v1387_v55 = vadd.f32 %v1379_v0, %v3535_v30 }
 0x284   :  { %2183 = vrcp.f32 %v1380_v45  ;;  %v1315_v54 = vmul.f32 %v3088_v19, %v3057_v25  ;;  %v1319_v11 = vmul.f32 %v3092_v31, %v3057_v25  ;;  %v1316_v8 = vmul.f32 %v3092_v31, %v3059_v51 }
 0x285   :  { %2185 = vrcp.f32 %v1381_v46  ;;  %v1318_v25 = vmul.f32 %v3088_v19, %v3059_v51 }
 0x286   :  { %2187 = vrcp.f32 %v1382_v17 }
 0x287   :  { %2189 = vrcp.f32 %v1383_v56 }
 0x288   :  { %2191 = vrcp.f32 %v1384_v53 }
 0x289   :  { %2193 = vrcp.f32 %v1385_v40 }
 0x28a   :  { %v2184_v39 = vpop.eup %2183  ;;  %2195 = vrcp.f32 %v1386_v47 }
 0x28b   :  { %v2186_v32 = vpop.eup %2185  ;;  %2197 = vrcp.f32 %v1387_v55  ;;  %v1396_v63 = vmul.f32 %v2184_v39, %v1380_v45 }
 0x28c   :  { %v2188_v57 = vpop.eup %2187  ;;  %v1397_v2 = vmul.f32 %v2186_v32, %v1381_v46 }
 0x28d   :  { %v2190_v52 = vpop.eup %2189  ;;  %v1398_v12 = vmul.f32 %v2188_v57, %v1382_v17  ;;  %v1404_v29 = vsub.f32 2.0, %v1396_v63  ;;  %v1317_v63 = vsub.f32 %v1315_v54, %v1316_v8 }
 0x28e   :  { %v2192_v10 = vpop.eup %2191  ;;  %v1399_v62 = vmul.f32 %v2190_v52, %v1383_v56  ;;  %v1405_v37 = vsub.f32 2.0, %v1397_v2 }
 0x28f   :  { %v2194_v24 = vpop.eup %2193  ;;  %v1400_v23 = vmul.f32 %v2192_v10, %v1384_v53  ;;  %v1406_v43 = vsub.f32 2.0, %v1398_v12  ;;  %v1412_v5 = vmul.f32 %v2184_v39, %v1404_v29 }
 0x290   :  { %v2196_v1 = vpop.eup %2195  ;;  %v1401_v44 = vmul.f32 %v2194_v24, %v1385_v40  ;;  %v1407_v42 = vsub.f32 2.0, %v1399_v62  ;;  %v1413_v20 = vmul.f32 %v2186_v32, %v1405_v37 }
 0x291   :  { %v2198_v49 = vpop.eup %2197  ;;  %v1402_v4 = vmul.f32 %v2196_v1, %v1386_v47  ;;  %v1408_v18 = vsub.f32 2.0, %v1400_v23  ;;  %v1414_v61 = vmul.f32 %v2188_v57, %v1406_v43  ;;  %v1320_v57 = vadd.f32 %v1319_v11, %v1318_v25 }
 0x292   :  { %v1403_v33 = vmul.f32 %v2198_v49, %v1387_v55  ;;  %v1409_v26 = vsub.f32 2.0, %v1401_v44  ;;  %v1415_v50 = vmul.f32 %v2190_v52, %v1407_v42  ;;  %v1428_v3 = vrot.slane %v1413_v20, 7 }
 0x293   :  { %v1410_v34 = vsub.f32 2.0, %v1402_v4  ;;  %v1416_v36 = vmul.f32 %v2192_v10, %v1408_v18  ;;  %v1430_v45 = vrot.slane %v1414_v61, 6 }
 0x294   :  { %v1411_v46 = vsub.f32 2.0, %v1403_v33  ;;  %v1417_v17 = vmul.f32 %v2194_v24, %v1409_v26  ;;  %v1429_v0 = vsel %vm297_vm8, %v1428_v3, %v1412_v5  ;;  %v1432_v56 = vrot.slane %v1415_v50, 5 }
 0x295   :  { %v1418_v53 = vmul.f32 %v2196_v1, %v1410_v34  ;;  %v1431_v40 = vsel %vm300_vm9, %v1430_v45, %v1429_v0  ;;  %v1434_v47 = vrot.slane %v1416_v36, 4 }
 0x296   :  { %v1419_v39 = vmul.f32 %v2198_v49, %v1411_v46  ;;  %v1433_v55 = vsel %vm303_vm10, %v1432_v56, %v1431_v40  ;;  %v1436_v32 = vrot.slane %v1417_v17, 3 }
 0x297   :  { %v1435_v51 = vsel %vm306_vm11, %v1434_v47, %v1433_v55  ;;  %v1438_v2 = vrot.slane %v1418_v53, 2 }
 0x298   :  { %v1437_v52 = vsel %vm309_vm12, %v1436_v32, %v1435_v51  ;;  %v1440_v12 = vrot.slane %v1419_v39, 1 }
 0x299   :  { %v1439_v29 = vsel %vm312_vm13, %v1438_v2, %v1437_v52 }
 0x29a   :  { %v1441_v10 = vsel %vm315_vm14, %v1440_v12, %v1439_v29 }
 0x29b   :  { %v1443_v62 = vmul.f32 %v1441_v10, %v1317_v63  ;;  %v1444_v37 = vmul.f32 %v1441_v10, %v1320_v57 }
 0x29d   :  { %v1445_v24 = vmul.f32 %v1443_v62, %v1317_v63  ;;  %v1446_v23 = vmul.f32 %v1444_v37, %v1320_v57  ;;  %v1449_v43 = vmul.f32 %v1443_v62, %v1320_v57  ;;  %v1450_v1 = vmul.f32 %v1444_v37, %v1317_v63  ;;  %1675 = vst [vmem:[#allocation10 + $0x80] sm:$0xff] %v1443_v62 }
 0x29e   :  { %1677 = vst [vmem:[#allocation10 + $0xb0] sm:$0xff] %v1444_v37  ;;  %v1463_v4 = vmul.f32 %v3088_v19, %v1443_v62  ;;  %v1464_v61 = vmul.f32 %v3092_v31, %v1444_v37  ;;  %v1466_v33 = vmul.f32 %v3088_v19, %v1444_v37  ;;  %v1467_v26 = vmul.f32 %v3092_v31, %v1443_v62 }
 0x29f   :  { %v1447_v54 = vadd.f32 %v1446_v23, %v1445_v24  ;;  %v1451_v11 = vsub.f32 %v1449_v43, %v1450_v1  ;;  %v1475_v52 = vmul.f32 %v1443_v62, %v1443_v62  ;;  %v1476_v12 = vmul.f32 %v1444_v37, %v1444_v37 }
 0x2a0   :  { %v1465_v34 = vadd.f32 %v1464_v61, %v1463_v4  ;;  %v1468_v36 = vsub.f32 %v1466_v33, %v1467_v26 }
 0x2a1   :  { %v1448_v44 = vsub.f32 1.0, %v1447_v54  ;;  %v1452_v42 = vsub.f32 0.0, %v1451_v11  ;;  %v1477_v43 = vadd.f32 %v1476_v12, %v1475_v52 }
 0x2a3   :  { %v1453_v5 = vmul.f32 %v1448_v44, %v1448_v44  ;;  %v1454_v20 = vmul.f32 %v1452_v42, %v1452_v42  ;;  %v1461_v3 = vsub.f32 0.0, %v1452_v42 }
 0x2a5   :  { %v1455_v49 = vadd.f32 %v1454_v20, %v1453_v5 }
 0x2a7   :  { %2199 = vrcp.f32 %v1455_v49 }
 0x2ad   :  { %v2200_v8 = vpop.eup %2199 }
 0x2ae   :  { %v1457_v18 = vmul.f32 %v2200_v8, %v1455_v49 }
 0x2b0   :  { %v1458_v50 = vsub.f32 2.0, %v1457_v18 }
 0x2b2   :  { %v1459_v25 = vmul.f32 %v2200_v8, %v1458_v50 }
 0x2b4   :  { %v1460_v45 = vmul.f32 %v1459_v25, %v1448_v44  ;;  %v1462_v46 = vmul.f32 %v1461_v3, %v1459_v25  ;;  %2201 = vrsqrt.f32 %v1459_v25  ;;  %vm1485_vm2 = vcmp.eq.f32.partialorder %v1459_v25, inf }
 0x2b5   :  { %v1488_v23 = vand.u32 2147483648, %v1459_v25  ;;  %vm1487_vm3 = vcmp.eq.f32.partialorder %v1459_v25, 0.0 }
 0x2b6   :  { %v1469_v17 = vmul.f32 %v1465_v34, %v1460_v45  ;;  %v1470_v0 = vmul.f32 %v1468_v36, %v1462_v46  ;;  %v1472_v56 = vmul.f32 %v1465_v34, %v1462_v46  ;;  %v1473_v53 = vmul.f32 %v1468_v36, %v1460_v45  ;;  %1679 = vst [vmem:[#allocation10 + $0xe0] sm:$0xff] %v1460_v45  ;;  %v3124_v36 = vld [vmem:[#allocation7 + $0x8] sm:$0xff]  ;;  %v3127_v45 = vld [vmem:[#allocation7 + $0x10] sm:$0xff] }
 0x2b7   :  { %1681 = vst [vmem:[#allocation10 + $0x110] sm:$0xff] %v1462_v46 }
 0x2b8   :  { %v3111_v40 = vsub.f32 %v1469_v17, %v1470_v0  ;;  %v3113_v47 = vadd.f32 %v1473_v53, %v1472_v56  ;;  %v3130_v53 = vld [vmem:[#allocation7 + $0x18] sm:$0xff] }
 0x2ba   :  { %v2202_v39 = vpop.eup %2201  ;;  %v1531_v55 = vmul.f32 %v3111_v40, %v3111_v40  ;;  %v1532_v32 = vmul.f32 %v3113_v47, %v3113_v47 }
 0x2bb   :  { %v1479_v63 = vmul.f32 %v2202_v39, %v1459_v25 }
 0x2bc   :  { %v3119_v57 = vadd.f32 %v1532_v32, %v1531_v55 }
 0x2bd   :  { %v1480_v51 = vmul.f32 %v2202_v39, %v1479_v63 }
 0x2be   :  { %2203 = vrsqrt.f32 %v3119_v57  ;;  %vm1541_vm4 = vcmp.eq.f32.partialorder %v3119_v57, inf  ;;  %vm1543_vm5 = vcmp.eq.f32.partialorder %v3119_v57, 0.0 }
 0x2bf   :  { %v1481_v2 = vmul.f32 0.5, %v1480_v51  ;;  %v3133_v51 = vld [vmem:[#allocation7 + $0x20] sm:$0xff] }
 0x2c1   :  { %v1482_v29 = vsub.f32 1.5, %v1481_v2 }
 0x2c3   :  { %v1483_v10 = vmul.f32 %v2202_v39, %v1482_v29 }
 0x2c4   :  { %v2204_v24 = vpop.eup %2203 }
 0x2c5   :  { %v1484_v1 = vmul.f32 %v1483_v10, %v1459_v25  ;;  %v1535_v54 = vmul.f32 %v2204_v24, %v3119_v57  ;;  %v3138_v10 = vld [vmem:[#allocation7 + $0x28] sm:$0xff] }
 0x2c7   :  { %v1486_v11 = vsel %vm1485_vm2, %v1459_v25, %v1484_v1  ;;  %v1536_v44 = vmul.f32 %v2204_v24, %v1535_v54  ;;  %v1544_v1 = vand.u32 2147483648, %v3119_v57  ;;  %v3142_v54 = vld [vmem:[#allocation7 + $0x30] sm:$0xff] }
 0x2c8   :  { %v1489_v42 = vsel %vm1487_vm3, %v1488_v23, %v1486_v11 }
 0x2c9   :  { %v1490_v5 = vmul.f32 %v1489_v42, %v1477_v43  ;;  %v1537_v20 = vmul.f32 0.5, %v1536_v44  ;;  %v3147_v42 = vld [vmem:[#allocation7 + $0x38] sm:$0xff] }
 0x2cb   :  { %v1492_v49 = vrot.slane %v1490_v5, 1  ;;  %v1493_v8 = vrot.slane %v1490_v5, 2  ;;  %v1499_v4 = vperm.slane %v1490_v5, 0  ;;  %v1494_v62 = vrot.slane %v1490_v5, 3 }
 0x2cc   :  { %v1495_v37 = vrot.slane %v1490_v5, 4  ;;  %v1496_v18 = vrot.slane %v1490_v5, 5  ;;  %v1497_v3 = vrot.slane %v1490_v5, 6  ;;  %v1538_v17 = vsub.f32 1.5, %v1537_v20 }
 0x2cd   :  { %v1500_v61 = vperm.slane %v1492_v49, 0  ;;  %v1501_v33 = vperm.slane %v1493_v8, 0  ;;  %v1502_v26 = vperm.slane %v1494_v62, 0  ;;  %v1515_v50 = vmul.f32 %v3067_v38, %v1499_v4  ;;  %v3538_v62 = vld [vmem:[#allocation15_spill] sm:$0xff] }
 0x2ce   :  { %v1503_v34 = vperm.slane %v1495_v37, 0  ;;  %v1498_v0 = vrot.slane %v1490_v5, 7  ;;  %v1504_v56 = vperm.slane %v1496_v18, 0  ;;  %v1539_v32 = vmul.f32 %v2204_v24, %v1538_v17 }
 0x2cf   :  { %v1516_v25 = vmul.f32 %v3124_v36, %v1500_v61  ;;  %v1517_v46 = vmul.f32 %v3127_v45, %v1501_v33  ;;  %v1518_v39 = vmul.f32 %v3130_v53, %v1502_v26  ;;  %v1505_v63 = vperm.slane %v1497_v3, 0 }
 0x2d0   :  { %v1519_v2 = vmul.f32 %v3133_v51, %v1503_v34  ;;  %v1540_v12 = vmul.f32 %v1539_v32, %v3119_v57  ;;  %v1506_v29 = vperm.slane %v1498_v0, 0  ;;  %v1520_v23 = vmul.f32 %v3138_v10, %v1504_v56  ;;  %v3541_v0 = vld [vmem:[#allocation24_spill] sm:$0xff] }
 0x2d1   :  { %v1523_v55 = vadd.f32 %v1516_v25, %v1515_v50  ;;  %v1521_v24 = vmul.f32 %v3142_v54, %v1505_v63  ;;  %v3539_v25 = vld [vmem:[#allocation22_spill] sm:$0xff]  ;;  %v1583_v56 = vmul.f32 %v3111_v40, %v3541_v0  ;;  %v3542_v63 = vld [vmem:[#allocation25_spill] sm:$0xff] }
 0x2d2   :  { %v1542_v44 = vsel %vm1541_vm4, %v3119_v57, %v1540_v12  ;;  %v1522_v5 = vmul.f32 %v3147_v42, %v1506_v29  ;;  %v1559_v57 = vmul.f32 %v3111_v40, %v3539_v25  ;;  %v1568_v32 = vmul.f32 %v3113_v47, %v3539_v25  ;;  %v3543_v29 = vld [vmem:[#allocation31_spill] sm:$0xff]  ;;  %v3552_v25 = vld [vmem:[#allocation32_spill] sm:$0xff] }
 0x2d3   :  { %v1524_v52 = vadd.f32 %v1523_v55, %v1517_v46  ;;  %v1545_v49 = vsel %vm1543_vm5, %v1544_v1, %v1542_v44  ;;  %v3540_v46 = vld [vmem:[#allocation23_spill] sm:$0xff]  ;;  %v1592_v12 = vmul.f32 %v3113_v47, %v3541_v0 }
 0x2d4   :  { %v1546_v37 = vmul.f32 %v1545_v49, %v3538_v62  ;;  %v1566_v17 = vmul.f32 %v3111_v40, %v3540_v46  ;;  %v1561_v55 = vmul.f32 %v3113_v47, %v3540_v46 }
 0x2d5   :  { %v1525_v43 = vadd.f32 %v1524_v52, %v1518_v39  ;;  %v1585_v52 = vmul.f32 %v3113_v47, %v3542_v63 }
 0x2d7   :  { %v1526_v11 = vadd.f32 %v1525_v43, %v1519_v2  ;;  %v1590_v2 = vmul.f32 %v3111_v40, %v3542_v63  ;;  %v3544_v43 = vld [vmem:[#allocation33_spill] sm:$0xff] }
 0x2d8   :  { %v1614_v1 = vmul.f32 %v3111_v40, %v3544_v43  ;;  %v1609_v44 = vmul.f32 %v3113_v47, %v3544_v43 }
 0x2d9   :  { %v1527_v20 = vadd.f32 %v1526_v11, %v1520_v23  ;;  %v1607_v23 = vmul.f32 %v3111_v40, %v3543_v29 }
 0x2db   :  { %v1528_v8 = vadd.f32 %v1527_v20, %v1521_v24  ;;  %v3545_v20 = vld [vmem:[#allocation34_spill] sm:$0xff] }
 0x2dc   :  { %v1631_v49 = vmul.f32 %v3111_v40, %v3545_v20 }
 0x2dd   :  { %v1529_v4 = vadd.f32 %v1528_v8, %v1522_v5  ;;  %v1616_v5 = vmul.f32 %v3113_v47, %v3543_v29  ;;  %v3546_v8 = vld [vmem:[#allocation35_spill] sm:$0xff]  ;;  %v3550_v29 = vld [vmem:[#allocation29_spill] sm:$0xff] }
 0x2df   :  { %v1530_v18 = vand.u32 2147483647, %v1529_v4  ;;  %v3181_v4 = vmul.f32 %v3113_v47, %v3546_v8 }
 0x2e1   :  { %v1547_v61 = vsub.f32 %v1546_v37, %v1530_v18  ;;  %v1638_v37 = vmul.f32 %v3111_v40, %v3546_v8 }
 0x2e3   :  { %v1548_v33 = vmax.f32 %v1547_v61, 0.0  ;;  %v3547_v61 = vld [vmem:[#allocation26_spill] sm:$0xff] }
 0x2e5   :  { %v1549_v26 = vadd.f32 %v1548_v33, %v1530_v18  ;;  %v3187_v18 = vmul.f32 %v3113_v47, %v3545_v20 }
 0x2e7   :  { %2205 = vrcp.f32 %v1549_v26 }
 0x2ed   :  { %v2206_v50 = vpop.eup %2205 }
 0x2ee   :  { %v1551_v3 = vmul.f32 %v2206_v50, %v1549_v26  ;;  %v3548_v26 = vld [vmem:[#allocation27_spill] sm:$0xff] }
 0x2f0   :  { %v1552_v34 = vsub.f32 2.0, %v1551_v3 }
 0x2f2   :  { %v1553_v39 = vmul.f32 %v2206_v50, %v1552_v34 }
 0x2f4   :  { %v1554_v24 = vmul.f32 %v1553_v39, %v3111_v40  ;;  %v1555_v11 = vmul.f32 %v1553_v39, %v3113_v47  ;;  %v3549_v39 = vld [vmem:[#allocation28_spill] sm:$0xff]  ;;  %v3551_v47 = vld [vmem:[#allocation30_spill] sm:$0xff] }
 0x2f6   :  { %v1556_v33 = vmul.f32 %v1554_v24, %v3547_v61  ;;  %v1557_v50 = vmul.f32 %v1555_v11, %v3548_v26  ;;  %v1563_v3 = vmul.f32 %v1554_v24, %v3548_v26  ;;  %v1564_v34 = vmul.f32 %v1555_v11, %v3547_v61 }
 0x2f7   :  { %v1580_v43 = vmul.f32 %v1554_v24, %v3549_v39  ;;  %v1581_v63 = vmul.f32 %v1555_v11, %v3550_v29  ;;  %v1587_v0 = vmul.f32 %v1554_v24, %v3550_v29  ;;  %v1588_v40 = vmul.f32 %v1555_v11, %v3549_v39 }
 0x2f8   :  { %v1558_v8 = vsub.f32 %v1556_v33, %v1557_v50  ;;  %v1565_v46 = vadd.f32 %v1564_v34, %v1563_v3  ;;  %v1604_v20 = vmul.f32 %v1554_v24, %v3551_v47  ;;  %v1605_v62 = vmul.f32 %v1555_v11, %v3552_v25 }
 0x2f9   :  { %v1582_v31 = vsub.f32 %v1580_v43, %v1581_v63  ;;  %v1589_v19 = vadd.f32 %v1588_v40, %v1587_v0  ;;  %v1611_v26 = vmul.f32 %v1554_v24, %v3552_v25  ;;  %v1612_v61 = vmul.f32 %v1555_v11, %v3551_v47 }
 0x2fa   :  { %v1560_v30 = vadd.f32 %v1559_v57, %v1558_v8  ;;  %v1567_v48 = vadd.f32 %v1566_v17, %v1565_v46  ;;  %v1606_v58 = vsub.f32 %v1604_v20, %v1605_v62  ;;  %v1628_v59 = vmul.f32 %v1554_v24, %v2652_v7 }
 0x2fb   :  { %v1584_v29 = vadd.f32 %v1583_v56, %v1582_v31  ;;  %v1591_v28 = vadd.f32 %v1590_v2, %v1589_v19  ;;  %v1613_v39 = vadd.f32 %v1612_v61, %v1611_v26  ;;  %v1629_v33 = vmul.f32 %v1555_v11, %v2655_v6 }
 0x2fc   :  { %v1562_v50 = vsub.f32 %v1560_v30, %v1561_v55  ;;  %v1569_v3 = vadd.f32 %v1568_v32, %v1567_v48  ;;  %v1608_v34 = vadd.f32 %v1607_v23, %v1606_v58  ;;  %v1635_v63 = vmul.f32 %v1554_v24, %v2655_v6 }
 0x2fd   :  { %v1586_v0 = vsub.f32 %v1584_v29, %v1585_v52  ;;  %v1593_v43 = vadd.f32 %v1592_v12, %v1591_v28  ;;  %v1615_v40 = vadd.f32 %v1614_v1, %v1613_v39  ;;  %v1630_v25 = vsub.f32 %v1628_v59, %v1629_v33 }
 0x2fe   :  { %v1570_v47 = vmax.f32 %v1562_v50, 0.0  ;;  %v1571_v57 = vmax.f32 %v1569_v3, 0.0  ;;  %v1610_v46 = vsub.f32 %v1608_v34, %v1609_v44  ;;  %v1636_v62 = vmul.f32 %v1555_v11, %v2652_v7 }
 0x2ff   :  { %v1594_v17 = vmax.f32 %v1586_v0, 0.0  ;;  %v1595_v31 = vmax.f32 %v1593_v43, 0.0  ;;  %v1617_v19 = vadd.f32 %v1616_v5, %v1615_v40  ;;  %v1632_v56 = vadd.f32 %v1631_v49, %v1630_v25 }
 0x300   :  { %v1572_v2 = vmul.f32 %v1570_v47, %v2665_v13  ;;  %v1573_v48 = vmul.f32 %v1571_v57, %v2668_v14  ;;  %v1576_v58 = vmul.f32 %v1570_v47, %v2668_v14  ;;  %v1577_v30 = vmul.f32 %v1571_v57, %v2665_v13 }
 0x301   :  { %v1596_v28 = vmul.f32 %v1594_v17, %v2671_v16  ;;  %v1597_v59 = vmul.f32 %v1595_v31, %v2678_v27  ;;  %v1600_v55 = vmul.f32 %v1594_v17, %v2678_v27  ;;  %v1601_v32 = vmul.f32 %v1595_v31, %v2671_v16 }
 0x302   :  { %v1574_v52 = vsub.f32 %v1572_v2, %v1573_v48  ;;  %v1578_v12 = vadd.f32 %v1577_v30, %v1576_v58  ;;  %v1618_v29 = vmax.f32 %v1610_v46, 0.0  ;;  %v1619_v25 = vmax.f32 %v1617_v19, 0.0 }
 0x303   :  { %v1598_v23 = vsub.f32 %v1596_v28, %v1597_v59  ;;  %v1602_v1 = vadd.f32 %v1601_v32, %v1600_v55  ;;  %v1634_v24 = vsub.f32 %v1632_v56, %v3181_v4  ;;  %v1637_v11 = vadd.f32 %v1636_v62, %v1635_v63 }
 0x304   :  { %v1620_v44 = vmul.f32 %v1618_v29, %v2685_v15  ;;  %v1621_v5 = vmul.f32 %v1619_v25, %v2688_v22  ;;  %v1624_v20 = vmul.f32 %v1618_v29, %v2688_v22  ;;  %v1625_v49 = vmul.f32 %v1619_v25, %v2685_v15 }
 0x305   :  { %v1639_v8 = vadd.f32 %v1638_v37, %v1637_v11  ;;  %v1642_v61 = vmax.f32 %v1634_v24, 0.0  ;;  %v1599_v26 = vadd.f32 %v1598_v23, %v1574_v52  ;;  %v1603_v39 = vadd.f32 %v1602_v1, %v1578_v12 }
 0x306   :  { %v1622_v47 = vsub.f32 %v1620_v44, %v1621_v5  ;;  %v1626_v33 = vadd.f32 %v1625_v49, %v1624_v20 }
 0x307   :  { %v1641_v50 = vadd.f32 %v3187_v18, %v1639_v8  ;;  %v1644_v4 = vmul.f32 %v1642_v61, %v2734_v60  ;;  %v1648_v34 = vmul.f32 %v1642_v61, %v2737_v9  ;;  %v3226_v18 = vld [vmem:[%s3375_s5] sm:$0xff]  ;;  %s2383_s5 = smov [#allocation10]  }
 0x308   :  { %v1623_v63 = vadd.f32 %v1622_v47, %v1599_v26  ;;  %v1627_v0 = vadd.f32 %v1626_v33, %v1603_v39  ;;  %s2053_s23 = sshll.u32 %s2383_s5, 4  ;;  %s2054_s23 = int_to_ptr.vmem [resolvable:$true] %s2053_s23 }
 0x309   :  { %v1643_v3 = vmax.f32 %v1641_v50, 0.0 }
 0x30b   :  { %v1645_v43 = vmul.f32 %v1643_v3, %v2737_v9  ;;  %v1649_v40 = vmul.f32 %v1643_v3, %v2734_v60 }
 0x30d   :  { %v1646_v57 = vsub.f32 %v1644_v4, %v1645_v43  ;;  %v1650_v37 = vadd.f32 %v1649_v40, %v1648_v34 }
 0x30f   :  { %v1647_v46 = vadd.f32 %v1646_v57, %v1623_v63  ;;  %v1651_v62 = vadd.f32 %v1650_v37, %v1627_v0 }
 0x311   :  { %v1652_v17 = vmul.f32 %v1647_v46, %v1647_v46  ;;  %v1653_v31 = vmul.f32 %v1651_v62, %v1651_v62 }
 0x313   :  { %v1654_v19 = vadd.f32 %v1653_v31, %v1652_v17 }
 0x315   :  { %v1655_v56 = vmax.f32 %v3226_v18, %v1654_v19 }
 0x317   :  { %2207 = vrsqrt.f32 %v1655_v56  ;;  %vm1662_vm6 = vweird.f32 %v1655_v56 }
 0x31d   :  { %v2208_v2 = vpop.eup %2207 }
 0x31e   :  { %v1657_v48 = vmul.f32 %v2208_v2, %v1655_v56  ;;  %vm1663_vm7 = vweird.f32 %v2208_v2 }
 0x31f   :  { %vm1664_vm15 = vmor %vm1662_vm6, %vm1663_vm7 }
 0x320   :  { %v1658_v58 = vmul.f32 %v2208_v2, %v1657_v48 }
 0x322   :  { %v1659_v30 = vmul.f32 0.5, %v1658_v58 }
 0x324   :  { %v1660_v28 = vsub.f32 1.5, %v1659_v30 }
 0x326   :  { %v1661_v59 = vmul.f32 %v2208_v2, %v1660_v28 }
 0x328   :  { %v1665_v55 = vsel %vm1664_vm15, %v2208_v2, %v1661_v59 }
 0x329   :  { %v1666_v32 = vmul.f32 %v1665_v55, %v2460_v21 }
 0x32b   :  { %v1667_v52 = vmin.f32 %v1666_v32, 1.0 }
 0x32d   :  { %v3230_v12 = vmul.f32 %v1667_v52, %v1647_v46  ;;  %v3232_v29 = vmul.f32 %v1667_v52, %v1651_v62 }
 0x32f   :  { %1671 = vst [vmem:[#allocation10 + $0x20] sm:$0xff] %v3230_v12  ;;  %v1688_v25 = vmul.f32 %v3230_v12, %v3230_v12  ;;  %v1689_v23 = vmul.f32 %v3232_v29, %v3232_v29 }
 0x330   :  { %1673 = vst [vmem:[#allocation10 + $0x50] sm:$0xff] %v3232_v29 }
 0x331   :  { %v1690_v1 = vadd.f32 %v1689_v23, %v1688_v25 }
 0x333   :  { %v1691_v24 = vmul.f32 %v3067_v38, %v1690_v1  ;;  %v1692_v11 = vmul.f32 %v3124_v36, %v1690_v1  ;;  %v1693_v44 = vmul.f32 %v3127_v45, %v1690_v1  ;;  %v1694_v5 = vmul.f32 %v3130_v53, %v1690_v1 }
 0x334   :  { %v1695_v20 = vmul.f32 %v3133_v51, %v1690_v1  ;;  %v1696_v49 = vmul.f32 %v3138_v10, %v1690_v1  ;;  %v1697_v8 = vmul.f32 %v3142_v54, %v1690_v1  ;;  %v1698_v61 = vmul.f32 %v3147_v42, %v1690_v1 }
 0x335   :  { %v1699_v26 = vrot.slane %v1691_v24, 4  ;;  %v1705_v39 = vrot.slane %v1692_v11, 4  ;;  %v1711_v47 = vrot.slane %v1693_v44, 4  ;;  %v1717_v33 = vrot.slane %v1694_v5, 4 }
 0x336   :  { %v1723_v50 = vrot.slane %v1695_v20, 4  ;;  %v1729_v38 = vrot.slane %v1696_v49, 4  ;;  %v1735_v3 = vrot.slane %v1697_v8, 4  ;;  %v1741_v4 = vrot.slane %v1698_v61, 4 }
 0x337   :  { %v1700_v34 = vadd.f32 %v1699_v26, %v1691_v24  ;;  %v1706_v63 = vadd.f32 %v1705_v39, %v1692_v11  ;;  %v1712_v0 = vadd.f32 %v1711_v47, %v1693_v44  ;;  %v1718_v43 = vadd.f32 %v1717_v33, %v1694_v5 }
 0x338   :  { %v1724_v40 = vadd.f32 %v1723_v50, %v1695_v20  ;;  %v1730_v57 = vadd.f32 %v1729_v38, %v1696_v49  ;;  %v1736_v37 = vadd.f32 %v1735_v3, %v1697_v8  ;;  %v1742_v46 = vadd.f32 %v1741_v4, %v1698_v61  ;;  %v2258_v3 = vld [vmem:[#allocation9] sm:$0xff] }
 0x339   :  { %v1701_v62 = vrot.slane %v1700_v34, 2  ;;  %v1707_v17 = vrot.slane %v1706_v63, 2  ;;  %v1713_v31 = vrot.slane %v1712_v0, 2  ;;  %v1719_v19 = vrot.slane %v1718_v43, 2 }
 0x33a   :  { %v1725_v56 = vrot.slane %v1724_v40, 2  ;;  %v1731_v2 = vrot.slane %v1730_v57, 2  ;;  %v1737_v48 = vrot.slane %v1736_v37, 2  ;;  %v1743_v58 = vrot.slane %v1742_v46, 2 }
 0x33b   :  { %v1702_v30 = vadd.f32 %v1701_v62, %v1700_v34  ;;  %v1708_v28 = vadd.f32 %v1707_v17, %v1706_v63  ;;  %v1714_v59 = vadd.f32 %v1713_v31, %v1712_v0  ;;  %v1720_v55 = vadd.f32 %v1719_v19, %v1718_v43  ;;  %v3553_v43 = vld [vmem:[#allocation17_spill] sm:$0xff]  ;;  %v3556_v17 = vld [vmem:[#allocation20_spill] sm:$0xff] }
 0x33c   :  { %v1726_v32 = vadd.f32 %v1725_v56, %v1724_v40  ;;  %v1732_v52 = vadd.f32 %v1731_v2, %v1730_v57  ;;  %v1738_v25 = vadd.f32 %v1737_v48, %v1736_v37  ;;  %v1744_v23 = vadd.f32 %v1743_v58, %v1742_v46  ;;  %v3554_v57 = vld [vmem:[#allocation18_spill] sm:$0xff]  ;;  %v3555_v46 = vld [vmem:[#allocation19_spill] sm:$0xff]  ;;  %v3557_v19 = vld [vmem:[#allocation21_spill] sm:$0xff] }
 0x33d   :  { %v1703_v1 = vrot.slane %v1702_v30, 1  ;;  %v1709_v24 = vrot.slane %v1708_v28, 1  ;;  %v1715_v11 = vrot.slane %v1714_v59, 1  ;;  %v1721_v44 = vrot.slane %v1720_v55, 1 }
 0x33e   :  { %v1727_v5 = vrot.slane %v1726_v32, 1  ;;  %v1733_v20 = vrot.slane %v1732_v52, 1  ;;  %v1739_v49 = vrot.slane %v1738_v25, 1  ;;  %v1745_v8 = vrot.slane %v1744_v23, 1 }
 0x33f   :  { %v1704_v61 = vadd.f32 %v1703_v1, %v1702_v30  ;;  %v1710_v26 = vadd.f32 %v1709_v24, %v1708_v28  ;;  %v1716_v39 = vadd.f32 %v1715_v11, %v1714_v59  ;;  %v1722_v47 = vadd.f32 %v1721_v44, %v1720_v55  ;;  %v3559_v24 = vld [vmem:[#allocation37_spill] sm:$0xff] }
 0x340   :  { %v1728_v33 = vadd.f32 %v1727_v5, %v1726_v32  ;;  %v1734_v50 = vadd.f32 %v1733_v20, %v1732_v52  ;;  %v1740_v38 = vadd.f32 %v1739_v49, %v1738_v25  ;;  %v1746_v0 = vadd.f32 %v1745_v8, %v1744_v23  ;;  %v3558_v23 = vld [vmem:[#allocation36_spill] sm:$0xff] }
 0x341   :  { %v1747_v4 = vadd.f32 %v2258_v3, %v1704_v61  ;;  %v1748_v34 = vadd.f32 %v1710_v26, %v2495_v41  ;;  %v1749_v63 = vadd.f32 %v1716_v39, %v3530_v35  ;;  %v1750_v40 = vadd.f32 %v1722_v47, %v3553_v43 }
 0x342   :  { %v1751_v37 = vadd.f32 %v1728_v33, %v3554_v57  ;;  %v1752_v62 = vadd.f32 %v1734_v50, %v3555_v46  ;;  %v1753_v31 = vadd.f32 %v1740_v38, %v3556_v17  ;;  %v1754_v56 = vadd.f32 %v1746_v0, %v3557_v19 }
 0x343   :  { %2209 = vrcp.f32 %v1747_v4  ;;  %v1682_v1 = vmul.f32 %v3558_v23, %v3230_v12  ;;  %v1686_v11 = vmul.f32 %v3559_v24, %v3230_v12  ;;  %v1683_v47 = vmul.f32 %v3559_v24, %v3232_v29 }
 0x344   :  { %2211 = vrcp.f32 %v1748_v34  ;;  %v1685_v12 = vmul.f32 %v3558_v23, %v3232_v29 }
 0x345   :  { %2213 = vrcp.f32 %v1749_v63 }
 0x346   :  { %2215 = vrcp.f32 %v1750_v40 }
 0x347   :  { %2217 = vrcp.f32 %v1751_v37 }
 0x348   :  { %2219 = vrcp.f32 %v1752_v62 }
 0x349   :  { %v2210_v41 = vpop.eup %2209  ;;  %2221 = vrcp.f32 %v1753_v31 }
 0x34a   :  { %v2212_v35 = vpop.eup %2211  ;;  %2223 = vrcp.f32 %v1754_v56  ;;  %v1763_v2 = vmul.f32 %v2210_v41, %v1747_v4 }
 0x34b   :  { %v2214_v48 = vpop.eup %2213  ;;  %v1764_v58 = vmul.f32 %v2212_v35, %v1748_v34 }
 0x34c   :  { %v2216_v30 = vpop.eup %2215  ;;  %v1765_v28 = vmul.f32 %v2214_v48, %v1749_v63  ;;  %v1771_v59 = vsub.f32 2.0, %v1763_v2  ;;  %v1684_v2 = vsub.f32 %v1682_v1, %v1683_v47 }
 0x34d   :  { %v2218_v55 = vpop.eup %2217  ;;  %v1766_v32 = vmul.f32 %v2216_v30, %v1750_v40  ;;  %v1772_v52 = vsub.f32 2.0, %v1764_v58 }
 0x34e   :  { %v2220_v25 = vpop.eup %2219  ;;  %v1767_v44 = vmul.f32 %v2218_v55, %v1751_v37  ;;  %v1773_v5 = vsub.f32 2.0, %v1765_v28  ;;  %v1779_v61 = vmul.f32 %v2210_v41, %v1771_v59 }
 0x34f   :  { %v2222_v20 = vpop.eup %2221  ;;  %v1768_v49 = vmul.f32 %v2220_v25, %v1752_v62  ;;  %v1774_v8 = vsub.f32 2.0, %v1766_v32  ;;  %v1780_v26 = vmul.f32 %v2212_v35, %v1772_v52 }
 0x350   :  { %v2224_v39 = vpop.eup %2223  ;;  %v1769_v33 = vmul.f32 %v2222_v20, %v1753_v31  ;;  %v1775_v50 = vsub.f32 2.0, %v1767_v44  ;;  %v1781_v38 = vmul.f32 %v2214_v48, %v1773_v5  ;;  %v1687_v48 = vadd.f32 %v1686_v11, %v1685_v12 }
 0x351   :  { %v1770_v3 = vmul.f32 %v2224_v39, %v1754_v56  ;;  %v1776_v4 = vsub.f32 2.0, %v1768_v49  ;;  %v1782_v34 = vmul.f32 %v2216_v30, %v1774_v8  ;;  %v1795_v63 = vrot.slane %v1780_v26, 7 }
 0x352   :  { %v1777_v0 = vsub.f32 2.0, %v1769_v33  ;;  %v1783_v43 = vmul.f32 %v2218_v55, %v1775_v50  ;;  %v1797_v40 = vrot.slane %v1781_v38, 6 }
 0x353   :  { %v1778_v57 = vsub.f32 2.0, %v1770_v3  ;;  %v1784_v37 = vmul.f32 %v2220_v25, %v1776_v4  ;;  %v1796_v46 = vsel %vm297_vm8, %v1795_v63, %v1779_v61  ;;  %v1799_v62 = vrot.slane %v1782_v34, 5 }
 0x354   :  { %v1785_v17 = vmul.f32 %v2222_v20, %v1777_v0  ;;  %v1798_v31 = vsel %vm300_vm9, %v1797_v40, %v1796_v46  ;;  %v1801_v19 = vrot.slane %v1783_v43, 4 }
 0x355   :  { %v1786_v41 = vmul.f32 %v2224_v39, %v1778_v57  ;;  %v1800_v56 = vsel %vm303_vm10, %v1799_v62, %v1798_v31  ;;  %v1803_v35 = vrot.slane %v1784_v37, 3 }
 0x356   :  { %v1802_v29 = vsel %vm306_vm11, %v1801_v19, %v1800_v56  ;;  %v1805_v58 = vrot.slane %v1785_v17, 2 }
 0x357   :  { %v1804_v30 = vsel %vm309_vm12, %v1803_v35, %v1802_v29  ;;  %v1807_v28 = vrot.slane %v1786_v41, 1 }
 0x358   :  { %v1806_v59 = vsel %vm312_vm13, %v1805_v58, %v1804_v30 }
 0x359   :  { %v1808_v55 = vsel %vm315_vm14, %v1807_v28, %v1806_v59 }
 0x35a   :  { %v1810_v32 = vmul.f32 %v1808_v55, %v1684_v2  ;;  %v1811_v52 = vmul.f32 %v1808_v55, %v1687_v48 }
 0x35c   :  { %v1812_v25 = vmul.f32 %v1810_v32, %v1684_v2  ;;  %v1813_v44 = vmul.f32 %v1811_v52, %v1687_v48  ;;  %v1816_v5 = vmul.f32 %v1810_v32, %v1687_v48  ;;  %v1817_v20 = vmul.f32 %v1811_v52, %v1684_v2  ;;  %2042 = vst [vmem:[#allocation10 + $0x88] sm:$0xff] %v1810_v32 }
 0x35d   :  { %2044 = vst [vmem:[#allocation10 + $0xb8] sm:$0xff] %v1811_v52  ;;  %v1830_v33 = vmul.f32 %v3558_v23, %v1810_v32  ;;  %v1831_v38 = vmul.f32 %v3559_v24, %v1811_v52  ;;  %v1833_v3 = vmul.f32 %v3558_v23, %v1811_v52  ;;  %v1834_v4 = vmul.f32 %v3559_v24, %v1810_v32 }
 0x35e   :  { %v1814_v1 = vadd.f32 %v1813_v44, %v1812_v25  ;;  %v1818_v11 = vsub.f32 %v1816_v5, %v1817_v20  ;;  %v1842_v29 = vmul.f32 %v1810_v32, %v1810_v32  ;;  %v1843_v58 = vmul.f32 %v1811_v52, %v1811_v52 }
 0x35f   :  { %v1832_v0 = vadd.f32 %v1831_v38, %v1830_v33  ;;  %v1835_v43 = vsub.f32 %v1833_v3, %v1834_v4  ;;  %v2259_v3 = vld [vmem:[#allocation7] sm:$0xff] }
 0x360   :  { %v1815_v49 = vsub.f32 1.0, %v1814_v1  ;;  %v1819_v8 = vsub.f32 0.0, %v1818_v11  ;;  %v1844_v25 = vadd.f32 %v1843_v58, %v1842_v29 }
 0x362   :  { %v1820_v61 = vmul.f32 %v1815_v49, %v1815_v49  ;;  %v1821_v26 = vmul.f32 %v1819_v8, %v1819_v8  ;;  %v1828_v63 = vsub.f32 0.0, %v1819_v8 }
 0x364   :  { %v1822_v39 = vadd.f32 %v1821_v26, %v1820_v61 }
 0x366   :  { %2225 = vrcp.f32 %v1822_v39 }
 0x36c   :  { %v2226_v47 = vpop.eup %2225 }
 0x36d   :  { %v1824_v50 = vmul.f32 %v2226_v47, %v1822_v39 }
 0x36f   :  { %v1825_v34 = vsub.f32 2.0, %v1824_v50 }
 0x371   :  { %v1826_v12 = vmul.f32 %v2226_v47, %v1825_v34 }
 0x373   :  { %v1827_v40 = vmul.f32 %v1826_v12, %v1815_v49  ;;  %v1829_v57 = vmul.f32 %v1828_v63, %v1826_v12  ;;  %2227 = vrsqrt.f32 %v1826_v12  ;;  %vm1852_vm8 = vcmp.eq.f32.partialorder %v1826_v12, inf }
 0x374   :  { %v1855_v55 = vand.u32 2147483648, %v1826_v12  ;;  %vm1854_vm9 = vcmp.eq.f32.partialorder %v1826_v12, 0.0 }
 0x375   :  { %v1836_v37 = vmul.f32 %v1832_v0, %v1827_v40  ;;  %v1837_v46 = vmul.f32 %v1835_v43, %v1829_v57  ;;  %v1839_v62 = vmul.f32 %v1832_v0, %v1829_v57  ;;  %v1840_v17 = vmul.f32 %v1835_v43, %v1827_v40  ;;  %2046 = vst [vmem:[#allocation10 + $0xe8] sm:$0xff] %v1827_v40 }
 0x376   :  { %2048 = vst [vmem:[#allocation10 + $0x118] sm:$0xff] %v1829_v57 }
 0x377   :  { %v3274_v31 = vsub.f32 %v1836_v37, %v1837_v46  ;;  %v3276_v19 = vadd.f32 %v1840_v17, %v1839_v62 }
 0x379   :  { %v2228_v23 = vpop.eup %2227  ;;  %v1898_v24 = vmul.f32 %v3274_v31, %v3274_v31  ;;  %v1899_v41 = vmul.f32 %v3276_v19, %v3276_v19 }
 0x37a   :  { %v1846_v56 = vmul.f32 %v2228_v23, %v1826_v12 }
 0x37b   :  { %v1900_v35 = vadd.f32 %v1899_v41, %v1898_v24 }
 0x37c   :  { %v1847_v2 = vmul.f32 %v2228_v23, %v1846_v56 }
 0x37d   :  { %2229 = vrsqrt.f32 %v1900_v35  ;;  %vm1908_vm10 = vcmp.eq.f32.partialorder %v1900_v35, inf  ;;  %vm1910_vm11 = vcmp.eq.f32.partialorder %v1900_v35, 0.0 }
 0x37e   :  { %v1848_v48 = vmul.f32 0.5, %v1847_v2 }
 0x380   :  { %v1849_v30 = vsub.f32 1.5, %v1848_v48 }
 0x382   :  { %v1850_v28 = vmul.f32 %v2228_v23, %v1849_v30 }
 0x383   :  { %v2230_v59 = vpop.eup %2229 }
 0x384   :  { %v1851_v44 = vmul.f32 %v1850_v28, %v1826_v12  ;;  %v1902_v5 = vmul.f32 %v2230_v59, %v1900_v35 }
 0x386   :  { %v1853_v20 = vsel %vm1852_vm8, %v1826_v12, %v1851_v44  ;;  %v1903_v11 = vmul.f32 %v2230_v59, %v1902_v5 }
 0x387   :  { %v1856_v1 = vsel %vm1854_vm9, %v1855_v55, %v1853_v20 }
 0x388   :  { %v1857_v49 = vmul.f32 %v1856_v1, %v1844_v25  ;;  %v1904_v32 = vmul.f32 0.5, %v1903_v11 }
 0x38a   :  { %v1859_v8 = vrot.slane %v1857_v49, 1  ;;  %v1860_v61 = vrot.slane %v1857_v49, 2  ;;  %v1861_v26 = vrot.slane %v1857_v49, 3  ;;  %v1862_v39 = vrot.slane %v1857_v49, 4 }
 0x38b   :  { %v1866_v47 = vperm.slane %v1857_v49, 0  ;;  %v1863_v52 = vrot.slane %v1857_v49, 5  ;;  %v1864_v34 = vrot.slane %v1857_v49, 6  ;;  %v1905_v43 = vsub.f32 1.5, %v1904_v32 }
 0x38c   :  { %v1867_v33 = vperm.slane %v1859_v8, 0  ;;  %v1868_v50 = vperm.slane %v1860_v61, 0  ;;  %v1869_v38 = vperm.slane %v1861_v26, 0  ;;  %v1870_v63 = vperm.slane %v1862_v39, 0  ;;  %v3563_v61 = vld [vmem:[#allocation24_spill] sm:$0xff] }
 0x38d   :  { %v1882_v4 = vmul.f32 %v2259_v3, %v1866_v47  ;;  %v1865_v40 = vrot.slane %v1857_v49, 7  ;;  %v1871_v57 = vperm.slane %v1863_v52, 0  ;;  %v1906_v62 = vmul.f32 %v2230_v59, %v1905_v43  ;;  %v3564_v52 = vld [vmem:[#allocation25_spill] sm:$0xff]  ;;  %v3565_v3 = vld [vmem:[#allocation31_spill] sm:$0xff] }
 0x38e   :  { %v1883_v0 = vmul.f32 %v3124_v36, %v1867_v33  ;;  %v1884_v12 = vmul.f32 %v3127_v45, %v1868_v50  ;;  %v1885_v37 = vmul.f32 %v3130_v53, %v1869_v38  ;;  %v1872_v17 = vperm.slane %v1864_v34, 0  ;;  %v3566_v34 = vld [vmem:[#allocation33_spill] sm:$0xff] }
 0x38f   :  { %v1886_v23 = vmul.f32 %v3133_v51, %v1870_v63  ;;  %v1907_v41 = vmul.f32 %v1906_v62, %v1900_v35  ;;  %v1873_v56 = vperm.slane %v1865_v40, 0  ;;  %v1887_v2 = vmul.f32 %v3138_v10, %v1871_v57  ;;  %v3560_v51 = vld [vmem:[#allocation15_spill] sm:$0xff]  ;;  %v3567_v57 = vld [vmem:[#allocation34_spill] sm:$0xff] }
 0x390   :  { %v1890_v46 = vadd.f32 %v1883_v0, %v1882_v4  ;;  %v1911_v36 = vand.u32 2147483648, %v1900_v35  ;;  %v1888_v45 = vmul.f32 %v3142_v54, %v1872_v17  ;;  %v3561_v54 = vld [vmem:[#allocation22_spill] sm:$0xff]  ;;  %v1950_v26 = vmul.f32 %v3274_v31, %v3563_v61 }
 0x391   :  { %v1909_v58 = vsel %vm1908_vm10, %v1900_v35, %v1907_v41  ;;  %v1889_v53 = vmul.f32 %v3147_v42, %v1873_v56  ;;  %v1926_v8 = vmul.f32 %v3274_v31, %v3561_v54  ;;  %v3562_v35 = vld [vmem:[#allocation23_spill] sm:$0xff]  ;;  %v1935_v32 = vmul.f32 %v3276_v19, %v3561_v54 }
 0x392   :  { %v1891_v24 = vadd.f32 %v1890_v46, %v1884_v12  ;;  %v1912_v28 = vsel %vm1910_vm11, %v1911_v36, %v1909_v58  ;;  %v1933_v42 = vmul.f32 %v3274_v31, %v3562_v35  ;;  %v1928_v47 = vmul.f32 %v3276_v19, %v3562_v35  ;;  %v3568_v46 = vld [vmem:[#allocation35_spill] sm:$0xff]  ;;  %v3572_v58 = vld [vmem:[#allocation29_spill] sm:$0xff] }
 0x393   :  { %v1913_v25 = vmul.f32 %v1912_v28, %v3560_v51  ;;  %v1957_v33 = vmul.f32 %v3274_v31, %v3564_v52  ;;  %v1952_v50 = vmul.f32 %v3276_v19, %v3564_v52  ;;  %v1959_v38 = vmul.f32 %v3276_v19, %v3563_v61  ;;  %v3570_v56 = vld [vmem:[#allocation27_spill] sm:$0xff]  ;;  %v3574_v51 = vld [vmem:[#allocation32_spill] sm:$0xff] }
 0x394   :  { %v1892_v48 = vadd.f32 %v1891_v24, %v1885_v37  ;;  %v1974_v4 = vmul.f32 %v3274_v31, %v3565_v3  ;;  %v1981_v63 = vmul.f32 %v3274_v31, %v3566_v34  ;;  %v1976_v43 = vmul.f32 %v3276_v19, %v3566_v34  ;;  %v3569_v24 = vld [vmem:[#allocation26_spill] sm:$0xff] }
 0x395   :  { %v1983_v40 = vmul.f32 %v3276_v19, %v3565_v3  ;;  %v1998_v37 = vmul.f32 %v3274_v31, %v3567_v57  ;;  %v3320_v62 = vmul.f32 %v3276_v19, %v3568_v46  ;;  %v2005_v17 = vmul.f32 %v3274_v31, %v3568_v46 }
 0x396   :  { %v1893_v29 = vadd.f32 %v1892_v48, %v1886_v23  ;;  %v3326_v23 = vmul.f32 %v3276_v19, %v3567_v57 }
 0x398   :  { %v1894_v30 = vadd.f32 %v1893_v29, %v1887_v2 }
 0x39a   :  { %v1895_v59 = vadd.f32 %v1894_v30, %v1888_v45  ;;  %v3571_v45 = vld [vmem:[#allocation28_spill] sm:$0xff] }
 0x39c   :  { %v1896_v55 = vadd.f32 %v1895_v59, %v1889_v53 }
 0x39e   :  { %v1897_v44 = vand.u32 2147483647, %v1896_v55 }
 0x3a0   :  { %v1914_v5 = vsub.f32 %v1913_v25, %v1897_v44 }
 0x3a2   :  { %v1915_v20 = vmax.f32 %v1914_v5, 0.0 }
 0x3a4   :  { %v1916_v1 = vadd.f32 %v1915_v20, %v1897_v44 }
 0x3a6   :  { %2231 = vrcp.f32 %v1916_v1 }
 0x3ac   :  { %v2232_v10 = vpop.eup %2231 }
 0x3ad   :  { %v1918_v11 = vmul.f32 %v2232_v10, %v1916_v1 }
 0x3af   :  { %v1919_v49 = vsub.f32 2.0, %v1918_v11 }
 0x3b1   :  { %v1920_v39 = vmul.f32 %v2232_v10, %v1919_v49 }
 0x3b3   :  { %v1921_v0 = vmul.f32 %v1920_v39, %v3274_v31  ;;  %v1922_v12 = vmul.f32 %v1920_v39, %v3276_v19  ;;  %v3573_v19 = vld [vmem:[#allocation30_spill] sm:$0xff] }
 0x3b5   :  { %v1923_v41 = vmul.f32 %v1921_v0, %v3569_v24  ;;  %v1924_v2 = vmul.f32 %v1922_v12, %v3570_v56  ;;  %v1930_v48 = vmul.f32 %v1921_v0, %v3570_v56  ;;  %v1931_v36 = vmul.f32 %v1922_v12, %v3569_v24 }
 0x3b6   :  { %v1947_v29 = vmul.f32 %v1921_v0, %v3571_v45  ;;  %v1948_v53 = vmul.f32 %v1922_v12, %v3572_v58  ;;  %v1954_v30 = vmul.f32 %v1921_v0, %v3572_v58  ;;  %v1955_v31 = vmul.f32 %v1922_v12, %v3571_v45 }
 0x3b7   :  { %v1925_v28 = vsub.f32 %v1923_v41, %v1924_v2  ;;  %v1932_v59 = vadd.f32 %v1931_v36, %v1930_v48  ;;  %v1971_v55 = vmul.f32 %v1921_v0, %v3573_v19  ;;  %v1972_v25 = vmul.f32 %v1922_v12, %v3574_v51 }
 0x3b8   :  { %v1949_v44 = vsub.f32 %v1947_v29, %v1948_v53  ;;  %v1956_v5 = vadd.f32 %v1955_v31, %v1954_v30  ;;  %v1978_v20 = vmul.f32 %v1921_v0, %v3574_v51  ;;  %v1979_v1 = vmul.f32 %v1922_v12, %v3573_v19 }
 0x3b9   :  { %v1927_v10 = vadd.f32 %v1926_v8, %v1925_v28  ;;  %v1934_v11 = vadd.f32 %v1933_v42, %v1932_v59  ;;  %v1973_v49 = vsub.f32 %v1971_v55, %v1972_v25  ;;  %v1995_v54 = vmul.f32 %v1921_v0, %v2652_v7 }
 0x3ba   :  { %v1951_v35 = vadd.f32 %v1950_v26, %v1949_v44  ;;  %v1958_v61 = vadd.f32 %v1957_v33, %v1956_v5  ;;  %v1980_v39 = vadd.f32 %v1979_v1, %v1978_v20  ;;  %v1996_v52 = vmul.f32 %v1922_v12, %v2655_v6 }
 0x3bb   :  { %v1929_v3 = vsub.f32 %v1927_v10, %v1928_v47  ;;  %v1936_v34 = vadd.f32 %v1935_v32, %v1934_v11  ;;  %v1975_v57 = vadd.f32 %v1974_v4, %v1973_v49  ;;  %v2002_v46 = vmul.f32 %v1921_v0, %v2655_v6 }
 0x3bc   :  { %v1953_v24 = vsub.f32 %v1951_v35, %v1952_v50  ;;  %v1960_v41 = vadd.f32 %v1959_v38, %v1958_v61  ;;  %v1982_v56 = vadd.f32 %v1981_v63, %v1980_v39  ;;  %v1997_v2 = vsub.f32 %v1995_v54, %v1996_v52 }
 0x3bd   :  { %v1937_v48 = vmax.f32 %v1929_v3, 0.0  ;;  %v1938_v8 = vmax.f32 %v1936_v34, 0.0  ;;  %v1977_v42 = vsub.f32 %v1975_v57, %v1976_v43  ;;  %v2003_v36 = vmul.f32 %v1922_v12, %v2652_v7 }
 0x3be   :  { %v1961_v45 = vmax.f32 %v1953_v24, 0.0  ;;  %v1962_v26 = vmax.f32 %v1960_v41, 0.0  ;;  %v1984_v33 = vadd.f32 %v1983_v40, %v1982_v56  ;;  %v1999_v29 = vadd.f32 %v1998_v37, %v1997_v2 }
 0x3bf   :  { %v1939_v58 = vmul.f32 %v1937_v48, %v2665_v13  ;;  %v1940_v47 = vmul.f32 %v1938_v8, %v2668_v14  ;;  %v1943_v32 = vmul.f32 %v1937_v48, %v2668_v14  ;;  %v1944_v6 = vmul.f32 %v1938_v8, %v2665_v13 }
 0x3c0   :  { %v1963_v50 = vmul.f32 %v1961_v45, %v2671_v16  ;;  %v1964_v38 = vmul.f32 %v1962_v26, %v2678_v27  ;;  %v1967_v4 = vmul.f32 %v1961_v45, %v2678_v27  ;;  %v1968_v7 = vmul.f32 %v1962_v26, %v2671_v16 }
 0x3c1   :  { %v1941_v63 = vsub.f32 %v1939_v58, %v1940_v47  ;;  %v1945_v0 = vadd.f32 %v1944_v6, %v1943_v32  ;;  %v1985_v12 = vmax.f32 %v1977_v42, 0.0  ;;  %v1986_v43 = vmax.f32 %v1984_v33, 0.0 }
 0x3c2   :  { %v1965_v40 = vsub.f32 %v1963_v50, %v1964_v38  ;;  %v1969_v37 = vadd.f32 %v1968_v7, %v1967_v4  ;;  %v2001_v53 = vsub.f32 %v1999_v29, %v3320_v62  ;;  %v2004_v30 = vadd.f32 %v2003_v36, %v2002_v46 }
 0x3c3   :  { %v1987_v14 = vmul.f32 %v1985_v12, %v2685_v15  ;;  %v1988_v13 = vmul.f32 %v1986_v43, %v2688_v22  ;;  %v1991_v31 = vmul.f32 %v1985_v12, %v2688_v22  ;;  %v1992_v28 = vmul.f32 %v1986_v43, %v2685_v15 }
 0x3c4   :  { %v2006_v27 = vadd.f32 %v2005_v17, %v2004_v30  ;;  %v2009_v59 = vmax.f32 %v2001_v53, 0.0  ;;  %v1966_v16 = vadd.f32 %v1965_v40, %v1941_v63  ;;  %v1970_v19 = vadd.f32 %v1969_v37, %v1945_v0 }
 0x3c5   :  { %v1989_v55 = vsub.f32 %v1987_v14, %v1988_v13  ;;  %v1993_v51 = vadd.f32 %v1992_v28, %v1991_v31 }
 0x3c6   :  { %v2008_v25 = vadd.f32 %v3326_v23, %v2006_v27  ;;  %v2011_v62 = vmul.f32 %v2009_v59, %v2734_v60  ;;  %v2015_v5 = vmul.f32 %v2009_v59, %v2737_v9 }
 0x3c7   :  { %v1990_v20 = vadd.f32 %v1989_v55, %v1966_v16  ;;  %v1994_v1 = vadd.f32 %v1993_v51, %v1970_v19 }
 0x3c8   :  { %v2010_v44 = vmax.f32 %v2008_v25, 0.0 }
 0x3ca   :  { %v2012_v10 = vmul.f32 %v2010_v44, %v2737_v9  ;;  %v2016_v22 = vmul.f32 %v2010_v44, %v2734_v60 }
 0x3cc   :  { %v2013_v15 = vsub.f32 %v2011_v62, %v2012_v10  ;;  %v2017_v17 = vadd.f32 %v2016_v22, %v2015_v5 }
 0x3ce   :  { %v2014_v11 = vadd.f32 %v2013_v15, %v1990_v20  ;;  %v2018_v49 = vadd.f32 %v2017_v17, %v1994_v1 }
 0x3d0   :  { %v2019_v54 = vmul.f32 %v2014_v11, %v2014_v11  ;;  %v2020_v35 = vmul.f32 %v2018_v49, %v2018_v49 }
 0x3d2   :  { %v2021_v61 = vadd.f32 %v2020_v35, %v2019_v54 }
 0x3d4   :  { %v2022_v23 = vmax.f32 %v3226_v18, %v2021_v61 }
 0x3d6   :  { %2233 = vrsqrt.f32 %v2022_v23  ;;  %vm2029_vm12 = vweird.f32 %v2022_v23 }
 0x3dc   :  { %v2234_v39 = vpop.eup %2233 }
 0x3dd   :  { %v2024_v52 = vmul.f32 %v2234_v39, %v2022_v23  ;;  %vm2030_vm13 = vweird.f32 %v2234_v39 }
 0x3de   :  { %vm2031_vm14 = vmor %vm2029_vm12, %vm2030_vm13 }
 0x3df   :  { %v2025_v3 = vmul.f32 %v2234_v39, %v2024_v52 }
 0x3e1   :  { %v2026_v34 = vmul.f32 0.5, %v2025_v3 }
 0x3e3   :  { %v2027_v57 = vsub.f32 1.5, %v2026_v34 }
 0x3e5   :  { %v2028_v9 = vmul.f32 %v2234_v39, %v2027_v57 }
 0x3e7   :  { %v2032_v60 = vsel %vm2031_vm14, %v2234_v39, %v2028_v9 }
 0x3e8   :  { %v2033_v46 = vmul.f32 %v2032_v60, %v2460_v21 }
 0x3ea   :  { %v2034_v24 = vmin.f32 %v2033_v46, 1.0 }
 0x3ec   :  { %v2035_v18 = vmul.f32 %v2034_v24, %v2014_v11  ;;  %v2036_v41 = vmul.f32 %v2034_v24, %v2018_v49 }
 0x3ee   :  { %2038 = vst [vmem:[#allocation10 + $0x28] sm:$0xff] %v2035_v18 }
 0x3ef   :  { %2040 = vst [vmem:[#allocation10 + $0x58] sm:$0xff] %v2036_v41 }
 0x3f0   :  { %2061 = dma.vmem_to_hbm [thread:$0]  %s2054_s23, 4608, %s2056_s26, [#allocation4], %s2377_s29, %s2377_s29, %s2378_s30  }
 0x3f1   :  { %2374 = dma.done.wait [#allocation4], 4608  }
 0x3f2   :  { %2375 = vsyncadd [#allocation4], 4294962688 }
 0x3f3   :  { %2066 = vsyncpa [#allocation3], 1 }
 0x3f4   :  { %2067 = vsyncpa [#allocation8], 1 }
 0x3f5   :  { %2068 = vsyncpa [#allocation4], 1 }
 0x3f6   :  { %2069 = vsyncpa [#allocation5], 1 }

</bundles_post_ra>
